<compile_context>
chip_gen: v5e
topology: v5e:2x2
jax: 0.10.0
libtpu: 0.0.40
codegen_flags: <defaults>
</compile_context>

<pallas_src>
import functools

import jax
import jax.numpy as jnp
from jax.experimental import pallas as pl
from jax.experimental.pallas import tpu as pltpu

DIM = 512  # matches the module-level constant in aelego.py


def _round_up(n, m):
    return ((n + m - 1) // m) * m


def _pick_tile_px(hw, cap=1024):
    """Pixel tile along the lane dim: multiple of 128 dividing hw, else full extent."""
    if hw <= cap:
        return hw
    if hw % 128 == 0:
        t = cap - cap % 128
        for cand in range(t, 127, -128):
            if hw % cand == 0:
                return cand
        return 128
    return hw  # block == full array dim is always legal


def gencoder_kernel(x_ref, ctx_ref, u_ref,
                    wc_ref, bc_ref,            # encoder: 1x1 conv weight^T (bf16) / bias (f32)
                    w1h_ref, w1c_ref, b1_ref,  # Neck.context_projection (split by concat half)
                    w2_ref, b2_ref,            # Neck.latent_projection (row-padded)
                    g_ref,                     # block-diagonal categorical-group matrix
                    p_ref, q_ref,              # outputs (row-padded column vectors)
                    acc_ref,                   # (DIM, 1) f32 pooled-sum accumulator
                    *, inv_hw, inv_temp):
    f32 = jnp.float32
    bf16 = jnp.bfloat16
    t = pl.program_id(1)

    @pl.when(t == 0)
    def _():
        acc_ref[...] = jnp.zeros_like(acc_ref)

    # --- encoder: 1x1 conv == per-pixel channel matmul (bf16 MXU, f32 acc) + bias + ReLU,
    # immediately reduced over the pixel tile (AdaptiveAvgPool2d accumulation).
    xt = x_ref[0].astype(bf16)                                             # (Cin, tile_px)
    feat = jnp.dot(wc_ref[...], xt, preferred_element_type=f32)            # (DIM, tile_px)
    feat = jnp.maximum(feat + bc_ref[...], 0.0)
    acc_ref[...] += jnp.sum(feat, axis=1, keepdims=True)                   # (DIM, 1)

    @pl.when(t == pl.num_programs(1) - 1)
    def _():
        h = (acc_ref[...] * inv_hw).astype(bf16)                           # pooled mean, (DIM,1)

        # Neck.context_projection: Linear(semantic+DIM, DIM)(cat(h, ctx)) + ReLU, written as
        # the split matvec  W.T[:, :DIM] @ h + W.T[:, DIM:] @ ctx  (column-vector form).
        h1 = (jnp.dot(w1h_ref[...], h, preferred_element_type=f32)
              + jnp.dot(w1c_ref[...], ctx_ref[0].astype(bf16), preferred_element_type=f32)
              + b1_ref[...])
        h1 = jnp.maximum(h1, 0.0)

        # Neck.latent_projection -> logits (LK_pad, 1); padded rows have zero w2/b2.
        logits = (jnp.dot(w2_ref[...], h1.astype(bf16), preferred_element_type=f32)
                  + b2_ref[...])

        # softmax over contiguous groups of `categorical_dim` rows.  g_ref is the
        # precomputed block-diagonal group matrix, so a single small matmul yields each
        # row's group denominator; subtracting the per-column global max is exact
        # (a constant cancels inside every group).
        def grouped_softmax(z):
            m = jnp.max(z, axis=0, keepdims=True)
            e = jnp.exp(z - m)
            denom = jnp.dot(g_ref[...], e, preferred_element_type=f32)
            return e * pl.reciprocal(denom, approx=True)

        # q = softmax(logits.view(B, L, K), dim=-1).view(B, L*K)
        q_ref[0] = grouped_softmax(logits)

        # p = gumbel_softmax(logits, T): add Gumbel(0,1) noise, scale by 1/T, softmax.
        gum = -jnp.log(-jnp.log(u_ref[0] + 1e-10) + 1e-10)
        p_ref[0] = grouped_softmax((logits + gum) * inv_temp)


def gencoder_forward(params, x_nchw, context, noise_u, temperature,
                     latent_dim, categorical_dim, *, tile_px=None):
    B, Cin, H, W = x_nchw.shape
    HW = H * W
    S = context.shape[1]
    LK = latent_dim * categorical_dim
    LK_pad = _round_up(LK, 128)      # tile-aligned logits / outputs

    if tile_px is None:
        tile_px = _pick_tile_px(HW)
    assert HW % tile_px == 0, (HW, tile_px)
    T = HW // tile_px

    # --- x stays in native NCHW: collapsing the trailing spatial dims is a free reshape,
    # so the kernel reads the activation straight from HBM exactly once (f32, no pad pass).
    x3 = x_nchw.reshape(B, Cin, HW)

    # Weights are tiny; transpose/cast them in the wrapper (column-vector convention).
    wcT = params["wc"].T.astype(jnp.bfloat16)                              # (DIM, Cin)
    bc = params["bc"].reshape(DIM, 1).astype(jnp.float32)
    w1hT = params["w1h"].T.astype(jnp.bfloat16)                            # (DIM, DIM)
    w1cT = params["w1c"].T.astype(jnp.bfloat16)                            # (DIM, S)
    b1 = params["b1"].reshape(DIM, 1).astype(jnp.float32)
    w2T = jnp.pad(params["w2"].T, ((0, LK_pad - LK), (0, 0))).astype(jnp.bfloat16)
    b2 = jnp.pad(params["b2"].reshape(LK, 1),
                 ((0, LK_pad - LK), (0, 0))).astype(jnp.float32)

    # block-diagonal "same categorical group" matrix, hoisted out of the kernel.
    grp = jnp.arange(LK_pad, dtype=jnp.int32) // categorical_dim
    gmat = (grp[:, None] == grp[None, :]).astype(jnp.float32)              # (LK_pad, LK_pad)

    ctx3 = context.reshape(B, S, 1).astype(jnp.float32)
    u2 = noise_u.reshape(B, LK).astype(jnp.float32)
    u3 = jnp.pad(u2, ((0, 0), (0, LK_pad - LK)),
                 constant_values=0.5).reshape(B, LK_pad, 1)                # pad stays finite

    kernel = functools.partial(gencoder_kernel,
                               inv_hw=1.0 / float(HW),
                               inv_temp=1.0 / float(temperature))

    wspec = lambda b, t: (0, 0)
    in_specs = [
        pl.BlockSpec((1, Cin, tile_px), lambda b, t: (b, 0, t)),   # x (pixel-tiled, native layout)
        pl.BlockSpec((1, S, 1), lambda b, t: (b, 0, 0)),           # context (column)
        pl.BlockSpec((1, LK_pad, 1), lambda b, t: (b, 0, 0)),      # gumbel uniforms (column)
        pl.BlockSpec((DIM, Cin), wspec),                           # wc^T
        pl.BlockSpec((DIM, 1), wspec),                             # bc
        pl.BlockSpec((DIM, DIM), wspec),                           # w1h^T
        pl.BlockSpec((DIM, S), wspec),                             # w1c^T
        pl.BlockSpec((DIM, 1), wspec),                             # b1
        pl.BlockSpec((LK_pad, DIM), wspec),                        # w2^T
        pl.BlockSpec((LK_pad, 1), wspec),                          # b2
        pl.BlockSpec((LK_pad, LK_pad), wspec),                     # group matrix
    ]
    out_specs = (pl.BlockSpec((1, LK_pad, 1), lambda b, t: (b, 0, 0)),
                 pl.BlockSpec((1, LK_pad, 1), lambda b, t: (b, 0, 0)))

    p3, q3 = pl.pallas_call(
        kernel,
        out_shape=(jax.ShapeDtypeStruct((B, LK_pad, 1), jnp.float32),
                   jax.ShapeDtypeStruct((B, LK_pad, 1), jnp.float32)),
        grid=(B, T),
        in_specs=in_specs,
        out_specs=out_specs,
        scratch_shapes=[pltpu.VMEM((DIM, 1), jnp.float32)],
        compiler_params=pltpu.CompilerParams(
            dimension_semantics=("parallel", "arbitrary"),
            vmem_limit_bytes=32 * 1024 * 1024),
    )(x3, ctx3, u3, wcT, bc, w1hT, w1cT, b1, w2T, b2, gmat)

    return p3[:, :LK, 0], q3[:, :LK, 0]


def init_params(key, cin, semantic_dim, latent_dim, categorical_dim):
    LK = latent_dim * categorical_dim
    ks = jax.random.split(key, 6)
    wc = jax.random.normal(ks[0], (cin, DIM), jnp.float32) / jnp.sqrt(cin).astype(jnp.float32)
    bc = jax.random.normal(ks[1], (1, DIM), jnp.float32) * 0.01
    w1 = jax.random.normal(ks[2], (DIM + semantic_dim, DIM), jnp.float32) / jnp.sqrt(
        jnp.float32(DIM + semantic_dim))
    b1 = jax.random.normal(ks[3], (1, DIM), jnp.float32) * 0.01
    w2 = jax.random.normal(ks[4], (DIM, LK), jnp.float32) / jnp.sqrt(jnp.float32(DIM))
    b2 = jax.random.normal(ks[5], (1, LK), jnp.float32) * 0.01
    return dict(wc=wc, bc=bc, w1h=w1[:DIM], w1c=w1[DIM:], b1=b1, w2=w2, b2=b2)


def reference_forward(params, x_nchw, context, u, temperature, latent_dim, categorical_dim):
    """Pure-JAX f32 reference mirroring the PyTorch forward pass."""
    B, Cin, H, W = x_nchw.shape
    x = jnp.transpose(x_nchw, (0, 2, 3, 1)).reshape(B, H * W, Cin)
    # TODO(synk): GEncoder wraps an arbitrary `encoder` nn.Module (Neck consumes
    # encoder(x)[-1]); a 1x1-conv(C->DIM)+ReLU stand-in is used here since the real
    # encoder is not specified.
    feat = jax.nn.relu(jnp.einsum('bpc,cd->bpd', x, params["wc"]) + params["bc"])
    h = jnp.mean(feat, axis=1)                                        # AdaptiveAvgPool2d+Flatten
    h = jax.nn.relu(h @ params["w1h"] + context @ params["w1c"] + params["b1"])
    logits = (h @ params["w2"] + params["b2"]).reshape(B, latent_dim, categorical_dim)
    q = jax.nn.softmax(logits, axis=-1).reshape(B, -1)
    eps = 1e-10
    g = -jnp.log(-jnp.log(u + eps) + eps)
    p = jax.nn.softmax((logits + g) / temperature, axis=-1).reshape(B, -1)
    return p, q


if __name__ == "__main__":
    # small shapes consistent with the module's forward (HW=256 -> 2 pixel tiles of 128)
    B, Cin, H, W = 2, 4, 16, 16
    latent_dim, categorical_dim, semantic_dim = 4, 8, 8
    temperature = 0.7

    key = jax.random.PRNGKey(0)
    kx, kc, ku, kp = jax.random.split(key, 4)
    x = jax.random.normal(kx, (B, Cin, H, W), jnp.float32)            # NCHW, like PyTorch
    context = jax.random.normal(kc, (B, semantic_dim), jnp.float32)
    # TODO(synk): torch.rand's RNG stream has no JAX equivalent; the Gumbel uniforms are
    # drawn deterministically with jax.random instead (same distribution / same transform).
    u = jax.random.uniform(ku, (B, latent_dim, categorical_dim), jnp.float32)
    params = init_params(kp, Cin, semantic_dim, latent_dim, categorical_dim)

    p, q = gencoder_forward(params, x, context, u, temperature,
                            latent_dim, categorical_dim, tile_px=128)
    p, q = jax.block_until_ready((p, q))

    # sanity: each categorical group must sum to 1 (approx reciprocal -> loose tol)
    psum = p.reshape(B, latent_dim, categorical_dim).sum(-1)
    qsum = q.reshape(B, latent_dim, categorical_dim).sum(-1)
    assert jnp.allclose(psum, 1.0, atol=1e-2), float(jnp.max(jnp.abs(psum - 1.0)))
    assert jnp.allclose(qsum, 1.0, atol=1e-2), float(jnp.max(jnp.abs(qsum - 1.0)))

    # numeric check against the pure-f32 reference; kernel matmuls run with bf16 operands
    # (f32 accumulation), so the tolerance is a bit wider than an f32-only version.
    p_ref, q_ref = reference_forward(params, x, context, u, temperature,
                                     latent_dim, categorical_dim)
    assert jnp.allclose(q, q_ref, atol=3e-2), float(jnp.max(jnp.abs(q - q_ref)))
    assert jnp.allclose(p, p_ref, atol=3e-2), float(jnp.max(jnp.abs(p - p_ref)))

    print("KERNEL_OK")
</pallas_src>

<mosaic_0001>
module attributes {stable_mosaic.version = 11 : i64} {
  func.func @gencoder_kernel(%arg0: i32, %arg1: i32, %arg2: memref<1x4x128xf32, #tpu.memory_space<vmem>>, %arg3: memref<1x8x1xf32, #tpu.memory_space<vmem>>, %arg4: memref<1x128x1xf32, #tpu.memory_space<vmem>>, %arg5: memref<512x4xbf16, #tpu.memory_space<vmem>>, %arg6: memref<512x1xf32, #tpu.memory_space<vmem>>, %arg7: memref<512x512xbf16, #tpu.memory_space<vmem>>, %arg8: memref<512x8xbf16, #tpu.memory_space<vmem>>, %arg9: memref<512x1xf32, #tpu.memory_space<vmem>>, %arg10: memref<128x512xbf16, #tpu.memory_space<vmem>>, %arg11: memref<128x1xf32, #tpu.memory_space<vmem>>, %arg12: memref<128x128xf32, #tpu.memory_space<vmem>>, %arg13: memref<1x128x1xf32, #tpu.memory_space<vmem>>, %arg14: memref<1x128x1xf32, #tpu.memory_space<vmem>>, %arg15: memref<512x1xf32, #tpu.memory_space<vmem>>) attributes {dimension_semantics = [#tpu.dimension_semantics<parallel>, #tpu.dimension_semantics<arbitrary>], iteration_bounds = array<i64: 2, 2>, scalar_prefetch = 0 : i64, scratch_operands = 1 : i64, tpu.core_type = #tpu.core_type<tc>, window_params = [{transform_indices = @transform_0, window_bounds = array<i64: 1, 4, 128>}, {transform_indices = @transform_1, window_bounds = array<i64: 1, 8, 1>}, {transform_indices = @transform_2, window_bounds = array<i64: 1, 128, 1>}, {pipeline_mode = #tpu.pipeline_mode<synchronous>, transform_indices = @transform_3, window_bounds = array<i64: 512, 4>}, {pipeline_mode = #tpu.pipeline_mode<synchronous>, transform_indices = @transform_4, window_bounds = array<i64: 512, 1>}, {pipeline_mode = #tpu.pipeline_mode<synchronous>, transform_indices = @transform_5, window_bounds = array<i64: 512, 512>}, {pipeline_mode = #tpu.pipeline_mode<synchronous>, transform_indices = @transform_6, window_bounds = array<i64: 512, 8>}, {pipeline_mode = #tpu.pipeline_mode<synchronous>, transform_indices = @transform_7, window_bounds = array<i64: 512, 1>}, {pipeline_mode = #tpu.pipeline_mode<synchronous>, transform_indices = @transform_8, window_bounds = array<i64: 128, 512>}, {pipeline_mode = #tpu.pipeline_mode<synchronous>, transform_indices = @transform_9, window_bounds = array<i64: 128, 1>}, {pipeline_mode = #tpu.pipeline_mode<synchronous>, transform_indices = @transform_10, window_bounds = array<i64: 128, 128>}, {transform_indices = @transform_11, window_bounds = array<i64: 1, 128, 1>}, {transform_indices = @transform_12, window_bounds = array<i64: 1, 128, 1>}]} {
    %c0_i32 = arith.constant 0 : i32
    %0 = arith.cmpi eq, %arg1, %c0_i32 : i32
    %1 = arith.extui %0 : i1 to i32
    %c0_i32_0 = arith.constant 0 : i32
    %2 = arith.cmpi ne, %1, %c0_i32_0 : i32
    scf.if %2 {
      %cst_14 = arith.constant 0.000000e+00 : f32
      %21 = vector.broadcast %cst_14 : f32 to vector<512x1xf32>
      %c0_15 = arith.constant 0 : index
      %c0_16 = arith.constant 0 : index
      %22 = vector.load %arg15[%c0_15, %c0_16] : memref<512x1xf32, #tpu.memory_space<vmem>>, vector<512x1xf32>
      tpu.vector_store %arg15[%c0_15, %c0_16], %21 {strides = array<i32>} : memref<512x1xf32, #tpu.memory_space<vmem>>, vector<512x1xf32>,
    } else {
    }
    %c0 = arith.constant 0 : index
    %c0_1 = arith.constant 0 : index
    %c0_2 = arith.constant 0 : index
    %3 = vector.load %arg2[%c0, %c0_1, %c0_2] : memref<1x4x128xf32, #tpu.memory_space<vmem>>, vector<1x4x128xf32>
    %4 = vector.shape_cast %3 : vector<1x4x128xf32> to vector<4x128xf32>
    %5 = arith.truncf %4 : vector<4x128xf32> to vector<4x128xbf16>
    %c0_3 = arith.constant 0 : index
    %c0_4 = arith.constant 0 : index
    %6 = vector.load %arg5[%c0_3, %c0_4] : memref<512x4xbf16, #tpu.memory_space<vmem>>, vector<512x4xbf16>
    %cst = arith.constant dense<0.000000e+00> : vector<512x128xf32>
    %7 = tpu.matmul %6, %5, %cst {dimension_numbers = #tpu.dot_dimension_numbers<[1], [0], [0], [1], [0, 0, 1, 1], [], []>} : vector<512x4xbf16>, vector<4x128xbf16>, vector<512x128xf32> -> vector<512x128xf32>
    %c0_5 = arith.constant 0 : index
    %c0_6 = arith.constant 0 : index
    %8 = vector.load %arg6[%c0_5, %c0_6] : memref<512x1xf32, #tpu.memory_space<vmem>>, vector<512x1xf32>
    %9 = vector.broadcast %8 : vector<512x1xf32> to vector<512x128xf32>
    %10 = arith.addf %7, %9 : vector<512x128xf32>
    %cst_7 = arith.constant 0.000000e+00 : f32
    %11 = vector.broadcast %cst_7 : f32 to vector<512x128xf32>
    %12 = arith.maximumf %10, %11 : vector<512x128xf32>
    %c0_8 = arith.constant 0 : index
    %c0_9 = arith.constant 0 : index
    %13 = vector.load %arg15[%c0_8, %c0_9] : memref<512x1xf32, #tpu.memory_space<vmem>>, vector<512x1xf32>
    %cst_10 = arith.constant dense<0.000000e+00> : vector<512xf32>
    %14 = vector.multi_reduction <add>, %12, %cst_10 [1] : vector<512x128xf32> to vector<512xf32>
    %15 = vector.shape_cast %14 : vector<512xf32> to vector<512x1xf32>
    %16 = arith.addf %13, %15 : vector<512x1xf32>
    %c0_11 = arith.constant 0 : index
    %c0_12 = arith.constant 0 : index
    %17 = vector.load %arg15[%c0_11, %c0_12] : memref<512x1xf32, #tpu.memory_space<vmem>>, vector<512x1xf32>
    tpu.vector_store %arg15[%c0_11, %c0_12], %16 {strides = array<i32>} : memref<512x1xf32, #tpu.memory_space<vmem>>, vector<512x1xf32>,
    %c1_i32 = arith.constant 1 : i32
    %18 = arith.cmpi eq, %arg1, %c1_i32 : i32
    %19 = arith.extui %18 : i1 to i32
    %c0_i32_13 = arith.constant 0 : i32
    %20 = arith.cmpi ne, %19, %c0_i32_13 : i32
    scf.if %20 {
      %c0_14 = arith.constant 0 : index
      %c0_15 = arith.constant 0 : index
      %21 = vector.load %arg15[%c0_14, %c0_15] : memref<512x1xf32, #tpu.memory_space<vmem>>, vector<512x1xf32>
      %cst_16 = arith.constant 3.906250e-03 : f32
      %22 = vector.broadcast %cst_16 : f32 to vector<512x1xf32>
      %23 = arith.mulf %21, %22 : vector<512x1xf32>
      %24 = arith.truncf %23 : vector<512x1xf32> to vector<512x1xbf16>
      %c0_17 = arith.constant 0 : index
      %c0_18 = arith.constant 0 : index
      %25 = vector.load %arg7[%c0_17, %c0_18] : memref<512x512xbf16, #tpu.memory_space<vmem>>, vector<512x512xbf16>
      %cst_19 = arith.constant dense<0.000000e+00> : vector<512x1xf32>
      %26 = tpu.matmul %25, %24, %cst_19 {dimension_numbers = #tpu.dot_dimension_numbers<[1], [0], [0], [1], [0, 0, 1, 1], [], []>} : vector<512x512xbf16>, vector<512x1xbf16>, vector<512x1xf32> -> vector<512x1xf32>
      %c0_20 = arith.constant 0 : index
      %c0_21 = arith.constant 0 : index
      %27 = vector.load %arg8[%c0_20, %c0_21] : memref<512x8xbf16, #tpu.memory_space<vmem>>, vector<512x8xbf16>
      %c0_22 = arith.constant 0 : index
      %c0_23 = arith.constant 0 : index
      %c0_24 = arith.constant 0 : index
      %28 = vector.load %arg3[%c0_22, %c0_23, %c0_24] : memref<1x8x1xf32, #tpu.memory_space<vmem>>, vector<1x8x1xf32>
      %29 = vector.shape_cast %28 : vector<1x8x1xf32> to vector<8x1xf32>
      %30 = arith.truncf %29 : vector<8x1xf32> to vector<8x1xbf16>
      %cst_25 = arith.constant dense<0.000000e+00> : vector<512x1xf32>
      %31 = tpu.matmul %27, %30, %cst_25 {dimension_numbers = #tpu.dot_dimension_numbers<[1], [0], [0], [1], [0, 0, 1, 1], [], []>} : vector<512x8xbf16>, vector<8x1xbf16>, vector<512x1xf32> -> vector<512x1xf32>
      %32 = arith.addf %26, %31 : vector<512x1xf32>
      %c0_26 = arith.constant 0 : index
      %c0_27 = arith.constant 0 : index
      %33 = vector.load %arg9[%c0_26, %c0_27] : memref<512x1xf32, #tpu.memory_space<vmem>>, vector<512x1xf32>
      %34 = arith.addf %32, %33 : vector<512x1xf32>
      %cst_28 = arith.constant 0.000000e+00 : f32
      %35 = vector.broadcast %cst_28 : f32 to vector<512x1xf32>
      %36 = arith.maximumf %34, %35 : vector<512x1xf32>
      %c0_29 = arith.constant 0 : index
      %c0_30 = arith.constant 0 : index
      %37 = vector.load %arg10[%c0_29, %c0_30] : memref<128x512xbf16, #tpu.memory_space<vmem>>, vector<128x512xbf16>
      %38 = arith.truncf %36 : vector<512x1xf32> to vector<512x1xbf16>
      %cst_31 = arith.constant dense<0.000000e+00> : vector<128x1xf32>
      %39 = tpu.matmul %37, %38, %cst_31 {dimension_numbers = #tpu.dot_dimension_numbers<[1], [0], [0], [1], [0, 0, 1, 1], [], []>} : vector<128x512xbf16>, vector<512x1xbf16>, vector<128x1xf32> -> vector<128x1xf32>
      %c0_32 = arith.constant 0 : index
      %c0_33 = arith.constant 0 : index
      %40 = vector.load %arg11[%c0_32, %c0_33] : memref<128x1xf32, #tpu.memory_space<vmem>>, vector<128x1xf32>
      %41 = arith.addf %39, %40 : vector<128x1xf32>
      %cst_34 = arith.constant dense<0xFF800000> : vector<1xf32>
      %42 = vector.multi_reduction <maximumf>, %41, %cst_34 [0] : vector<128x1xf32> to vector<1xf32>
      %43 = vector.shape_cast %42 : vector<1xf32> to vector<1x1xf32>
      %44 = vector.broadcast %43 : vector<1x1xf32> to vector<128x1xf32>
      %45 = arith.subf %41, %44 : vector<128x1xf32>
      %46 = math.exp %45 : vector<128x1xf32>
      %c0_35 = arith.constant 0 : index
      %c0_36 = arith.constant 0 : index
      %47 = vector.load %arg12[%c0_35, %c0_36] : memref<128x128xf32, #tpu.memory_space<vmem>>, vector<128x128xf32>
      %cst_37 = arith.constant dense<0.000000e+00> : vector<128x1xf32>
      %48 = tpu.matmul %47, %46, %cst_37 {dimension_numbers = #tpu.dot_dimension_numbers<[1], [0], [0], [1], [0, 0, 1, 1], [], []>} : vector<128x128xf32>, vector<128x1xf32>, vector<128x1xf32> -> vector<128x1xf32>
      %49 = tpu.reciprocal %48 {approx = true} : vector<128x1xf32> -> vector<128x1xf32>
      %50 = arith.mulf %46, %49 : vector<128x1xf32>
      %c0_38 = arith.constant 0 : index
      %c0_39 = arith.constant 0 : index
      %c0_40 = arith.constant 0 : index
      %51 = vector.load %arg14[%c0_38, %c0_39, %c0_40] : memref<1x128x1xf32, #tpu.memory_space<vmem>>, vector<1x128x1xf32>
      %52 = vector.shape_cast %51 : vector<1x128x1xf32> to vector<128x1xf32>
      %53 = vector.shape_cast %50 : vector<128x1xf32> to vector<1x128x1xf32>
      tpu.vector_store %arg14[%c0_38, %c0_39, %c0_40], %53 {strides = array<i32>} : memref<1x128x1xf32, #tpu.memory_space<vmem>>, vector<1x128x1xf32>,
      %c0_41 = arith.constant 0 : index
      %c0_42 = arith.constant 0 : index
      %c0_43 = arith.constant 0 : index
      %54 = vector.load %arg4[%c0_41, %c0_42, %c0_43] : memref<1x128x1xf32, #tpu.memory_space<vmem>>, vector<1x128x1xf32>
      %55 = vector.shape_cast %54 : vector<1x128x1xf32> to vector<128x1xf32>
      %cst_44 = arith.constant 1.000000e-10 : f32
      %56 = vector.broadcast %cst_44 : f32 to vector<128x1xf32>
      %57 = arith.addf %55, %56 : vector<128x1xf32>
      %58 = math.log %57 : vector<128x1xf32>
      %cst_45 = arith.constant 0.000000e+00 : f32
      %59 = vector.broadcast %cst_45 : f32 to vector<128x1xf32>
      %60 = arith.subf %59, %58 : vector<128x1xf32>
      %cst_46 = arith.constant 1.000000e-10 : f32
      %61 = vector.broadcast %cst_46 : f32 to vector<128x1xf32>
      %62 = arith.addf %60, %61 : vector<128x1xf32>
      %63 = math.log %62 : vector<128x1xf32>
      %cst_47 = arith.constant 0.000000e+00 : f32
      %64 = vector.broadcast %cst_47 : f32 to vector<128x1xf32>
      %65 = arith.subf %64, %63 : vector<128x1xf32>
      %66 = arith.addf %41, %65 : vector<128x1xf32>
      %cst_48 = arith.constant 1.42857146 : f32
      %67 = vector.broadcast %cst_48 : f32 to vector<128x1xf32>
      %68 = arith.mulf %66, %67 : vector<128x1xf32>
      %cst_49 = arith.constant dense<0xFF800000> : vector<1xf32>
      %69 = vector.multi_reduction <maximumf>, %68, %cst_49 [0] : vector<128x1xf32> to vector<1xf32>
      %70 = vector.shape_cast %69 : vector<1xf32> to vector<1x1xf32>
      %71 = vector.broadcast %70 : vector<1x1xf32> to vector<128x1xf32>
      %72 = arith.subf %68, %71 : vector<128x1xf32>
      %73 = math.exp %72 : vector<128x1xf32>
      %c0_50 = arith.constant 0 : index
      %c0_51 = arith.constant 0 : index
      %74 = vector.load %arg12[%c0_50, %c0_51] : memref<128x128xf32, #tpu.memory_space<vmem>>, vector<128x128xf32>
      %cst_52 = arith.constant dense<0.000000e+00> : vector<128x1xf32>
      %75 = tpu.matmul %74, %73, %cst_52 {dimension_numbers = #tpu.dot_dimension_numbers<[1], [0], [0], [1], [0, 0, 1, 1], [], []>} : vector<128x128xf32>, vector<128x1xf32>, vector<128x1xf32> -> vector<128x1xf32>
      %76 = tpu.reciprocal %75 {approx = true} : vector<128x1xf32> -> vector<128x1xf32>
      %77 = arith.mulf %73, %76 : vector<128x1xf32>
      %c0_53 = arith.constant 0 : index
      %c0_54 = arith.constant 0 : index
      %c0_55 = arith.constant 0 : index
      %78 = vector.load %arg13[%c0_53, %c0_54, %c0_55] : memref<1x128x1xf32, #tpu.memory_space<vmem>>, vector<1x128x1xf32>
      %79 = vector.shape_cast %78 : vector<1x128x1xf32> to vector<128x1xf32>
      %80 = vector.shape_cast %77 : vector<128x1xf32> to vector<1x128x1xf32>
      tpu.vector_store %arg13[%c0_53, %c0_54, %c0_55], %80 {strides = array<i32>} : memref<1x128x1xf32, #tpu.memory_space<vmem>>, vector<1x128x1xf32>,
    } else {
    }
    return
  }
  func.func @transform_0(%arg0: i32, %arg1: i32) -> (i32, i32, i32) {
    %c0_i32 = arith.constant 0 : i32
    %c0_i32_0 = arith.constant 0 : i32
    return %arg0, %c0_i32, %arg1 : i32, i32, i32
  }
  func.func @transform_1(%arg0: i32, %arg1: i32) -> (i32, i32, i32) {
    %c0_i32 = arith.constant 0 : i32
    %c0_i32_0 = arith.constant 0 : i32
    %c0_i32_1 = arith.constant 0 : i32
    return %arg0, %c0_i32, %c0_i32_0 : i32, i32, i32
  }
  func.func @transform_2(%arg0: i32, %arg1: i32) -> (i32, i32, i32) {
    %c0_i32 = arith.constant 0 : i32
    %c0_i32_0 = arith.constant 0 : i32
    %c0_i32_1 = arith.constant 0 : i32
    return %arg0, %c0_i32, %c0_i32_0 : i32, i32, i32
  }
  func.func @transform_3(%arg0: i32, %arg1: i32) -> (i32, i32) {
    %c0_i32 = arith.constant 0 : i32
    %c0_i32_0 = arith.constant 0 : i32
    %c0_i32_1 = arith.constant 0 : i32
    return %c0_i32, %c0_i32_0 : i32, i32
  }
  func.func @transform_4(%arg0: i32, %arg1: i32) -> (i32, i32) {
    %c0_i32 = arith.constant 0 : i32
    %c0_i32_0 = arith.constant 0 : i32
    %c0_i32_1 = arith.constant 0 : i32
    return %c0_i32, %c0_i32_0 : i32, i32
  }
  func.func @transform_5(%arg0: i32, %arg1: i32) -> (i32, i32) {
    %c0_i32 = arith.constant 0 : i32
    %c0_i32_0 = arith.constant 0 : i32
    %c0_i32_1 = arith.constant 0 : i32
    return %c0_i32, %c0_i32_0 : i32, i32
  }
  func.func @transform_6(%arg0: i32, %arg1: i32) -> (i32, i32) {
    %c0_i32 = arith.constant 0 : i32
    %c0_i32_0 = arith.constant 0 : i32
    %c0_i32_1 = arith.constant 0 : i32
    return %c0_i32, %c0_i32_0 : i32, i32
  }
  func.func @transform_7(%arg0: i32, %arg1: i32) -> (i32, i32) {
    %c0_i32 = arith.constant 0 : i32
    %c0_i32_0 = arith.constant 0 : i32
    %c0_i32_1 = arith.constant 0 : i32
    return %c0_i32, %c0_i32_0 : i32, i32
  }
  func.func @transform_8(%arg0: i32, %arg1: i32) -> (i32, i32) {
    %c0_i32 = arith.constant 0 : i32
    %c0_i32_0 = arith.constant 0 : i32
    %c0_i32_1 = arith.constant 0 : i32
    return %c0_i32, %c0_i32_0 : i32, i32
  }
  func.func @transform_9(%arg0: i32, %arg1: i32) -> (i32, i32) {
    %c0_i32 = arith.constant 0 : i32
    %c0_i32_0 = arith.constant 0 : i32
    %c0_i32_1 = arith.constant 0 : i32
    return %c0_i32, %c0_i32_0 : i32, i32
  }
  func.func @transform_10(%arg0: i32, %arg1: i32) -> (i32, i32) {
    %c0_i32 = arith.constant 0 : i32
    %c0_i32_0 = arith.constant 0 : i32
    %c0_i32_1 = arith.constant 0 : i32
    return %c0_i32, %c0_i32_0 : i32, i32
  }
  func.func @transform_11(%arg0: i32, %arg1: i32) -> (i32, i32, i32) {
    %c0_i32 = arith.constant 0 : i32
    %c0_i32_0 = arith.constant 0 : i32
    %c0_i32_1 = arith.constant 0 : i32
    return %arg0, %c0_i32, %c0_i32_0 : i32, i32, i32
  }
  func.func @transform_12(%arg0: i32, %arg1: i32) -> (i32, i32, i32) {
    %c0_i32 = arith.constant 0 : i32
    %c0_i32_0 = arith.constant 0 : i32
    %c0_i32_1 = arith.constant 0 : i32
    return %arg0, %c0_i32, %c0_i32_0 : i32, i32, i32
  }
}

</mosaic_0001>

<bundles_post_ra>
// kernel: tpu_custom_call.1
= control target key start
LH: loop header
LB: loop body
LE: loop exit
PB: predicated region body
PF: predicated region fallthrough
CT: control target
= control target key end

     0   :  { %s6842_s21 = smov 0   ;;  %s6844_s22 = smov 0   ;;  %s10122_s0 = inlined_call_operand.vmem [shape: f32[2,4,256], index: 0, kind: input, shape index: {}]   ;;  %s10123_s1 = inlined_call_operand.vmem [shape: f32[2,8,1], index: 1, kind: input, shape index: {}]   ;;  %s10124_s2 = inlined_call_operand.vmem [shape: f32[2,128,1], index: 2, kind: input, shape index: {}]   ;;  %s10125_s3 = inlined_call_operand.vmem [shape: bf16[512,4], index: 3, kind: input, shape index: {}]   ;;  %s10126_s4 = inlined_call_operand.vmem [shape: f32[512,1], index: 4, kind: input, shape index: {}]   ;;  %s10127_s5 = inlined_call_operand.vmem [shape: bf16[512,512], index: 5, kind: input, shape index: {}]   ;;  %s10128_s6 = inlined_call_operand.vmem [shape: bf16[512,8], index: 6, kind: input, shape index: {}]   ;;  %s10129_s7 = inlined_call_operand.vmem [shape: f32[512,1], index: 7, kind: input, shape index: {}]   ;;  %s10130_s8 = inlined_call_operand.vmem [shape: bf16[128,512], index: 8, kind: input, shape index: {}]   ;;  %s10131_s9 = inlined_call_operand.vmem [shape: f32[128,1], index: 9, kind: input, shape index: {}]   ;;  %s10132_s10 = inlined_call_operand.vmem [shape: f32[128,128], index: 10, kind: input, shape index: {}]   ;;  %s10133_s11 = inlined_call_operand.vmem [shape: f32[2,128,1], index: 11, kind: output, shape index: {0}]   ;;  %s10134_s12 = inlined_call_operand.vmem [shape: f32[2,128,1], index: 12, kind: output, shape index: {1}]  }
   0x1   :  { %10139 = sst [smem:[#allocation38_spill]] %s10132_s10  ;;  %s6846_s23 = smov 0  }
   0x2   :  { %s6848_s24 = smov 0   ;;  %s6850_s25 = smov 0  }
   0x3 LB: > { %10140 = sst [smem:[#allocation3_spill]] %s6765_s23  ;;  %s32_s26 = sadd.s32 1, %s6765_s23  ;;  %s6773_s25 = sphi %s6850_s25, %s23_s25   ;;  %s6769_s24 = sphi %s6848_s24, %s10210_s24   ;;  %s6765_s23 = sphi %s6846_s23, %s10209_s23   ;;  %s6761_s22 = sphi %s6844_s22, %s10208_s22   ;;  %s6757_s21 = sphi %s6842_s21, %s10207_s21  }
   0x4   : > { %10141 = sst [smem:[#allocation4_spill]] %s6769_s24  ;;  %s35_s27 = sadd.s32 1, %s6769_s24 }
   0x5   : > { %10142 = sst [smem:[#allocation5_spill]] %s6773_s25  ;;  %p33_p0 = scmp.ge.s32.totalorder %s32_s26, 2 }
   0x6   : > { %p5291_p1 = scmp.ge.s32.totalorder %s6773_s25, 1  ;;  %p401_p2 = scmp.lt.s32.totalorder %s6773_s25, 5 }
   0x7   : > { %s10212_s26 = smov (%p33_p0, %s32_s26), 0  ;;  %s10214_s27 = smov (!%p33_p0, %s35_s27), %s6769_s24 }
   0x8   : > { %10143 = sst [smem:[#allocation6_spill]] %s10212_s26  ;;  %p402_p3 = pnand %p5291_p1, %p401_p2 }
   0x9   : > { %p37_p4 = scmp.ge.s32.totalorder %s10214_s27, 2  ;;  %p460_p5 = scmp.lt.s32.totalorder (!%p402_p3), %s6761_s22, 1 }
   0xa   : > { %405 = sbr.rel (%p402_p3) target bundleno = 2173 (0x87d), region = 64  ;;  %p462_p6 = scmp.lt.s32.totalorder (!%p402_p3), %s6757_s21, 1 }
   0xb   : > { %s10216_s27 = smov (%p37_p4, %s10214_s27), 0  ;;  %p5301_p7 = scmp.ne.s32.totalorder (!%p402_p3), %s6757_s21, 0 }
   0xc   : > { %10144 = sst [smem:[#allocation7_spill]] %s10216_s27 }
   0xf   : > { %s10218_s22 = smov (!%p460_p5, %s6761_s22), 1 }
  0x10   : > { %s463_s28 = scalar_select %p462_p6, %s6757_s21, 1 }
  0x11   : > { %s5292_s29 = sshll.u32 %s10218_s22, 1  ;;  %s5294_s30 = sshll.u32 %s10218_s22, 3 }
  0x12   : > { %s465_s13 = sadd.s32 %s5292_s29, %s463_s28  ;;  %s6879_s16 = scalar_lea.vmem %s10123_s1, %s5294_s30 }
  0x13   : > { %s5293_s17 = sshll.u32 %s465_s13, 2  ;;  %s6265_s18 = sshll.u32 %s10218_s22, 7 }
  0x14   : > { %s6884_s27 = scalar_lea.vmem %s10122_s0, %s5293_s17  ;;  %s6889_s23 = scalar_lea.vmem %s10124_s2, %s6265_s18 }
  0x15   : > { %s6894_s28 = scalar_lea.vmem %s10133_s11, %s6265_s18  ;;  %s6899_s13 = scalar_lea.vmem %s10134_s12, %s6265_s18 }
  0x16   : > { %491 = sbr.rel (%p5301_p7) target bundleno = 92 (0x5c), region = 68 }
  0x1b   : > { %vm492_vm0 = vcmask 7168   ;;  %v6775_v0 = vmov 0.0  }
  0x1c   : > { %493 = vst.msk [vmem:[#allocation2] sm:$0xff] %vm492_vm0, %v6775_v0 }
  0x1d   : > { %494 = vst.msk [vmem:[#allocation2 + $0x8] sm:$0xff] %vm492_vm0, %v6775_v0 }
  0x1e   : > { %495 = vst.msk [vmem:[#allocation2 + $0x10] sm:$0xff] %vm492_vm0, %v6775_v0 }
  0x1f   : > { %496 = vst.msk [vmem:[#allocation2 + $0x18] sm:$0xff] %vm492_vm0, %v6775_v0 }
  0x20   : > { %497 = vst.msk [vmem:[#allocation2 + $0x20] sm:$0xff] %vm492_vm0, %v6775_v0 }
  0x21   : > { %498 = vst.msk [vmem:[#allocation2 + $0x28] sm:$0xff] %vm492_vm0, %v6775_v0 }
  0x22   : > { %499 = vst.msk [vmem:[#allocation2 + $0x30] sm:$0xff] %vm492_vm0, %v6775_v0 }
  0x23   : > { %500 = vst.msk [vmem:[#allocation2 + $0x38] sm:$0xff] %vm492_vm0, %v6775_v0 }
  0x24   : > { %501 = vst.msk [vmem:[#allocation2 + $0x40] sm:$0xff] %vm492_vm0, %v6775_v0 }
  0x25   : > { %502 = vst.msk [vmem:[#allocation2 + $0x48] sm:$0xff] %vm492_vm0, %v6775_v0 }
  0x26   : > { %503 = vst.msk [vmem:[#allocation2 + $0x50] sm:$0xff] %vm492_vm0, %v6775_v0 }
  0x27   : > { %504 = vst.msk [vmem:[#allocation2 + $0x58] sm:$0xff] %vm492_vm0, %v6775_v0 }
  0x28   : > { %505 = vst.msk [vmem:[#allocation2 + $0x60] sm:$0xff] %vm492_vm0, %v6775_v0 }
  0x29   : > { %506 = vst.msk [vmem:[#allocation2 + $0x68] sm:$0xff] %vm492_vm0, %v6775_v0 }
  0x2a   : > { %507 = vst.msk [vmem:[#allocation2 + $0x70] sm:$0xff] %vm492_vm0, %v6775_v0 }
  0x2b   : > { %508 = vst.msk [vmem:[#allocation2 + $0x78] sm:$0xff] %vm492_vm0, %v6775_v0 }
  0x2c   : > { %509 = vst.msk [vmem:[#allocation2 + $0x80] sm:$0xff] %vm492_vm0, %v6775_v0 }
  0x2d   : > { %510 = vst.msk [vmem:[#allocation2 + $0x88] sm:$0xff] %vm492_vm0, %v6775_v0 }
  0x2e   : > { %511 = vst.msk [vmem:[#allocation2 + $0x90] sm:$0xff] %vm492_vm0, %v6775_v0 }
  0x2f   : > { %512 = vst.msk [vmem:[#allocation2 + $0x98] sm:$0xff] %vm492_vm0, %v6775_v0 }
  0x30   : > { %513 = vst.msk [vmem:[#allocation2 + $0xa0] sm:$0xff] %vm492_vm0, %v6775_v0 }
  0x31   : > { %514 = vst.msk [vmem:[#allocation2 + $0xa8] sm:$0xff] %vm492_vm0, %v6775_v0 }
  0x32   : > { %515 = vst.msk [vmem:[#allocation2 + $0xb0] sm:$0xff] %vm492_vm0, %v6775_v0 }
  0x33   : > { %516 = vst.msk [vmem:[#allocation2 + $0xb8] sm:$0xff] %vm492_vm0, %v6775_v0 }
  0x34   : > { %517 = vst.msk [vmem:[#allocation2 + $0xc0] sm:$0xff] %vm492_vm0, %v6775_v0 }
  0x35   : > { %518 = vst.msk [vmem:[#allocation2 + $0xc8] sm:$0xff] %vm492_vm0, %v6775_v0 }
  0x36   : > { %519 = vst.msk [vmem:[#allocation2 + $0xd0] sm:$0xff] %vm492_vm0, %v6775_v0 }
  0x37   : > { %520 = vst.msk [vmem:[#allocation2 + $0xd8] sm:$0xff] %vm492_vm0, %v6775_v0 }
  0x38   : > { %521 = vst.msk [vmem:[#allocation2 + $0xe0] sm:$0xff] %vm492_vm0, %v6775_v0 }
  0x39   : > { %522 = vst.msk [vmem:[#allocation2 + $0xe8] sm:$0xff] %vm492_vm0, %v6775_v0 }
  0x3a   : > { %523 = vst.msk [vmem:[#allocation2 + $0xf0] sm:$0xff] %vm492_vm0, %v6775_v0 }
  0x3b   : > { %524 = vst.msk [vmem:[#allocation2 + $0xf8] sm:$0xff] %vm492_vm0, %v6775_v0 }
  0x3c   : > { %525 = vst.msk [vmem:[#allocation2 + $0x100] sm:$0xff] %vm492_vm0, %v6775_v0 }
  0x3d   : > { %526 = vst.msk [vmem:[#allocation2 + $0x108] sm:$0xff] %vm492_vm0, %v6775_v0 }
  0x3e   : > { %527 = vst.msk [vmem:[#allocation2 + $0x110] sm:$0xff] %vm492_vm0, %v6775_v0 }
  0x3f   : > { %528 = vst.msk [vmem:[#allocation2 + $0x118] sm:$0xff] %vm492_vm0, %v6775_v0 }
  0x40   : > { %529 = vst.msk [vmem:[#allocation2 + $0x120] sm:$0xff] %vm492_vm0, %v6775_v0 }
  0x41   : > { %530 = vst.msk [vmem:[#allocation2 + $0x128] sm:$0xff] %vm492_vm0, %v6775_v0 }
  0x42   : > { %531 = vst.msk [vmem:[#allocation2 + $0x130] sm:$0xff] %vm492_vm0, %v6775_v0 }
  0x43   : > { %532 = vst.msk [vmem:[#allocation2 + $0x138] sm:$0xff] %vm492_vm0, %v6775_v0 }
  0x44   : > { %533 = vst.msk [vmem:[#allocation2 + $0x140] sm:$0xff] %vm492_vm0, %v6775_v0 }
  0x45   : > { %534 = vst.msk [vmem:[#allocation2 + $0x148] sm:$0xff] %vm492_vm0, %v6775_v0 }
  0x46   : > { %535 = vst.msk [vmem:[#allocation2 + $0x150] sm:$0xff] %vm492_vm0, %v6775_v0 }
  0x47   : > { %536 = vst.msk [vmem:[#allocation2 + $0x158] sm:$0xff] %vm492_vm0, %v6775_v0 }
  0x48   : > { %537 = vst.msk [vmem:[#allocation2 + $0x160] sm:$0xff] %vm492_vm0, %v6775_v0 }
  0x49   : > { %538 = vst.msk [vmem:[#allocation2 + $0x168] sm:$0xff] %vm492_vm0, %v6775_v0 }
  0x4a   : > { %539 = vst.msk [vmem:[#allocation2 + $0x170] sm:$0xff] %vm492_vm0, %v6775_v0 }
  0x4b   : > { %540 = vst.msk [vmem:[#allocation2 + $0x178] sm:$0xff] %vm492_vm0, %v6775_v0 }
  0x4c   : > { %541 = vst.msk [vmem:[#allocation2 + $0x180] sm:$0xff] %vm492_vm0, %v6775_v0 }
  0x4d   : > { %542 = vst.msk [vmem:[#allocation2 + $0x188] sm:$0xff] %vm492_vm0, %v6775_v0 }
  0x4e   : > { %543 = vst.msk [vmem:[#allocation2 + $0x190] sm:$0xff] %vm492_vm0, %v6775_v0 }
  0x4f   : > { %544 = vst.msk [vmem:[#allocation2 + $0x198] sm:$0xff] %vm492_vm0, %v6775_v0 }
  0x50   : > { %545 = vst.msk [vmem:[#allocation2 + $0x1a0] sm:$0xff] %vm492_vm0, %v6775_v0 }
  0x51   : > { %546 = vst.msk [vmem:[#allocation2 + $0x1a8] sm:$0xff] %vm492_vm0, %v6775_v0 }
  0x52   : > { %547 = vst.msk [vmem:[#allocation2 + $0x1b0] sm:$0xff] %vm492_vm0, %v6775_v0 }
  0x53   : > { %548 = vst.msk [vmem:[#allocation2 + $0x1b8] sm:$0xff] %vm492_vm0, %v6775_v0 }
  0x54   : > { %549 = vst.msk [vmem:[#allocation2 + $0x1c0] sm:$0xff] %vm492_vm0, %v6775_v0 }
  0x55   : > { %550 = vst.msk [vmem:[#allocation2 + $0x1c8] sm:$0xff] %vm492_vm0, %v6775_v0 }
  0x56   : > { %551 = vst.msk [vmem:[#allocation2 + $0x1d0] sm:$0xff] %vm492_vm0, %v6775_v0 }
  0x57   : > { %552 = vst.msk [vmem:[#allocation2 + $0x1d8] sm:$0xff] %vm492_vm0, %v6775_v0 }
  0x58   : > { %553 = vst.msk [vmem:[#allocation2 + $0x1e0] sm:$0xff] %vm492_vm0, %v6775_v0 }
  0x59   : > { %554 = vst.msk [vmem:[#allocation2 + $0x1e8] sm:$0xff] %vm492_vm0, %v6775_v0 }
  0x5a   : > { %555 = vst.msk [vmem:[#allocation2 + $0x1f0] sm:$0xff] %vm492_vm0, %v6775_v0 }
  0x5b   : > { %556 = vst.msk [vmem:[#allocation2 + $0x1f8] sm:$0xff] %vm492_vm0, %v6775_v0 }
  0x5c PF: > { %v627_v1 = vld [vmem:[%s10126_s4 + $0x20] sm:$0xff]  ;;  %v625_v2 = vld [vmem:[%s10126_s4 + $0x10] sm:$0xff]  ;;  %v6776_v4 = vmov 0   ;;  %vm1264_vm1 = vcmask 1041408   ;;  %vm1167_vm2 = vcmask 31744   ;;  %v628_v12 = vld [vmem:[%s10126_s4 + $0x28] sm:$0xff] }
  0x5d   : > { %v623_v3 = vld [vmem:[%s10126_s4] sm:$0xff]  ;;  %6542 = vset.pattern.permute.xlu2 %v6776_v4  ;;  %6541 = vset.pattern.permute.xlu1 %v6776_v4  ;;  %v626_v13 = vld [vmem:[%s10126_s4 + $0x18] sm:$0xff]  ;;  %v624_v14 = vld [vmem:[%s10126_s4 + $0x8] sm:$0xff]  ;;  %vm1757_vm3 = vcmask 7168   ;;  %p5462_p8 = scmp.ne.s32.totalorder %s6757_s21, 1 }
  0x5e   : > { %v557_v5 = vld [vmem:[%s6884_s27] sm:$0xf]  ;;  %6540 = vset.pattern.permute.xlu0 %v6776_v4  ;;  %709 = vperm.xlu2 %6542, %v627_v1   ;;  %v630_v16 = vld [vmem:[%s10126_s4 + $0x38] sm:$0xff]  ;;  %v629_v17 = vld [vmem:[%s10126_s4 + $0x30] sm:$0xff] }
  0x5f   : > { %v558_v6 = vpack.c.bf16 %v557_v5, %v557_v5  ;;  %699 = vperm.xlu1 %6541, %v625_v2   ;;  %689 = vperm.xlu0 %6540, %v623_v3   ;;  %v6268_v8 = vld [vmem:[%s10125_s3] sm:$0xff]  ;;  %v6269_v18 = vld [vmem:[%s10125_s3 + $0x8] sm:$0xff]  ;;  %v634_v22 = vld [vmem:[%s10126_s4 + $0x58] sm:$0xff] }
  0x60   : > { %v6276_v9 = vld [vmem:[%s10125_s3 + $0x40] sm:$0xff]  ;;  %v6277_v19 = vld [vmem:[%s10125_s3 + $0x48] sm:$0xff]  ;;  %v633_v23 = vld [vmem:[%s10126_s4 + $0x50] sm:$0xff] }
  0x61   : > { %v1266_v7 = vsel %vm1264_vm1, %v558_v6, 0  ;;  %v6284_v10 = vld [vmem:[%s10125_s3 + $0x80] sm:$0xff]  ;;  %v6285_v20 = vld [vmem:[%s10125_s3 + $0x88] sm:$0xff]  ;;  %v637_v25 = vld [vmem:[%s10126_s4 + $0x70] sm:$0xff] }
  0x62   : > { %1275 = vmatpush.bf16.msra.mxu0 %v1266_v7  ;;  %6492 = vmatpush.bf16.msra.mxu1 %v1266_v7  ;;  %v6292_v11 = vld [vmem:[%s10125_s3 + $0xc0] sm:$0xff]  ;;  %v6293_v21 = vld [vmem:[%s10125_s3 + $0xc8] sm:$0xff]  ;;  %v6270_v28 = vld [vmem:[%s10125_s3 + $0x10] sm:$0xff] }
  0x63   : > { %6493 = vmatpush.bf16.msra.mxu2 %v1266_v7  ;;  %6494 = vmatpush.bf16.msra.mxu3 %v1266_v7  ;;  %v631_v15 = vld [vmem:[%s10126_s4 + $0x40] sm:$0xff]  ;;  %v632_v24 = vld [vmem:[%s10126_s4 + $0x48] sm:$0xff]  ;;  %v6278_v29 = vld [vmem:[%s10125_s3 + $0x50] sm:$0xff] }
  0x64   : > { %v636_v26 = vld [vmem:[%s10126_s4 + $0x68] sm:$0xff]  ;;  %v635_v27 = vld [vmem:[%s10126_s4 + $0x60] sm:$0xff]  ;;  %v6286_v30 = vld [vmem:[%s10125_s3 + $0x90] sm:$0xff] }
  0x65   : > { %5430 = vmatmul.msk.bf16.vlgmr.msra.gmra.mxu0 %vm1167_vm2, %v6268_v8  ;;  %5438 = vmatmul.msk.bf16.vlgmr.msra.gmra.mxu1 %vm1167_vm2, %v6276_v9  ;;  %v6294_v31 = vld [vmem:[%s10125_s3 + $0xd0] sm:$0xff]  ;;  %v640_v32 = vld [vmem:[%s10126_s4 + $0x88] sm:$0xff]  ;;  %v639_v33 = vld [vmem:[%s10126_s4 + $0x80] sm:$0xff] }
  0x66   : > { %5446 = vmatmul.msk.bf16.vlgmr.msra.gmra.mxu2 %vm1167_vm2, %v6284_v10  ;;  %5454 = vmatmul.msk.bf16.vlgmr.msra.gmra.mxu3 %vm1167_vm2, %v6292_v11  ;;  %v638_v34 = vld [vmem:[%s10126_s4 + $0x78] sm:$0xff]  ;;  %v643_v35 = vld [vmem:[%s10126_s4 + $0xa0] sm:$0xff]  ;;  %v641_v37 = vld [vmem:[%s10126_s4 + $0x90] sm:$0xff] }
  0x67   : > { %714 = vperm.xlu2 %6542, %v628_v12   ;;  %704 = vperm.xlu1 %6541, %v626_v13   ;;  %v642_v36 = vld [vmem:[%s10126_s4 + $0x98] sm:$0xff]  ;;  %v645_v43 = vld [vmem:[%s10126_s4 + $0xb0] sm:$0xff]  ;;  %v644_v44 = vld [vmem:[%s10126_s4 + $0xa8] sm:$0xff] }
  0x68   : > { %694 = vperm.xlu0 %6540, %v624_v14   ;;  %v6271_v38 = vld [vmem:[%s10125_s3 + $0x18] sm:$0xff]  ;;  %v649_v45 = vld [vmem:[%s10126_s4 + $0xd0] sm:$0xff]  ;;  %v648_v46 = vld [vmem:[%s10126_s4 + $0xc8] sm:$0xff] }
  0x69   : > { %v6279_v39 = vld [vmem:[%s10125_s3 + $0x58] sm:$0xff]  ;;  %v647_v47 = vld [vmem:[%s10126_s4 + $0xc0] sm:$0xff]  ;;  %v652_v52 = vld [vmem:[%s10126_s4 + $0xe8] sm:$0xff] }
  0x6a   : > { %v6287_v40 = vld [vmem:[%s10125_s3 + $0x98] sm:$0xff]  ;;  %v6272_v48 = vld [vmem:[%s10125_s3 + $0x20] sm:$0xff]  ;;  %v653_v57 = vld [vmem:[%s10126_s4 + $0xf0] sm:$0xff] }
  0x6b   : > { %v6295_v41 = vld [vmem:[%s10125_s3 + $0xd8] sm:$0xff]  ;;  %v6280_v49 = vld [vmem:[%s10125_s3 + $0x60] sm:$0xff]  ;;  %v6273_v58 = vld [vmem:[%s10125_s3 + $0x28] sm:$0xff] }
  0x6c   : > { %v646_v42 = vld [vmem:[%s10126_s4 + $0xb8] sm:$0xff]  ;;  %v6288_v50 = vld [vmem:[%s10125_s3 + $0xa0] sm:$0xff]  ;;  %v6281_v59 = vld [vmem:[%s10125_s3 + $0x68] sm:$0xff] }
  0x6d   : > { %v6296_v51 = vld [vmem:[%s10125_s3 + $0xe0] sm:$0xff]  ;;  %v650_v54 = vld [vmem:[%s10126_s4 + $0xd8] sm:$0xff]  ;;  %v6289_v60 = vld [vmem:[%s10125_s3 + $0xa8] sm:$0xff] }
  0x6e   : > { %v651_v53 = vld [vmem:[%s10126_s4 + $0xe0] sm:$0xff]  ;;  %v654_v56 = vld [vmem:[%s10126_s4 + $0xf8] sm:$0xff]  ;;  %v6297_v61 = vld [vmem:[%s10125_s3 + $0xe8] sm:$0xff] }
  0x6f   : > { %729 = vperm.xlu2 %6542, %v631_v15   ;;  %724 = vperm.xlu1 %6541, %v630_v16   ;;  %v655_v55 = vld [vmem:[%s10126_s4 + $0x100] sm:$0xff]  ;;  %v658_v62 = vld [vmem:[%s10126_s4 + $0x118] sm:$0xff]  ;;  %v657_v63 = vld [vmem:[%s10126_s4 + $0x110] sm:$0xff] }
  0x70   : > { %719 = vperm.xlu0 %6540, %v629_v17   ;;  %v656_v0 = vld [vmem:[%s10126_s4 + $0x108] sm:$0xff]  ;;  %v661_v1 = vld [vmem:[%s10126_s4 + $0x130] sm:$0xff]  ;;  %v659_v3 = vld [vmem:[%s10126_s4 + $0x120] sm:$0xff] }
  0x71   : > { %v660_v2 = vld [vmem:[%s10126_s4 + $0x128] sm:$0xff]  ;;  %v6274_v4 = vld [vmem:[%s10125_s3 + $0x30] sm:$0xff]  ;;  %v663_v9 = vld [vmem:[%s10126_s4 + $0x140] sm:$0xff] }
  0x72   : > { %v6282_v5 = vld [vmem:[%s10125_s3 + $0x70] sm:$0xff]  ;;  %v664_v8 = vld [vmem:[%s10126_s4 + $0x148] sm:$0xff]  ;;  %v662_v10 = vld [vmem:[%s10126_s4 + $0x138] sm:$0xff] }
  0x73   : > { %v6290_v6 = vld [vmem:[%s10125_s3 + $0xb0] sm:$0xff]  ;;  %v667_v12 = vld [vmem:[%s10126_s4 + $0x160] sm:$0xff]  ;;  %v666_v13 = vld [vmem:[%s10126_s4 + $0x158] sm:$0xff] }
  0x74   : > { %v6298_v7 = vld [vmem:[%s10125_s3 + $0xf0] sm:$0xff]  ;;  %v6275_v15 = vld [vmem:[%s10125_s3 + $0x38] sm:$0xff] }
  0x75   : > { %5431 = vmatmul.msk.bf16.gmra.mxu0 %vm1167_vm2, %v6269_v18  ;;  %5439 = vmatmul.msk.bf16.gmra.mxu1 %vm1167_vm2, %v6277_v19  ;;  %v665_v14 = vld [vmem:[%s10126_s4 + $0x150] sm:$0xff]  ;;  %v6283_v16 = vld [vmem:[%s10125_s3 + $0x78] sm:$0xff] }
  0x76   : > { %5447 = vmatmul.msk.bf16.gmra.mxu2 %vm1167_vm2, %v6285_v20  ;;  %5455 = vmatmul.msk.bf16.gmra.mxu3 %vm1167_vm2, %v6293_v21  ;;  %v6291_v19 = vld [vmem:[%s10125_s3 + $0xb8] sm:$0xff] }
  0x77   : > { %744 = vperm.xlu2 %6542, %v634_v22   ;;  %739 = vperm.xlu1 %6541, %v633_v23   ;;  %v6299_v20 = vld [vmem:[%s10125_s3 + $0xf8] sm:$0xff]  ;;  %v669_v23 = vld [vmem:[%s10126_s4 + $0x170] sm:$0xff] }
  0x78   : > { %734 = vperm.xlu0 %6540, %v632_v24   ;;  %v670_v22 = vld [vmem:[%s10126_s4 + $0x178] sm:$0xff]  ;;  %v668_v24 = vld [vmem:[%s10126_s4 + $0x168] sm:$0xff] }
  0x7f   : > { %759 = vperm.xlu2 %6542, %v637_v25   ;;  %754 = vperm.xlu1 %6541, %v636_v26  }
  0x80   : > { %749 = vperm.xlu0 %6540, %v635_v27   ;;  %v673_v27 = vld [vmem:[%s10126_s4 + $0x190] sm:$0xff] }
  0x85   : > { %5432 = vmatmul.msk.bf16.gmra.mxu0 %vm1167_vm2, %v6270_v28  ;;  %5440 = vmatmul.msk.bf16.gmra.mxu1 %vm1167_vm2, %v6278_v29  ;;  %v672_v28 = vld [vmem:[%s10126_s4 + $0x188] sm:$0xff]  ;;  %v671_v29 = vld [vmem:[%s10126_s4 + $0x180] sm:$0xff] }
  0x86   : > { %5448 = vmatmul.msk.bf16.gmra.mxu2 %vm1167_vm2, %v6286_v30  ;;  %5456 = vmatmul.msk.bf16.gmra.mxu3 %vm1167_vm2, %v6294_v31 }
  0x87   : > { %774 = vperm.xlu2 %6542, %v640_v32   ;;  %769 = vperm.xlu1 %6541, %v639_v33  }
  0x88   : > { %764 = vperm.xlu0 %6540, %v638_v34  }
  0x8f   : > { %789 = vperm.xlu2 %6542, %v643_v35   ;;  %784 = vperm.xlu1 %6541, %v642_v36   ;;  %v676_v35 = vld [vmem:[%s10126_s4 + $0x1a8] sm:$0xff]  ;;  %v675_v36 = vld [vmem:[%s10126_s4 + $0x1a0] sm:$0xff] }
  0x90   : > { %779 = vperm.xlu0 %6540, %v641_v37   ;;  %v674_v37 = vld [vmem:[%s10126_s4 + $0x198] sm:$0xff] }
  0x95   : > { %5433 = vmatmul.msk.bf16.gmra.mxu0 %vm1167_vm2, %v6271_v38  ;;  %5441 = vmatmul.msk.bf16.gmra.mxu1 %vm1167_vm2, %v6279_v39 }
  0x96   : > { %5449 = vmatmul.msk.bf16.gmra.mxu2 %vm1167_vm2, %v6287_v40  ;;  %5457 = vmatmul.msk.bf16.gmra.mxu3 %vm1167_vm2, %v6295_v41 }
  0x97   : > { %804 = vperm.xlu2 %6542, %v646_v42   ;;  %799 = vperm.xlu1 %6541, %v645_v43   ;;  %v679_v43 = vld [vmem:[%s10126_s4 + $0x1c0] sm:$0xff] }
  0x98   : > { %794 = vperm.xlu0 %6540, %v644_v44   ;;  %v678_v44 = vld [vmem:[%s10126_s4 + $0x1b8] sm:$0xff] }
  0x9f   : > { %819 = vperm.xlu2 %6542, %v649_v45   ;;  %814 = vperm.xlu1 %6541, %v648_v46   ;;  %v677_v45 = vld [vmem:[%s10126_s4 + $0x1b0] sm:$0xff] }
  0xa0   : > { %809 = vperm.xlu0 %6540, %v647_v47  }
  0xa5   : > { %5434 = vmatmul.msk.bf16.gmra.mxu0 %vm1167_vm2, %v6272_v48  ;;  %5442 = vmatmul.msk.bf16.gmra.mxu1 %vm1167_vm2, %v6280_v49 }
  0xa6   : > { %5450 = vmatmul.msk.bf16.gmra.mxu2 %vm1167_vm2, %v6288_v50  ;;  %5458 = vmatmul.msk.bf16.gmra.mxu3 %vm1167_vm2, %v6296_v51  ;;  %v682_v50 = vld [vmem:[%s10126_s4 + $0x1d8] sm:$0xff] }
  0xa7   : > { %834 = vperm.xlu2 %6542, %v652_v52   ;;  %829 = vperm.xlu1 %6541, %v651_v53   ;;  %v681_v52 = vld [vmem:[%s10126_s4 + $0x1d0] sm:$0xff]  ;;  %v680_v53 = vld [vmem:[%s10126_s4 + $0x1c8] sm:$0xff] }
  0xa8   : > { %824 = vperm.xlu0 %6540, %v650_v54  }
  0xaf   : > { %849 = vperm.xlu2 %6542, %v655_v55   ;;  %844 = vperm.xlu1 %6541, %v654_v56   ;;  %v685_v56 = vld [vmem:[%s10126_s4 + $0x1f0] sm:$0xff] }
  0xb0   : > { %839 = vperm.xlu0 %6540, %v653_v57  }
  0xb5   : > { %5435 = vmatmul.msk.bf16.gmra.mxu0 %vm1167_vm2, %v6273_v58  ;;  %5443 = vmatmul.msk.bf16.gmra.mxu1 %vm1167_vm2, %v6281_v59  ;;  %v684_v58 = vld [vmem:[%s10126_s4 + $0x1e8] sm:$0xff]  ;;  %v683_v59 = vld [vmem:[%s10126_s4 + $0x1e0] sm:$0xff] }
  0xb6   : > { %5451 = vmatmul.msk.bf16.gmra.mxu2 %vm1167_vm2, %v6289_v60  ;;  %5459 = vmatmul.msk.bf16.gmra.mxu3 %vm1167_vm2, %v6297_v61 }
  0xb7   : > { %864 = vperm.xlu2 %6542, %v658_v62   ;;  %859 = vperm.xlu1 %6541, %v657_v63   ;;  %v686_v63 = vld [vmem:[%s10126_s4 + $0x1f8] sm:$0xff] }
  0xb8   : > { %854 = vperm.xlu0 %6540, %v656_v0   ;;  %v7269_v11 = vpop.permute.xlu2 %709 }
  0xbf   : > { %879 = vperm.xlu2 %6542, %v661_v1   ;;  %874 = vperm.xlu1 %6541, %v660_v2  }
  0xc0   : > { %869 = vperm.xlu0 %6540, %v659_v3  }
  0xc1   : > { %v7296_v21 = vpop.permute.xlu2 %714 }
  0xc5   : > { %5436 = vmatmul.msk.bf16.gmra.mxu0 %vm1167_vm2, %v6274_v4  ;;  %5444 = vmatmul.msk.bf16.gmra.mxu1 %vm1167_vm2, %v6282_v5 }
  0xc6   : > { %5452 = vmatmul.msk.bf16.gmra.mxu2 %vm1167_vm2, %v6290_v6  ;;  %5460 = vmatmul.msk.bf16.gmra.mxu3 %vm1167_vm2, %v6298_v7 }
  0xc7   : > { %894 = vperm.xlu2 %6542, %v664_v8   ;;  %889 = vperm.xlu1 %6541, %v663_v9  }
  0xc8   : > { %884 = vperm.xlu0 %6540, %v662_v10  }
  0xc9   : > { %v7324_v30 = vpop.permute.xlu2 %729 }
  0xcf   : > { %909 = vperm.xlu2 %6542, %v667_v12   ;;  %904 = vperm.xlu1 %6541, %v666_v13  }
  0xd0   : > { %899 = vperm.xlu0 %6540, %v665_v14  }
  0xd1   : > { %v7286_v17 = vpop.permute.xlu1 %699  ;;  %v7288_v18 = vpop.permute.xlu0 %689 }
  0xd2   : > { %v7343_v38 = vpop.permute.xlu2 %744 }
  0xd5   : > { %5437 = vmatmul.msk.bf16.gmra.mxu0 %vm1167_vm2, %v6275_v15  ;;  %5445 = vmatmul.msk.bf16.gmra.mxu1 %vm1167_vm2, %v6283_v16 }
  0xd6   : > { %5453 = vmatmul.msk.bf16.gmra.mxu2 %vm1167_vm2, %v6291_v19  ;;  %5461 = vmatmul.msk.bf16.gmra.mxu3 %vm1167_vm2, %v6299_v20 }
  0xd7   : > { %924 = vperm.xlu2 %6542, %v670_v22   ;;  %919 = vperm.xlu1 %6541, %v669_v23  }
  0xd8   : > { %914 = vperm.xlu0 %6540, %v668_v24  }
  0xd9   : > { %v7311_v25 = vpop.permute.xlu1 %704 }
  0xda   : > { %v7313_v26 = vpop.permute.xlu0 %694  ;;  %v7360_v46 = vpop.permute.xlu2 %759 }
  0xdf   : > { %939 = vperm.xlu2 %6542, %v673_v27   ;;  %934 = vperm.xlu1 %6541, %v672_v28  }
  0xe0   : > { %929 = vperm.xlu0 %6540, %v671_v29  }
  0xe1   : > { %v7326_v31 = vpop.permute.xlu1 %724 }
  0xe2   : > { %v7328_v32 = vpop.permute.xlu0 %719  ;;  %v7330_v33 = vpop.f32.mrf.mxu0 }
  0xe3   : > { %v7332_v34 = vpop.f32.mrf.mxu1  ;;  %v7377_v55 = vpop.permute.xlu2 %774  ;;  %v1278_v24 = vadd.f32 %v7330_v33, %v7288_v18 }
  0xe7   : > { %954 = vperm.xlu2 %6542, %v676_v35   ;;  %949 = vperm.xlu1 %6541, %v675_v36  }
  0xe8   : > { %944 = vperm.xlu0 %6540, %v674_v37   ;;  %v1437_v37 = vmax.f32 %v1278_v24, 0.0 }
  0xe9   : > { %v7345_v39 = vpop.permute.xlu1 %739  ;;  %v7405_v4 = vpop.f32.mrf.mxu2 }
  0xea   : > { %v7347_v40 = vpop.permute.xlu0 %734  ;;  %v1279_v41 = vpop.f32.mrf.mxu0 }
  0xeb   : > { %v7349_v42 = vpop.f32.mrf.mxu1  ;;  %v7397_v0 = vpop.permute.xlu2 %789  ;;  %v1280_v22 = vadd.f32 %v1279_v41, %v7313_v26 }
  0xed   : > { %v1438_v29 = vmax.f32 %v1280_v22, 0.0 }
  0xef   : > { %969 = vperm.xlu2 %6542, %v679_v43   ;;  %964 = vperm.xlu1 %6541, %v678_v44  }
  0xf0   : > { %959 = vperm.xlu0 %6540, %v677_v45  }
  0xf1   : > { %v7364_v49 = vpop.permute.xlu1 %754  ;;  %v7415_v12 = vpop.f32.mrf.mxu2 }
  0xf2   : > { %v7362_v47 = vpop.permute.xlu0 %749  ;;  %v1282_v48 = vpop.f32.mrf.mxu0 }
  0xf3   : > { %v7369_v51 = vpop.f32.mrf.mxu1  ;;  %v7407_v6 = vpop.permute.xlu2 %804  ;;  %v1283_v41 = vadd.f32 %v1282_v48, %v7286_v17 }
  0xf7   : > { %984 = vperm.xlu2 %6542, %v682_v50   ;;  %979 = vperm.xlu1 %6541, %v681_v52   ;;  %v1439_v52 = vmax.f32 %v1283_v41, 0.0 }
  0xf8   : > { %974 = vperm.xlu0 %6540, %v680_v53  }
  0xf9   : > { %v7390_v60 = vpop.permute.xlu1 %769  ;;  %v7425_v20 = vpop.f32.mrf.mxu2 }
  0xfa   : > { %v1284_v54 = vpop.f32.mrf.mxu0  ;;  %v7382_v57 = vpop.permute.xlu0 %764 }
  0xfb   : > { %v7392_v61 = vpop.f32.mrf.mxu1  ;;  %v7417_v13 = vpop.permute.xlu2 %819  ;;  %v1285_v44 = vadd.f32 %v1284_v54, %v7311_v25 }
  0xfd   : > { %v1440_v33 = vmax.f32 %v1285_v44, 0.0 }
  0xff   : > { %999 = vperm.xlu2 %6542, %v685_v56   ;;  %994 = vperm.xlu1 %6541, %v684_v58  }
 0x100   : > { %989 = vperm.xlu0 %6540, %v683_v59  }
 0x101   : > { %v7401_v2 = vpop.permute.xlu1 %784  ;;  %v7438_v43 = vpop.f32.mrf.mxu2 }
 0x102   : > { %v1287_v62 = vpop.f32.mrf.mxu0  ;;  %v7399_v1 = vpop.permute.xlu0 %779 }
 0x103   : > { %v7403_v3 = vpop.f32.mrf.mxu1  ;;  %v7430_v27 = vpop.permute.xlu2 %834  ;;  %v1288_v18 = vadd.f32 %v1287_v62, %v7269_v11 }
 0x105   : > { %v1441_v53 = vmax.f32 %v1288_v18, 0.0 }
 0x108   : > { %1004 = vperm.xlu0 %6540, %v686_v63  }
 0x109   : > { %v7411_v8 = vpop.permute.xlu1 %799  ;;  %v7451_v59 = vpop.f32.mrf.mxu2 }
 0x10a   : > { %v1289_v5 = vpop.f32.mrf.mxu0  ;;  %v7409_v7 = vpop.permute.xlu0 %794 }
 0x10b   : > { %v7413_v9 = vpop.f32.mrf.mxu1  ;;  %v7443_v45 = vpop.permute.xlu2 %849  ;;  %v1290_v25 = vadd.f32 %v1289_v5, %v7296_v21 }
 0x10d   : > { %v1442_v54 = vmax.f32 %v1290_v25, 0.0 }
 0x111   : > { %v7421_v16 = vpop.permute.xlu1 %814 }
 0x112   : > { %v1292_v10 = vpop.f32.mrf.mxu0  ;;  %v7419_v14 = vpop.permute.xlu0 %809 }
 0x113   : > { %v7423_v19 = vpop.f32.mrf.mxu1  ;;  %v1293_v11 = vadd.f32 %v1292_v10, %v7328_v32  ;;  %v7456_v62 = vpop.permute.xlu2 %864 }
 0x115   : > { %v1443_v63 = vmax.f32 %v1293_v11, 0.0 }
 0x119   : > { %v7434_v35 = vpop.permute.xlu1 %829 }
 0x11a   : > { %v1294_v15 = vpop.f32.mrf.mxu0  ;;  %v7432_v28 = vpop.permute.xlu0 %824 }
 0x11b   : > { %v7436_v36 = vpop.f32.mrf.mxu1  ;;  %v1295_v48 = vadd.f32 %v1294_v15, %v7326_v31  ;;  %v7467_v31 = vpop.f32.mrf.mxu2 }
 0x11d   : > { %v1444_v22 = vmax.f32 %v1295_v48, 0.0 }
 0x121   : > { %v7447_v56 = vpop.permute.xlu1 %844 }
 0x122   : > { %v1297_v23 = vpop.f32.mrf.mxu0  ;;  %v7445_v50 = vpop.permute.xlu0 %839 }
 0x123   : > { %v7449_v58 = vpop.f32.mrf.mxu1 }
 0x128   : > { %1567 = vadd.xlane.f32.xlu2 %v1438_v29  ;;  %v7460_v29 = vpop.f32.mrf.mxu3 }
 0x129   : > { %1565 = vadd.xlane.f32.xlu1 %v1437_v37  ;;  %v1298_v37 = vadd.f32 %v1297_v23, %v7324_v30  ;;  %v7463_v21 = vpop.permute.xlu1 %859 }
 0x12a   : > { %v1299_v26 = vpop.f32.mrf.mxu0  ;;  %v7458_v24 = vpop.permute.xlu0 %854 }
 0x12b   : > { %v7465_v5 = vpop.f32.mrf.mxu1  ;;  %v1300_v10 = vadd.f32 %v1299_v26, %v7347_v40  ;;  %v1445_v44 = vmax.f32 %v1298_v37, 0.0  ;;  %v7481_v26 = vpop.f32.mrf.mxu2 }
 0x12d   : > { %v1446_v41 = vmax.f32 %v1300_v10, 0.0 }
 0x130   : > { %1571 = vadd.xlane.f32.xlu2 %v1440_v33  ;;  %v7471_v33 = vpop.permute.xlu2 %879 }
 0x131   : > { %1573 = vadd.xlane.f32.xlu1 %v1441_v53  ;;  %v7476_v53 = vpop.f32.mrf.mxu3  ;;  %v7479_v40 = vpop.permute.xlu1 %874 }
 0x132   : > { %1569 = vadd.xlane.f32.xlu0 %v1439_v52  ;;  %v1302_v17 = vpop.f32.mrf.mxu0  ;;  %v7474_v23 = vpop.permute.xlu0 %869 }
 0x133   : > { %v1303_v15 = vadd.f32 %v1302_v17, %v7345_v39  ;;  %v1342_v39 = vpop.f32.mrf.mxu1 }
 0x135   : > { %v1447_v18 = vmax.f32 %v1303_v15, 0.0 }
 0x138   : > { %1575 = vadd.xlane.f32.xlu2 %v1442_v54  ;;  %v1323_v54 = vadd.f32 %v7369_v51, %v7399_v1  ;;  %v1318_v51 = vadd.f32 %v7332_v34, %v7390_v60  ;;  %v1325_v34 = vadd.f32 %v7392_v61, %v7401_v2  ;;  %v1330_v61 = vadd.f32 %v7413_v9, %v7409_v7 }
 0x139   : > { %1579 = vadd.xlane.f32.xlu1 %v1444_v22  ;;  %v7488_v22 = vpop.permute.xlu2 %894  ;;  %v7494_v15 = vpop.permute.xlu1 %889  ;;  %v1338_v7 = vadd.f32 %v7449_v58, %v7419_v14  ;;  %v1343_v9 = vadd.f32 %v1342_v39, %v7417_v13 }
 0x13a   : > { %1577 = vadd.xlane.f32.xlu0 %v1443_v63  ;;  %v1304_v32 = vpop.f32.mrf.mxu0  ;;  %v1453_v1 = vmax.f32 %v1318_v51, 0.0 }
 0x13b   : > { %v1305_v30 = vadd.f32 %v1304_v32, %v7343_v38  ;;  %v1320_v38 = vadd.f32 %v7349_v42, %v7377_v55  ;;  %v7492_v32 = vpop.f32.mrf.mxu3  ;;  %v7496_v42 = vpop.f32.mrf.mxu2 }
 0x13d   : > { %v1448_v17 = vmax.f32 %v1305_v30, 0.0  ;;  %v1454_v37 = vmax.f32 %v1320_v38, 0.0 }
 0x140   : > { %1581 = vadd.xlane.f32.xlu2 %v1445_v44  ;;  %v1344_v44 = vpop.f32.mrf.mxu1 }
 0x141   : > { %1585 = vadd.xlane.f32.xlu1 %v1447_v18  ;;  %v7501_v30 = vpop.permute.xlu2 %909  ;;  %v1345_v14 = vadd.f32 %v1344_v44, %v7432_v28 }
 0x142   : > { %1583 = vadd.xlane.f32.xlu0 %v1446_v41  ;;  %v1307_v52 = vpop.f32.mrf.mxu0  ;;  %v1455_v41 = vmax.f32 %v1323_v54, 0.0  ;;  %v1456_v54 = vmax.f32 %v1325_v34, 0.0 }
 0x143   : > { %v1308_v25 = vadd.f32 %v1307_v52, %v7362_v47  ;;  %v7490_v47 = vpop.permute.xlu0 %884  ;;  %v7511_v60 = vpop.f32.mrf.mxu2 }
 0x145   : > { %v1449_v11 = vmax.f32 %v1308_v25, 0.0  ;;  %v7505_v25 = vpop.f32.mrf.mxu3 }
 0x148   : > { %1587 = vadd.xlane.f32.xlu2 %v1448_v17  ;;  %v7507_v17 = vpop.permute.xlu1 %904 }
 0x14a   : > { %1589 = vadd.xlane.f32.xlu0 %v1449_v11  ;;  %v1309_v48 = vpop.f32.mrf.mxu0  ;;  %v1347_v11 = vpop.f32.mrf.mxu1 }
 0x14b   : > { %v1310_v63 = vadd.f32 %v1309_v48, %v7364_v49  ;;  %v7503_v52 = vpop.permute.xlu0 %899  ;;  %v1348_v13 = vadd.f32 %v1347_v11, %v7434_v35  ;;  %v1358_v35 = vadd.f32 %v7405_v4, %v7443_v45  ;;  %v1360_v4 = vadd.f32 %v7415_v12, %v7458_v24 }
 0x14c   : > { %v1368_v12 = vadd.f32 %v7451_v59, %v7474_v23  ;;  %v1373_v24 = vadd.f32 %v7481_v26, %v7471_v33  ;;  %v1375_v59 = vadd.f32 %v7496_v42, %v7490_v47 }
 0x14d   : > { %v1450_v10 = vmax.f32 %v1310_v63, 0.0  ;;  %v7522_v2 = vpop.f32.mrf.mxu3 }
 0x14f   : > { %1591 = vadd.xlane.f32.xlu1 %v1450_v10  ;;  %v7516_v10 = vpop.permute.xlu2 %924 }
 0x150   : > { %1599 = vadd.xlane.f32.xlu2 %v1454_v37 }
 0x152   : > { %1601 = vadd.xlane.f32.xlu0 %v1455_v41  ;;  %v1312_v49 = vpop.f32.mrf.mxu0  ;;  %v1349_v51 = vpop.f32.mrf.mxu1 }
 0x153   : > { %v1313_v55 = vadd.f32 %v1312_v49, %v7360_v46  ;;  %v1328_v46 = vadd.f32 %v7403_v3, %v7397_v0  ;;  %v7518_v41 = vpop.permute.xlu0 %914  ;;  %v1333_v0 = vadd.f32 %v7423_v19, %v7411_v8  ;;  %v7528_v3 = vpop.permute.xlu1 %919  ;;  %v1340_v8 = vadd.f32 %v7465_v5, %v7421_v16 }
 0x154   : > { %v7530_v49 = vpop.f32.mrf.mxu2  ;;  %v1350_v16 = vadd.f32 %v1349_v51, %v7430_v27  ;;  %v1469_v51 = vmax.f32 %v1358_v35, 0.0 }
 0x155   : > { %v1451_v18 = vmax.f32 %v1313_v55, 0.0  ;;  %v1457_v37 = vmax.f32 %v1328_v46, 0.0  ;;  %v1458_v55 = vmax.f32 %v1330_v61, 0.0  ;;  %v1465_v61 = vmax.f32 %v1348_v13, 0.0 }
 0x156   : > { %v1380_v33 = vadd.f32 %v7530_v49, %v7488_v22  ;;  %v1501_v49 = vld [vmem:[#allocation2] sm:$0xff] }
 0x157   : > { %1597 = vadd.xlane.f32.xlu1 %v1453_v1  ;;  %v1459_v1 = vmax.f32 %v1333_v0, 0.0  ;;  %v1466_v0 = vmax.f32 %v1350_v16, 0.0  ;;  %v1473_v16 = vmax.f32 %v1368_v12, 0.0 }
 0x158   : > { %1593 = vadd.xlane.f32.xlu2 %v1451_v18 }
 0x15a   : > { %v1314_v38 = vpop.f32.mrf.mxu0  ;;  %v1352_v46 = vpop.f32.mrf.mxu1 }
 0x15b   : > { %v1315_v48 = vadd.f32 %v1314_v38, %v7382_v57  ;;  %v1335_v57 = vadd.f32 %v7436_v36, %v7407_v6  ;;  %v7537_v6 = vpop.permute.xlu2 %939  ;;  %v7539_v19 = vpop.permute.xlu0 %929  ;;  %v1461_v38 = vmax.f32 %v1338_v7, 0.0  ;;  %v1353_v28 = vadd.f32 %v1352_v46, %v7445_v50 }
 0x15c   : > { %v7541_v36 = vpop.f32.mrf.mxu3  ;;  %v7543_v34 = vpop.permute.xlu1 %934  ;;  %v1363_v50 = vadd.f32 %v7425_v20, %v7463_v21  ;;  %v1370_v20 = vadd.f32 %v7467_v31, %v7479_v40  ;;  %v1378_v31 = vadd.f32 %v7511_v60, %v7494_v15  ;;  %v1502_v15 = vld [vmem:[#allocation2 + $0x8] sm:$0xff] }
 0x15d   : > { %v1452_v63 = vmax.f32 %v1315_v48, 0.0  ;;  %v1460_v18 = vmax.f32 %v1335_v57, 0.0  ;;  %v1462_v48 = vmax.f32 %v1340_v8, 0.0  ;;  %v1467_v44 = vmax.f32 %v1353_v28, 0.0 }
 0x15e   : > { %v1471_v46 = vmax.f32 %v1363_v50, 0.0  ;;  %v1474_v13 = vmax.f32 %v1370_v20, 0.0 }
 0x15f   : > { %1595 = vadd.xlane.f32.xlu0 %v1452_v63  ;;  %1603 = vadd.xlane.f32.xlu1 %v1456_v54  ;;  %v7545_v54 = vpop.f32.mrf.mxu2  ;;  %v1463_v63 = vmax.f32 %v1343_v9, 0.0 }
 0x160   : > { %1605 = vadd.xlane.f32.xlu2 %v1457_v37  ;;  %v1464_v37 = vmax.f32 %v1345_v14, 0.0  ;;  %v1383_v22 = vadd.f32 %v7545_v54, %v7503_v52 }
 0x162   : > { %v1479_v50 = vmax.f32 %v1383_v22, 0.0 }
 0x163   : > { %v7550_v58 = vpop.permute.xlu2 %954  ;;  %v7552_v5 = vpop.permute.xlu0 %944 }
 0x164   : > { %v7554_v39 = vpop.f32.mrf.mxu3  ;;  %v7556_v57 = vpop.permute.xlu1 %949 }
 0x167   : > { %1607 = vadd.xlane.f32.xlu0 %v1458_v55  ;;  %1609 = vadd.xlane.f32.xlu1 %v1459_v1  ;;  %v1354_v55 = vpop.f32.mrf.mxu1  ;;  %v1384_v1 = vpop.f32.mrf.mxu2 }
 0x168   : > { %1611 = vadd.xlane.f32.xlu2 %v1460_v18  ;;  %v1355_v27 = vadd.f32 %v1354_v55, %v7447_v56  ;;  %v1365_v56 = vadd.f32 %v7438_v43, %v7456_v62  ;;  %v1476_v55 = vmax.f32 %v1375_v59, 0.0  ;;  %v1385_v47 = vadd.f32 %v1384_v1, %v7507_v17 }
 0x16a   : > { %v1468_v11 = vmax.f32 %v1355_v27, 0.0  ;;  %v1478_v27 = vmax.f32 %v1380_v33, 0.0  ;;  %v1403_v33 = vadd.f32 %v7492_v32, %v7537_v6  ;;  %v1405_v32 = vadd.f32 %v7505_v25, %v7552_v5  ;;  %v1512_v25 = vld [vmem:[#allocation2 + $0x58] sm:$0xff] }
 0x16b   : > { %v7562_v18 = vpop.permute.xlu2 %969  ;;  %v7564_v7 = vpop.permute.xlu0 %959  ;;  %v1410_v6 = vadd.f32 %v7541_v36, %v7550_v58 }
 0x16c   : > { %v7566_v8 = vpop.f32.mrf.mxu3  ;;  %v7568_v9 = vpop.permute.xlu1 %964  ;;  %v1413_v58 = vadd.f32 %v7554_v39, %v7564_v7  ;;  %v1514_v39 = vld [vmem:[#allocation2 + $0x68] sm:$0xff] }
 0x16d   : > { %v1415_v36 = vadd.f32 %v7566_v8, %v7568_v9  ;;  %v1518_v7 = vld [vmem:[#allocation2 + $0x88] sm:$0xff] }
 0x16f   : > { %1613 = vadd.xlane.f32.xlu0 %v1461_v38  ;;  %1615 = vadd.xlane.f32.xlu1 %v1462_v48  ;;  %v1387_v45 = vpop.f32.mrf.mxu2  ;;  %v1470_v38 = vmax.f32 %v1360_v4, 0.0  ;;  %v1472_v48 = vmax.f32 %v1365_v56, 0.0 }
 0x170   : > { %1617 = vadd.xlane.f32.xlu2 %v1463_v63  ;;  %v1388_v42 = vadd.f32 %v1387_v45, %v7501_v30  ;;  %v1504_v30 = vld [vmem:[#allocation2 + $0x18] sm:$0xff] }
 0x172   : > { %v1481_v17 = vmax.f32 %v1388_v42, 0.0 }
 0x173   : > { %v7576_v63 = vpop.permute.xlu2 %984  ;;  %v7578_v14 = vpop.permute.xlu0 %974 }
 0x174   : > { %v7586_v43 = vpop.f32.mrf.mxu3  ;;  %v7588_v62 = vpop.permute.xlu1 %979 }
 0x175   : > { %v1418_v5 = vadd.f32 %v7586_v43, %v7562_v18 }
 0x177   : > { %1619 = vadd.xlane.f32.xlu0 %v1464_v37  ;;  %1621 = vadd.xlane.f32.xlu1 %v1465_v61  ;;  %v1389_v21 = vpop.f32.mrf.mxu2  ;;  %v1475_v37 = vmax.f32 %v1373_v24, 0.0 }
 0x178   : > { %1623 = vadd.xlane.f32.xlu2 %v1466_v0  ;;  %v1477_v0 = vmax.f32 %v1378_v31, 0.0  ;;  %v1390_v52 = vadd.f32 %v1389_v21, %v7518_v41  ;;  %v1398_v21 = vadd.f32 %v7460_v29, %v7539_v19  ;;  %v1509_v29 = vld [vmem:[#allocation2 + $0x40] sm:$0xff] }
 0x17a   : > { %v1485_v42 = vmax.f32 %v1398_v21, 0.0 }
 0x17b   : > { %v7596_v23 = vpop.permute.xlu2 %999  ;;  %v7598_v40 = vpop.permute.xlu0 %989 }
 0x17c   : > { %v7600_v26 = vpop.f32.mrf.mxu3  ;;  %v7602_v61 = vpop.permute.xlu1 %994 }
 0x17d   : > { %v1420_v8 = vadd.f32 %v7600_v26, %v7578_v14  ;;  %v1515_v14 = vld [vmem:[#allocation2 + $0x70] sm:$0xff] }
 0x17f   : > { %1625 = vadd.xlane.f32.xlu0 %v1467_v44  ;;  %1627 = vadd.xlane.f32.xlu1 %v1468_v11  ;;  %v1392_v28 = vpop.f32.mrf.mxu2  ;;  %v1494_v21 = vmax.f32 %v1420_v8, 0.0  ;;  %v1531_v8 = vld [vmem:[#allocation2 + $0xf0] sm:$0xff] }
 0x180   : > { %1629 = vadd.xlane.f32.xlu2 %v1469_v51  ;;  %v1480_v51 = vmax.f32 %v1385_v47, 0.0  ;;  %v1393_v54 = vadd.f32 %v1392_v28, %v7528_v3  ;;  %v1400_v3 = vadd.f32 %v7476_v53, %v7543_v34  ;;  %v1508_v28 = vld [vmem:[#allocation2 + $0x38] sm:$0xff]  ;;  %v1408_v53 = vadd.f32 %v7522_v2, %v7556_v57 }
 0x181   : > { %v1490_v2 = vmax.f32 %v1410_v6, 0.0 }
 0x182   : > { %v1486_v22 = vmax.f32 %v1400_v3, 0.0 }
 0x183   : > { %v7608_v44 = vpop.permute.xlu0 %1004 }
 0x184   : > { %v7611_v56 = vpop.f32.mrf.mxu3 }
 0x185   : > { %v1423_v18 = vadd.f32 %v7611_v56, %v7588_v62 }
 0x187   : > { %1631 = vadd.xlane.f32.xlu0 %v1470_v38  ;;  %1633 = vadd.xlane.f32.xlu1 %v1471_v46  ;;  %v1394_v1 = vpop.f32.mrf.mxu2  ;;  %v1503_v38 = vld [vmem:[#allocation2 + $0x10] sm:$0xff]  ;;  %v1495_v3 = vmax.f32 %v1423_v18, 0.0 }
 0x188   : > { %1635 = vadd.xlane.f32.xlu2 %v1472_v48  ;;  %v1395_v45 = vadd.f32 %v1394_v1, %v7516_v10  ;;  %v1505_v48 = vld [vmem:[#allocation2 + $0x20] sm:$0xff]  ;;  %v1506_v10 = vld [vmem:[#allocation2 + $0x28] sm:$0xff]  ;;  %v1489_v1 = vmax.f32 %v1408_v53, 0.0 }
 0x18a   : > { %v1484_v59 = vmax.f32 %v1395_v45, 0.0  ;;  %v1513_v45 = vld [vmem:[#allocation2 + $0x60] sm:$0xff] }
 0x18c   : > { %v7619_v41 = vpop.f32.mrf.mxu3 }
 0x18d   : > { %v1425_v9 = vadd.f32 %v7619_v41, %v7576_v63  ;;  %v1517_v63 = vld [vmem:[#allocation2 + $0x80] sm:$0xff] }
 0x18f   : > { %1637 = vadd.xlane.f32.xlu0 %v1473_v16  ;;  %1639 = vadd.xlane.f32.xlu1 %v1474_v13  ;;  %v1482_v13 = vmax.f32 %v1390_v52, 0.0  ;;  %v1483_v16 = vmax.f32 %v1393_v54, 0.0 }
 0x190   : > { %1641 = vadd.xlane.f32.xlu2 %v1475_v37 }
 0x194   : > { %v1427_v19 = vpop.f32.mrf.mxu3 }
 0x195   : > { %v1428_v26 = vadd.f32 %v1427_v19, %v7598_v40 }
 0x197   : > { %1643 = vadd.xlane.f32.xlu0 %v1476_v55  ;;  %1645 = vadd.xlane.f32.xlu1 %v1477_v0  ;;  %v1507_v55 = vld [vmem:[#allocation2 + $0x30] sm:$0xff] }
 0x198   : > { %1647 = vadd.xlane.f32.xlu2 %v1478_v27 }
 0x19b   : > { %v1568_v60 = vpop.xlane.xlu2 %1567 }
 0x19c   : > { %v1694_v35 = vadd.f32 %v1568_v60, %v1502_v15  ;;  %v1566_v11 = vpop.xlane.xlu1 %1565 }
 0x19d   : > { %v1693_v4 = vadd.f32 %v1566_v11, %v1501_v49  ;;  %v1510_v11 = vld [vmem:[#allocation2 + $0x48] sm:$0xff] }
 0x19e   : > { %1759 = vst.msk [vmem:[#allocation2 + $0x8] sm:$0xff] %vm1757_vm3, %v1694_v35  ;;  %v1487_v35 = vmax.f32 %v1403_v33, 0.0 }
 0x19f   : > { %1758 = vst.msk [vmem:[#allocation2] sm:$0xff] %vm1757_vm3, %v1693_v4  ;;  %1649 = vadd.xlane.f32.xlu0 %v1479_v50  ;;  %1651 = vadd.xlane.f32.xlu1 %v1480_v51  ;;  %v1511_v51 = vld [vmem:[#allocation2 + $0x50] sm:$0xff] }
 0x1a0   : > { %1653 = vadd.xlane.f32.xlu2 %v1481_v17 }
 0x1a3   : > { %v1572_v46 = vpop.xlane.xlu2 %1571 }
 0x1a4   : > { %v1696_v20 = vadd.f32 %v1572_v46, %v1504_v30  ;;  %v1574_v24 = vpop.xlane.xlu1 %1573  ;;  %v1488_v30 = vmax.f32 %v1405_v32, 0.0 }
 0x1a5   : > { %v1570_v12 = vpop.xlane.xlu0 %1569  ;;  %v1697_v31 = vadd.f32 %v1574_v24, %v1505_v48 }
 0x1a6   : > { %1761 = vst.msk [vmem:[#allocation2 + $0x18] sm:$0xff] %vm1757_vm3, %v1696_v20  ;;  %v1695_v37 = vadd.f32 %v1570_v12, %v1503_v38  ;;  %v1429_v38 = vpop.f32.mrf.mxu3  ;;  %v1492_v20 = vmax.f32 %v1415_v36, 0.0  ;;  %v1491_v12 = vmax.f32 %v1413_v58, 0.0 }
 0x1a7   : > { %1655 = vadd.xlane.f32.xlu0 %v1482_v13  ;;  %1657 = vadd.xlane.f32.xlu1 %v1483_v16  ;;  %1762 = vst.msk [vmem:[#allocation2 + $0x20] sm:$0xff] %vm1757_vm3, %v1697_v31  ;;  %v1493_v13 = vmax.f32 %v1418_v5, 0.0  ;;  %v1430_v62 = vadd.f32 %v1429_v38, %v7602_v61  ;;  %v1516_v61 = vld [vmem:[#allocation2 + $0x78] sm:$0xff] }
 0x1a8   : > { %1760 = vst.msk [vmem:[#allocation2 + $0x10] sm:$0xff] %vm1757_vm3, %v1695_v37  ;;  %1659 = vadd.xlane.f32.xlu2 %v1484_v59  ;;  %v1519_v37 = vld [vmem:[#allocation2 + $0x90] sm:$0xff]  ;;  %v1528_v38 = vld [vmem:[#allocation2 + $0xd8] sm:$0xff] }
 0x1ab   : > { %v1576_v0 = vpop.xlane.xlu2 %1575 }
 0x1ac   : > { %v1698_v27 = vadd.f32 %v1576_v0, %v1506_v10  ;;  %v1580_v47 = vpop.xlane.xlu1 %1579  ;;  %v1496_v0 = vmax.f32 %v1425_v9, 0.0  ;;  %v1532_v9 = vld [vmem:[#allocation2 + $0xf8] sm:$0xff] }
 0x1ad   : > { %v1578_v15 = vpop.xlane.xlu0 %1577  ;;  %v1700_v49 = vadd.f32 %v1580_v47, %v1508_v28  ;;  %v1498_v47 = vmax.f32 %v1430_v62, 0.0 }
 0x1ae   : > { %1763 = vst.msk [vmem:[#allocation2 + $0x28] sm:$0xff] %vm1757_vm3, %v1698_v27  ;;  %v1699_v60 = vadd.f32 %v1578_v15, %v1507_v55  ;;  %v1432_v55 = vpop.f32.mrf.mxu3 }
 0x1af   : > { %1661 = vadd.xlane.f32.xlu0 %v1485_v42  ;;  %1663 = vadd.xlane.f32.xlu1 %v1486_v22  ;;  %1765 = vst.msk [vmem:[#allocation2 + $0x38] sm:$0xff] %vm1757_vm3, %v1700_v49  ;;  %v1433_v56 = vadd.f32 %v1432_v55, %v7596_v23  ;;  %v1497_v22 = vmax.f32 %v1428_v26, 0.0  ;;  %v1520_v49 = vld [vmem:[#allocation2 + $0x98] sm:$0xff]  ;;  %v1521_v23 = vld [vmem:[#allocation2 + $0xa0] sm:$0xff] }
 0x1b0   : > { %1764 = vst.msk [vmem:[#allocation2 + $0x30] sm:$0xff] %vm1757_vm3, %v1699_v60  ;;  %1665 = vadd.xlane.f32.xlu2 %v1487_v35 }
 0x1b1   : > { %v1499_v42 = vmax.f32 %v1433_v56, 0.0 }
 0x1b3   : > { %v1582_v34 = vpop.xlane.xlu2 %1581 }
 0x1b4   : > { %v1701_v50 = vadd.f32 %v1582_v34, %v1509_v29  ;;  %v1586_v17 = vpop.xlane.xlu1 %1585 }
 0x1b5   : > { %v1584_v4 = vpop.xlane.xlu0 %1583  ;;  %v1703_v54 = vadd.f32 %v1586_v17, %v1511_v51  ;;  %v1523_v51 = vld [vmem:[#allocation2 + $0xb0] sm:$0xff] }
 0x1b6   : > { %1766 = vst.msk [vmem:[#allocation2 + $0x40] sm:$0xff] %vm1757_vm3, %v1701_v50  ;;  %v1702_v52 = vadd.f32 %v1584_v4, %v1510_v11  ;;  %v1434_v60 = vpop.f32.mrf.mxu3  ;;  %v1522_v11 = vld [vmem:[#allocation2 + $0xa8] sm:$0xff]  ;;  %v1524_v50 = vld [vmem:[#allocation2 + $0xb8] sm:$0xff] }
 0x1b7   : > { %1667 = vadd.xlane.f32.xlu0 %v1488_v30  ;;  %1669 = vadd.xlane.f32.xlu1 %v1489_v1  ;;  %1768 = vst.msk [vmem:[#allocation2 + $0x50] sm:$0xff] %vm1757_vm3, %v1703_v54  ;;  %v1435_v40 = vadd.f32 %v1434_v60, %v7608_v44  ;;  %v1525_v54 = vld [vmem:[#allocation2 + $0xc0] sm:$0xff] }
 0x1b8   : > { %1767 = vst.msk [vmem:[#allocation2 + $0x48] sm:$0xff] %vm1757_vm3, %v1702_v52  ;;  %1671 = vadd.xlane.f32.xlu2 %v1490_v2  ;;  %v1526_v2 = vld [vmem:[#allocation2 + $0xc8] sm:$0xff] }
 0x1b9   : > { %v1500_v34 = vmax.f32 %v1435_v40, 0.0  ;;  %v1541_v40 = vld [vmem:[#allocation2 + $0x140] sm:$0xff] }
 0x1bb   : > { %v1588_v57 = vpop.xlane.xlu2 %1587 }
 0x1bc   : > { %v1704_v46 = vadd.f32 %v1588_v57, %v1512_v25  ;;  %v1527_v25 = vld [vmem:[#allocation2 + $0xd0] sm:$0xff] }
 0x1bd   : > { %v1590_v48 = vpop.xlane.xlu0 %1589 }
 0x1be   : > { %1769 = vst.msk [vmem:[#allocation2 + $0x58] sm:$0xff] %vm1757_vm3, %v1704_v46  ;;  %v1705_v24 = vadd.f32 %v1590_v48, %v1513_v45  ;;  %v1529_v48 = vld [vmem:[#allocation2 + $0xe0] sm:$0xff] }
 0x1bf   : > { %1673 = vadd.xlane.f32.xlu0 %v1491_v12  ;;  %1675 = vadd.xlane.f32.xlu1 %v1492_v20  ;;  %v1530_v20 = vld [vmem:[#allocation2 + $0xe8] sm:$0xff] }
 0x1c0   : > { %1770 = vst.msk [vmem:[#allocation2 + $0x60] sm:$0xff] %vm1757_vm3, %v1705_v24  ;;  %1677 = vadd.xlane.f32.xlu2 %v1493_v13 }
 0x1c2   : > { %v1592_v43 = vpop.xlane.xlu1 %1591 }
 0x1c3   : > { %v1600_v16 = vpop.xlane.xlu2 %1599  ;;  %v1706_v31 = vadd.f32 %v1592_v43, %v1514_v39  ;;  %v1533_v43 = vld [vmem:[#allocation2 + $0x100] sm:$0xff] }
 0x1c4   : > { %v1710_v59 = vadd.f32 %v1600_v16, %v1518_v7 }
 0x1c5   : > { %v1602_v10 = vpop.xlane.xlu0 %1601  ;;  %1771 = vst.msk [vmem:[#allocation2 + $0x68] sm:$0xff] %vm1757_vm3, %v1706_v31 }
 0x1c6   : > { %v1711_v33 = vadd.f32 %v1602_v10, %v1519_v37  ;;  %1775 = vst.msk [vmem:[#allocation2 + $0x88] sm:$0xff] %vm1757_vm3, %v1710_v59 }
 0x1c7   : > { %1679 = vadd.xlane.f32.xlu0 %v1494_v21  ;;  %1681 = vadd.xlane.f32.xlu1 %v1495_v3  ;;  %v1534_v21 = vld [vmem:[#allocation2 + $0x108] sm:$0xff] }
 0x1c8   : > { %1776 = vst.msk [vmem:[#allocation2 + $0x90] sm:$0xff] %vm1757_vm3, %v1711_v33  ;;  %1683 = vadd.xlane.f32.xlu2 %v1496_v0  ;;  %v1535_v33 = vld [vmem:[#allocation2 + $0x110] sm:$0xff]  ;;  %v1536_v0 = vld [vmem:[#allocation2 + $0x118] sm:$0xff] }
 0x1ca   : > { %v1598_v41 = vpop.xlane.xlu1 %1597 }
 0x1cb   : > { %v1594_v28 = vpop.xlane.xlu2 %1593  ;;  %v1709_v27 = vadd.f32 %v1598_v41, %v1517_v63  ;;  %v1537_v41 = vld [vmem:[#allocation2 + $0x120] sm:$0xff] }
 0x1cc   : > { %v1707_v15 = vadd.f32 %v1594_v28, %v1515_v14  ;;  %v1538_v28 = vld [vmem:[#allocation2 + $0x128] sm:$0xff] }
 0x1cd   : > { %1774 = vst.msk [vmem:[#allocation2 + $0x80] sm:$0xff] %vm1757_vm3, %v1709_v27  ;;  %v1539_v27 = vld [vmem:[#allocation2 + $0x130] sm:$0xff] }
 0x1ce   : > { %1772 = vst.msk [vmem:[#allocation2 + $0x70] sm:$0xff] %vm1757_vm3, %v1707_v15 }
 0x1cf   : > { %1685 = vadd.xlane.f32.xlu0 %v1497_v22  ;;  %1687 = vadd.xlane.f32.xlu1 %v1498_v47 }
 0x1d0   : > { %1689 = vadd.xlane.f32.xlu2 %v1499_v42 }
 0x1d2   : > { %v1596_v35 = vpop.xlane.xlu0 %1595  ;;  %v1604_v29 = vpop.xlane.xlu1 %1603 }
 0x1d3   : > { %v1708_v53 = vadd.f32 %v1596_v35, %v1516_v61  ;;  %v1712_v32 = vadd.f32 %v1604_v29, %v1520_v49  ;;  %v1606_v6 = vpop.xlane.xlu2 %1605  ;;  %v1540_v49 = vld [vmem:[#allocation2 + $0x138] sm:$0xff] }
 0x1d4   : > { %v1713_v19 = vadd.f32 %v1606_v6, %v1521_v23  ;;  %v1542_v23 = vld [vmem:[#allocation2 + $0x148] sm:$0xff] }
 0x1d5   : > { %1773 = vst.msk [vmem:[#allocation2 + $0x78] sm:$0xff] %vm1757_vm3, %v1708_v53 }
 0x1d6   : > { %1777 = vst.msk [vmem:[#allocation2 + $0x98] sm:$0xff] %vm1757_vm3, %v1712_v32 }
 0x1d7   : > { %1778 = vst.msk [vmem:[#allocation2 + $0xa0] sm:$0xff] %vm1757_vm3, %v1713_v19  ;;  %1691 = vadd.xlane.f32.xlu0 %v1500_v34  ;;  %v1543_v34 = vld [vmem:[#allocation2 + $0x150] sm:$0xff] }
 0x1da   : > { %v1608_v4 = vpop.xlane.xlu0 %1607  ;;  %v1610_v44 = vpop.xlane.xlu1 %1609 }
 0x1db   : > { %v1714_v17 = vadd.f32 %v1608_v4, %v1522_v11  ;;  %v1715_v1 = vadd.f32 %v1610_v44, %v1523_v51  ;;  %v1612_v30 = vpop.xlane.xlu2 %1611  ;;  %v1544_v11 = vld [vmem:[#allocation2 + $0x158] sm:$0xff]  ;;  %v1545_v51 = vld [vmem:[#allocation2 + $0x160] sm:$0xff] }
 0x1dc   : > { %v1716_v52 = vadd.f32 %v1612_v30, %v1524_v50 }
 0x1dd   : > { %1779 = vst.msk [vmem:[#allocation2 + $0xa8] sm:$0xff] %vm1757_vm3, %v1714_v17 }
 0x1de   : > { %1780 = vst.msk [vmem:[#allocation2 + $0xb0] sm:$0xff] %vm1757_vm3, %v1715_v1 }
 0x1df   : > { %1781 = vst.msk [vmem:[#allocation2 + $0xb8] sm:$0xff] %vm1757_vm3, %v1716_v52  ;;  %v1546_v52 = vld [vmem:[#allocation2 + $0x168] sm:$0xff] }
 0x1e2   : > { %v1614_v36 = vpop.xlane.xlu0 %1613  ;;  %v1616_v58 = vpop.xlane.xlu1 %1615 }
 0x1e3   : > { %v1717_v5 = vadd.f32 %v1614_v36, %v1525_v54  ;;  %v1718_v57 = vadd.f32 %v1616_v58, %v1526_v2  ;;  %v1618_v45 = vpop.xlane.xlu2 %1617  ;;  %v1547_v54 = vld [vmem:[#allocation2 + $0x170] sm:$0xff]  ;;  %v1548_v2 = vld [vmem:[#allocation2 + $0x178] sm:$0xff] }
 0x1e4   : > { %v1719_v46 = vadd.f32 %v1618_v45, %v1527_v25 }
 0x1e5   : > { %1782 = vst.msk [vmem:[#allocation2 + $0xc0] sm:$0xff] %vm1757_vm3, %v1717_v5 }
 0x1e6   : > { %1783 = vst.msk [vmem:[#allocation2 + $0xc8] sm:$0xff] %vm1757_vm3, %v1718_v57 }
 0x1e7   : > { %1784 = vst.msk [vmem:[#allocation2 + $0xd0] sm:$0xff] %vm1757_vm3, %v1719_v46  ;;  %v1549_v46 = vld [vmem:[#allocation2 + $0x180] sm:$0xff] }
 0x1ea   : > { %v1620_v12 = vpop.xlane.xlu0 %1619  ;;  %v1622_v24 = vpop.xlane.xlu1 %1621 }
 0x1eb   : > { %v1720_v13 = vadd.f32 %v1620_v12, %v1528_v38  ;;  %v1721_v39 = vadd.f32 %v1622_v24, %v1529_v48  ;;  %v1624_v7 = vpop.xlane.xlu2 %1623  ;;  %v1550_v38 = vld [vmem:[#allocation2 + $0x188] sm:$0xff]  ;;  %v1551_v48 = vld [vmem:[#allocation2 + $0x190] sm:$0xff] }
 0x1ec   : > { %v1722_v18 = vadd.f32 %v1624_v7, %v1530_v20 }
 0x1ed   : > { %1785 = vst.msk [vmem:[#allocation2 + $0xd8] sm:$0xff] %vm1757_vm3, %v1720_v13 }
 0x1ee   : > { %1786 = vst.msk [vmem:[#allocation2 + $0xe0] sm:$0xff] %vm1757_vm3, %v1721_v39 }
 0x1ef   : > { %1787 = vst.msk [vmem:[#allocation2 + $0xe8] sm:$0xff] %vm1757_vm3, %v1722_v18  ;;  %v1552_v18 = vld [vmem:[#allocation2 + $0x198] sm:$0xff] }
 0x1f2   : > { %v1626_v16 = vpop.xlane.xlu0 %1625  ;;  %v1628_v37 = vpop.xlane.xlu1 %1627 }
 0x1f3   : > { %v1723_v31 = vadd.f32 %v1626_v16, %v1531_v8  ;;  %v1724_v59 = vadd.f32 %v1628_v37, %v1532_v9  ;;  %v1630_v10 = vpop.xlane.xlu2 %1629  ;;  %v1553_v8 = vld [vmem:[#allocation2 + $0x1a0] sm:$0xff]  ;;  %v1554_v9 = vld [vmem:[#allocation2 + $0x1a8] sm:$0xff] }
 0x1f4   : > { %v1725_v3 = vadd.f32 %v1630_v10, %v1533_v43 }
 0x1f5   : > { %1788 = vst.msk [vmem:[#allocation2 + $0xf0] sm:$0xff] %vm1757_vm3, %v1723_v31 }
 0x1f6   : > { %1789 = vst.msk [vmem:[#allocation2 + $0xf8] sm:$0xff] %vm1757_vm3, %v1724_v59 }
 0x1f7   : > { %1790 = vst.msk [vmem:[#allocation2 + $0x100] sm:$0xff] %vm1757_vm3, %v1725_v3  ;;  %v1555_v3 = vld [vmem:[#allocation2 + $0x1b0] sm:$0xff] }
 0x1fa   : > { %v1632_v55 = vpop.xlane.xlu0 %1631  ;;  %v1634_v63 = vpop.xlane.xlu1 %1633 }
 0x1fb   : > { %v1726_v14 = vadd.f32 %v1632_v55, %v1534_v21  ;;  %v1727_v62 = vadd.f32 %v1634_v63, %v1535_v33  ;;  %v1636_v26 = vpop.xlane.xlu2 %1635  ;;  %v1556_v21 = vld [vmem:[#allocation2 + $0x1b8] sm:$0xff]  ;;  %v1557_v33 = vld [vmem:[#allocation2 + $0x1c0] sm:$0xff] }
 0x1fc   : > { %v1728_v56 = vadd.f32 %v1636_v26, %v1536_v0 }
 0x1fd   : > { %1791 = vst.msk [vmem:[#allocation2 + $0x108] sm:$0xff] %vm1757_vm3, %v1726_v14 }
 0x1fe   : > { %1792 = vst.msk [vmem:[#allocation2 + $0x110] sm:$0xff] %vm1757_vm3, %v1727_v62 }
 0x1ff   : > { %1793 = vst.msk [vmem:[#allocation2 + $0x118] sm:$0xff] %vm1757_vm3, %v1728_v56  ;;  %v1558_v56 = vld [vmem:[#allocation2 + $0x1c8] sm:$0xff] }
 0x202   : > { %v1638_v15 = vpop.xlane.xlu0 %1637  ;;  %v1640_v47 = vpop.xlane.xlu1 %1639 }
 0x203   : > { %v1729_v22 = vadd.f32 %v1638_v15, %v1537_v41  ;;  %v1730_v42 = vadd.f32 %v1640_v47, %v1538_v28  ;;  %v1642_v60 = vpop.xlane.xlu2 %1641  ;;  %v1559_v41 = vld [vmem:[#allocation2 + $0x1d0] sm:$0xff]  ;;  %v1560_v28 = vld [vmem:[#allocation2 + $0x1d8] sm:$0xff] }
 0x204   : > { %v1731_v61 = vadd.f32 %v1642_v60, %v1539_v27 }
 0x205   : > { %1794 = vst.msk [vmem:[#allocation2 + $0x120] sm:$0xff] %vm1757_vm3, %v1729_v22 }
 0x206   : > { %1795 = vst.msk [vmem:[#allocation2 + $0x128] sm:$0xff] %vm1757_vm3, %v1730_v42 }
 0x207   : > { %1796 = vst.msk [vmem:[#allocation2 + $0x130] sm:$0xff] %vm1757_vm3, %v1731_v61  ;;  %v1561_v61 = vld [vmem:[#allocation2 + $0x1e0] sm:$0xff] }
 0x20a   : > { %v1644_v35 = vpop.xlane.xlu0 %1643  ;;  %v1646_v29 = vpop.xlane.xlu1 %1645 }
 0x20b   : > { %v1732_v53 = vadd.f32 %v1644_v35, %v1540_v49  ;;  %v1733_v32 = vadd.f32 %v1646_v29, %v1541_v40  ;;  %v1648_v6 = vpop.xlane.xlu2 %1647  ;;  %v1562_v49 = vld [vmem:[#allocation2 + $0x1e8] sm:$0xff]  ;;  %v1563_v40 = vld [vmem:[#allocation2 + $0x1f0] sm:$0xff] }
 0x20c   : > { %v1734_v19 = vadd.f32 %v1648_v6, %v1542_v23 }
 0x20d   : > { %1797 = vst.msk [vmem:[#allocation2 + $0x138] sm:$0xff] %vm1757_vm3, %v1732_v53 }
 0x20e   : > { %1798 = vst.msk [vmem:[#allocation2 + $0x140] sm:$0xff] %vm1757_vm3, %v1733_v32 }
 0x20f   : > { %1799 = vst.msk [vmem:[#allocation2 + $0x148] sm:$0xff] %vm1757_vm3, %v1734_v19  ;;  %v1564_v19 = vld [vmem:[#allocation2 + $0x1f8] sm:$0xff] }
 0x212   : > { %v1650_v50 = vpop.xlane.xlu0 %1649  ;;  %v1652_v4 = vpop.xlane.xlu1 %1651 }
 0x213   : > { %v1735_v44 = vadd.f32 %v1650_v50, %v1543_v34  ;;  %v1736_v17 = vadd.f32 %v1652_v4, %v1544_v11  ;;  %v1654_v1 = vpop.xlane.xlu2 %1653 }
 0x214   : > { %v1737_v30 = vadd.f32 %v1654_v1, %v1545_v51 }
 0x215   : > { %1800 = vst.msk [vmem:[#allocation2 + $0x150] sm:$0xff] %vm1757_vm3, %v1735_v44 }
 0x216   : > { %1801 = vst.msk [vmem:[#allocation2 + $0x158] sm:$0xff] %vm1757_vm3, %v1736_v17 }
 0x217   : > { %1802 = vst.msk [vmem:[#allocation2 + $0x160] sm:$0xff] %vm1757_vm3, %v1737_v30 }
 0x21a   : > { %v1656_v25 = vpop.xlane.xlu0 %1655  ;;  %v1658_v36 = vpop.xlane.xlu1 %1657 }
 0x21b   : > { %v1738_v58 = vadd.f32 %v1656_v25, %v1546_v52  ;;  %v1739_v5 = vadd.f32 %v1658_v36, %v1547_v54  ;;  %v1660_v57 = vpop.xlane.xlu2 %1659 }
 0x21c   : > { %v1740_v45 = vadd.f32 %v1660_v57, %v1548_v2 }
 0x21d   : > { %1803 = vst.msk [vmem:[#allocation2 + $0x168] sm:$0xff] %vm1757_vm3, %v1738_v58 }
 0x21e   : > { %1804 = vst.msk [vmem:[#allocation2 + $0x170] sm:$0xff] %vm1757_vm3, %v1739_v5 }
 0x21f   : > { %1805 = vst.msk [vmem:[#allocation2 + $0x178] sm:$0xff] %vm1757_vm3, %v1740_v45 }
 0x222   : > { %v1662_v20 = vpop.xlane.xlu0 %1661  ;;  %v1664_v12 = vpop.xlane.xlu1 %1663 }
 0x223   : > { %v1741_v24 = vadd.f32 %v1662_v20, %v1549_v46  ;;  %v1742_v13 = vadd.f32 %v1664_v12, %v1550_v38  ;;  %v1666_v39 = vpop.xlane.xlu2 %1665 }
 0x224   : > { %v1743_v7 = vadd.f32 %v1666_v39, %v1551_v48 }
 0x225   : > { %1806 = vst.msk [vmem:[#allocation2 + $0x180] sm:$0xff] %vm1757_vm3, %v1741_v24 }
 0x226   : > { %1807 = vst.msk [vmem:[#allocation2 + $0x188] sm:$0xff] %vm1757_vm3, %v1742_v13 }
 0x227   : > { %1808 = vst.msk [vmem:[#allocation2 + $0x190] sm:$0xff] %vm1757_vm3, %v1743_v7 }
 0x22a   : > { %v1668_v43 = vpop.xlane.xlu0 %1667  ;;  %v1670_v16 = vpop.xlane.xlu1 %1669 }
 0x22b   : > { %v1744_v37 = vadd.f32 %v1668_v43, %v1552_v18  ;;  %v1745_v31 = vadd.f32 %v1670_v16, %v1553_v8  ;;  %v1672_v59 = vpop.xlane.xlu2 %1671 }
 0x22c   : > { %v1746_v10 = vadd.f32 %v1672_v59, %v1554_v9 }
 0x22d   : > { %1809 = vst.msk [vmem:[#allocation2 + $0x198] sm:$0xff] %vm1757_vm3, %v1744_v37 }
 0x22e   : > { %1810 = vst.msk [vmem:[#allocation2 + $0x1a0] sm:$0xff] %vm1757_vm3, %v1745_v31 }
 0x22f   : > { %1811 = vst.msk [vmem:[#allocation2 + $0x1a8] sm:$0xff] %vm1757_vm3, %v1746_v10 }
 0x232   : > { %v1674_v0 = vpop.xlane.xlu0 %1673  ;;  %v1676_v55 = vpop.xlane.xlu1 %1675 }
 0x233   : > { %v1747_v63 = vadd.f32 %v1674_v0, %v1555_v3  ;;  %v1748_v14 = vadd.f32 %v1676_v55, %v1556_v21  ;;  %v1678_v62 = vpop.xlane.xlu2 %1677 }
 0x234   : > { %v1749_v26 = vadd.f32 %v1678_v62, %v1557_v33 }
 0x235   : > { %1812 = vst.msk [vmem:[#allocation2 + $0x1b0] sm:$0xff] %vm1757_vm3, %v1747_v63 }
 0x236   : > { %1813 = vst.msk [vmem:[#allocation2 + $0x1b8] sm:$0xff] %vm1757_vm3, %v1748_v14 }
 0x237   : > { %1814 = vst.msk [vmem:[#allocation2 + $0x1c0] sm:$0xff] %vm1757_vm3, %v1749_v26 }
 0x23a   : > { %v1680_v27 = vpop.xlane.xlu0 %1679  ;;  %v1682_v15 = vpop.xlane.xlu1 %1681 }
 0x23b   : > { %v1750_v47 = vadd.f32 %v1680_v27, %v1558_v56  ;;  %v1751_v22 = vadd.f32 %v1682_v15, %v1559_v41  ;;  %v1684_v42 = vpop.xlane.xlu2 %1683 }
 0x23c   : > { %v1752_v60 = vadd.f32 %v1684_v42, %v1560_v28 }
 0x23d   : > { %1815 = vst.msk [vmem:[#allocation2 + $0x1c8] sm:$0xff] %vm1757_vm3, %v1750_v47 }
 0x23e   : > { %1816 = vst.msk [vmem:[#allocation2 + $0x1d0] sm:$0xff] %vm1757_vm3, %v1751_v22 }
 0x23f   : > { %1817 = vst.msk [vmem:[#allocation2 + $0x1d8] sm:$0xff] %vm1757_vm3, %v1752_v60 }
 0x242   : > { %v1686_v23 = vpop.xlane.xlu0 %1685  ;;  %v1688_v35 = vpop.xlane.xlu1 %1687 }
 0x243   : > { %v1753_v29 = vadd.f32 %v1686_v23, %v1561_v61  ;;  %v1754_v53 = vadd.f32 %v1688_v35, %v1562_v49  ;;  %v1690_v32 = vpop.xlane.xlu2 %1689 }
 0x244   : > { %v1755_v6 = vadd.f32 %v1690_v32, %v1563_v40 }
 0x245   : > { %1818 = vst.msk [vmem:[#allocation2 + $0x1e0] sm:$0xff] %vm1757_vm3, %v1753_v29 }
 0x246   : > { %1819 = vst.msk [vmem:[#allocation2 + $0x1e8] sm:$0xff] %vm1757_vm3, %v1754_v53 }
 0x247   : > { %1820 = vst.msk [vmem:[#allocation2 + $0x1f0] sm:$0xff] %vm1757_vm3, %v1755_v6 }
 0x249   : > { %1825 = sbr.rel (%p5462_p8) target bundleno = 2173 (0x87d), region = 72 }
 0x24a   : > { %v1692_v34 = vpop.xlane.xlu0 %1691 }
 0x24b   : > { %v1756_v11 = vadd.f32 %v1692_v34, %v1564_v19 }
 0x24d   : > { %1821 = vst.msk [vmem:[#allocation2 + $0x1f8] sm:$0xff] %vm1757_vm3, %v1756_v11 }
 0x24e   : > { %v2178_v51 = vld [vmem:[%s6879_s16] sm:$0xff]  ;;  %vm2437_vm4 = vcmask 1043456   ;;  %v6449_v17 = vld [vmem:[%s10128_s6 + $0xa8] sm:$0xff]  ;;  %vm2340_vm5 = vcmask 64512   ;;  %v6454_v30 = vld [vmem:[%s10128_s6 + $0xd0] sm:$0xff]  ;;  %s10205_s27 = sld [smem:[#allocation38_spill]] }
 0x24f   : > { %v2179_v50 = vpack.c.bf16 %v2178_v51, %v2178_v51  ;;  %v6428_v44 = vld [vmem:[%s10128_s6] sm:$0xff]  ;;  %v1856_v52 = vld [vmem:[#allocation2 + $0xf0] sm:$0xff]  ;;  %v1857_v54 = vld [vmem:[#allocation2 + $0xf8] sm:$0xff] }
 0x250   : > { %v6456_v1 = vld [vmem:[%s10128_s6 + $0xe0] sm:$0xff]  ;;  %v1920_v2 = vmul.f32 0.00390625, %v1856_v52  ;;  %v1921_v25 = vmul.f32 0.00390625, %v1857_v54  ;;  %v1872_v36 = vld [vmem:[#allocation2 + $0x170] sm:$0xff]  ;;  %v1873_v58 = vld [vmem:[#allocation2 + $0x178] sm:$0xff] }
 0x251   : > { %v2439_v4 = vsel %vm2437_vm4, %v2179_v50, 0  ;;  %v1936_v5 = vmul.f32 0.00390625, %v1872_v36  ;;  %v1937_v57 = vmul.f32 0.00390625, %v1873_v58  ;;  %v6429_v38 = vld [vmem:[%s10128_s6 + $0x8] sm:$0xff]  ;;  %v6450_v48 = vld [vmem:[%s10128_s6 + $0xb0] sm:$0xff]  ;;  %v1841_v12 = vld [vmem:[#allocation2 + $0x78] sm:$0xff] }
 0x252   : > { %2448 = vmatpush.bf16.msra.mxu0 %v2439_v4  ;;  %6495 = vmatpush.bf16.msra.mxu1 %v2439_v4  ;;  %v1969_v45 = vpack.c.bf16 %v1921_v25, %v1920_v2  ;;  %v1840_v20 = vld [vmem:[#allocation2 + $0x70] sm:$0xff]  ;;  %v1854_v24 = vld [vmem:[#allocation2 + $0xe0] sm:$0xff]  ;;  %v6457_v13 = vld [vmem:[%s10128_s6 + $0xe8] sm:$0xff]  ;;  %v1905_v7 = vmul.f32 0.00390625, %v1841_v12 }
 0x253   : > { %6497 = vmatpush.bf16.msra.mxu3 %v2439_v4  ;;  %6496 = vmatpush.bf16.msra.mxu2 %v2439_v4  ;;  %v1977_v46 = vpack.c.bf16 %v1937_v57, %v1936_v5  ;;  %v1904_v39 = vmul.f32 0.00390625, %v1840_v20  ;;  %v1855_v18 = vld [vmem:[#allocation2 + $0xe8] sm:$0xff]  ;;  %v1918_v8 = vmul.f32 0.00390625, %v1854_v24  ;;  %v1870_v43 = vld [vmem:[#allocation2 + $0x160] sm:$0xff]  ;;  %v1852_v33 = vld [vmem:[#allocation2 + $0xd0] sm:$0xff] }
 0x254   : > { %v1919_v9 = vmul.f32 0.00390625, %v1855_v18  ;;  %v1871_v16 = vld [vmem:[#allocation2 + $0x168] sm:$0xff]  ;;  %v1934_v31 = vmul.f32 0.00390625, %v1870_v43  ;;  %v1838_v3 = vld [vmem:[#allocation2 + $0x60] sm:$0xff]  ;;  %v1853_v14 = vld [vmem:[#allocation2 + $0xd8] sm:$0xff]  ;;  %v1916_v62 = vmul.f32 0.00390625, %v1852_v33 }
 0x255   : > { %5591 = vmatmul.msk.bf16.vlgmr.msra.gmra.mxu0 %vm2340_vm5, %v6428_v44  ;;  %5612 = vmatmul.msk.bf16.vlgmr.msra.gmra.mxu1 %vm2340_vm5, %v6449_v17  ;;  %v1961_v37 = vpack.c.bf16 %v1905_v7, %v1904_v39  ;;  %v1935_v59 = vmul.f32 0.00390625, %v1871_v16  ;;  %v1839_v21 = vld [vmem:[#allocation2 + $0x68] sm:$0xff]  ;;  %v1902_v55 = vmul.f32 0.00390625, %v1838_v3  ;;  %v1868_v26 = vld [vmem:[#allocation2 + $0x150] sm:$0xff]  ;;  %v1869_v56 = vld [vmem:[#allocation2 + $0x158] sm:$0xff]  ;;  %v1917_v41 = vmul.f32 0.00390625, %v1853_v14 }
 0x256   : > { %5619 = vmatmul.msk.bf16.vlgmr.msra.gmra.mxu3 %vm2340_vm5, %v6456_v1  ;;  %5617 = vmatmul.msk.bf16.vlgmr.msra.gmra.mxu2 %vm2340_vm5, %v6454_v30  ;;  %v1968_v10 = vpack.c.bf16 %v1919_v9, %v1918_v8  ;;  %v1903_v63 = vmul.f32 0.00390625, %v1839_v21  ;;  %v1932_v28 = vmul.f32 0.00390625, %v1868_v26  ;;  %v1933_v27 = vmul.f32 0.00390625, %v1869_v56  ;;  %v1836_v15 = vld [vmem:[#allocation2 + $0x50] sm:$0xff]  ;;  %v1837_v47 = vld [vmem:[#allocation2 + $0x58] sm:$0xff]  ;;  %v1850_v22 = vld [vmem:[#allocation2 + $0xc0] sm:$0xff] }
 0x257   : > { %3419 = vmatpush.bf16.msrb.mxu2 %v1969_v45  ;;  %3588 = vmatpush.bf16.msrb.mxu3 %v1977_v46  ;;  %v1976_v0 = vpack.c.bf16 %v1935_v59, %v1934_v31  ;;  %v1900_v60 = vmul.f32 0.00390625, %v1836_v15  ;;  %v1901_v61 = vmul.f32 0.00390625, %v1837_v47  ;;  %v1851_v49 = vld [vmem:[#allocation2 + $0xc8] sm:$0xff]  ;;  %v1914_v40 = vmul.f32 0.00390625, %v1850_v22  ;;  %v1866_v23 = vld [vmem:[#allocation2 + $0x140] sm:$0xff]  ;;  %v6455_v19 = vld [vmem:[%s10128_s6 + $0xd8] sm:$0xff] }
 0x258   : > { %3250 = vmatpush.bf16.msrb.mxu1 %v1961_v37  ;;  %v1960_v42 = vpack.c.bf16 %v1903_v63, %v1902_v55  ;;  %v1867_v35 = vld [vmem:[#allocation2 + $0x148] sm:$0xff]  ;;  %v1967_v29 = vpack.c.bf16 %v1917_v41, %v1916_v62  ;;  %v1975_v53 = vpack.c.bf16 %v1933_v27, %v1932_v28  ;;  %v1915_v32 = vmul.f32 0.00390625, %v1851_v49  ;;  %v1834_v34 = vld [vmem:[#allocation2 + $0x40] sm:$0xff]  ;;  %v1848_v17 = vld [vmem:[#allocation2 + $0xb0] sm:$0xff] }
 0x259   : > { %v1930_v6 = vmul.f32 0.00390625, %v1866_v23  ;;  %v1835_v11 = vld [vmem:[#allocation2 + $0x48] sm:$0xff]  ;;  %v1959_v51 = vpack.c.bf16 %v1901_v61, %v1900_v60  ;;  %v1931_v50 = vmul.f32 0.00390625, %v1867_v35  ;;  %v1898_v4 = vmul.f32 0.00390625, %v1834_v34  ;;  %v1849_v1 = vld [vmem:[#allocation2 + $0xb8] sm:$0xff]  ;;  %v1864_v2 = vld [vmem:[#allocation2 + $0x130] sm:$0xff] }
 0x25a   : > { %v1899_v44 = vmul.f32 0.00390625, %v1835_v11  ;;  %v1966_v30 = vpack.c.bf16 %v1915_v32, %v1914_v40  ;;  %v1912_v52 = vmul.f32 0.00390625, %v1848_v17  ;;  %v1913_v54 = vmul.f32 0.00390625, %v1849_v1  ;;  %v1865_v25 = vld [vmem:[#allocation2 + $0x138] sm:$0xff]  ;;  %v6430_v46 = vld [vmem:[%s10128_s6 + $0x10] sm:$0xff]  ;;  %v1846_v24 = vld [vmem:[#allocation2 + $0xa0] sm:$0xff] }
 0x25b   : > { %3420 = vmatpush.bf16.msrb.mxu2 %v1968_v10  ;;  %3589 = vmatpush.bf16.msrb.mxu3 %v1976_v0  ;;  %v1974_v36 = vpack.c.bf16 %v1931_v50, %v1930_v6  ;;  %v1928_v58 = vmul.f32 0.00390625, %v1864_v2  ;;  %v1929_v5 = vmul.f32 0.00390625, %v1865_v25  ;;  %v1832_v20 = vld [vmem:[#allocation2 + $0x30] sm:$0xff]  ;;  %v1833_v12 = vld [vmem:[#allocation2 + $0x38] sm:$0xff]  ;;  %v1847_v18 = vld [vmem:[#allocation2 + $0xa8] sm:$0xff]  ;;  %v1910_v8 = vmul.f32 0.00390625, %v1846_v24 }
 0x25c   : > { %3251 = vmatpush.bf16.msrb.mxu1 %v1960_v42  ;;  %v1958_v57 = vpack.c.bf16 %v1899_v44, %v1898_v4  ;;  %v1965_v45 = vpack.c.bf16 %v1913_v54, %v1912_v52  ;;  %v1896_v39 = vmul.f32 0.00390625, %v1832_v20  ;;  %v1897_v7 = vmul.f32 0.00390625, %v1833_v12  ;;  %v1862_v43 = vld [vmem:[#allocation2 + $0x120] sm:$0xff]  ;;  %v1863_v16 = vld [vmem:[#allocation2 + $0x128] sm:$0xff]  ;;  %v1844_v33 = vld [vmem:[#allocation2 + $0x90] sm:$0xff] }
 0x25d   : > { %v1911_v9 = vmul.f32 0.00390625, %v1847_v18  ;;  %v1926_v31 = vmul.f32 0.00390625, %v1862_v43  ;;  %v1927_v59 = vmul.f32 0.00390625, %v1863_v16  ;;  %v1830_v3 = vld [vmem:[#allocation2 + $0x20] sm:$0xff]  ;;  %v1831_v21 = vld [vmem:[#allocation2 + $0x28] sm:$0xff]  ;;  %v1845_v14 = vld [vmem:[#allocation2 + $0x98] sm:$0xff] }
 0x25e   : > { %v1957_v37 = vpack.c.bf16 %v1897_v7, %v1896_v39  ;;  %v1894_v55 = vmul.f32 0.00390625, %v1830_v3  ;;  %v1895_v63 = vmul.f32 0.00390625, %v1831_v21  ;;  %v1908_v62 = vmul.f32 0.00390625, %v1844_v33  ;;  %v1860_v26 = vld [vmem:[#allocation2 + $0x110] sm:$0xff]  ;;  %v1861_v56 = vld [vmem:[#allocation2 + $0x118] sm:$0xff]  ;;  %v1842_v22 = vld [vmem:[#allocation2 + $0x80] sm:$0xff] }
 0x25f   : > { %3421 = vmatpush.bf16.msrb.mxu2 %v1967_v29  ;;  %3590 = vmatpush.bf16.msrb.mxu3 %v1975_v53  ;;  %v1964_v10 = vpack.c.bf16 %v1911_v9, %v1910_v8  ;;  %v1972_v0 = vpack.c.bf16 %v1927_v59, %v1926_v31  ;;  %v1909_v41 = vmul.f32 0.00390625, %v1845_v14  ;;  %v1924_v28 = vmul.f32 0.00390625, %v1860_v26  ;;  %v1828_v15 = vld [vmem:[#allocation2 + $0x10] sm:$0xff]  ;;  %v1829_v47 = vld [vmem:[#allocation2 + $0x18] sm:$0xff]  ;;  %v1843_v49 = vld [vmem:[#allocation2 + $0x88] sm:$0xff] }
 0x260   : > { %3252 = vmatpush.bf16.msrb.mxu1 %v1959_v51  ;;  %v1925_v27 = vmul.f32 0.00390625, %v1861_v56  ;;  %v1956_v42 = vpack.c.bf16 %v1895_v63, %v1894_v55  ;;  %v1892_v60 = vmul.f32 0.00390625, %v1828_v15  ;;  %v1893_v61 = vmul.f32 0.00390625, %v1829_v47  ;;  %v1858_v23 = vld [vmem:[#allocation2 + $0x100] sm:$0xff]  ;;  %v1859_v35 = vld [vmem:[#allocation2 + $0x108] sm:$0xff]  ;;  %v6431_v2 = vld [vmem:[%s10128_s6 + $0x18] sm:$0xff] }
 0x261   : > { %v1906_v40 = vmul.f32 0.00390625, %v1842_v22  ;;  %v1963_v29 = vpack.c.bf16 %v1909_v41, %v1908_v62  ;;  %v1907_v32 = vmul.f32 0.00390625, %v1843_v49  ;;  %v1922_v6 = vmul.f32 0.00390625, %v1858_v23  ;;  %v1826_v11 = vld [vmem:[#allocation2] sm:$0xff]  ;;  %v1827_v51 = vld [vmem:[#allocation2 + $0x8] sm:$0xff]  ;;  %v6435_v15 = vld [vmem:[%s10128_s6 + $0x38] sm:$0xff] }
 0x262   : > { %v1971_v53 = vpack.c.bf16 %v1925_v27, %v1924_v28  ;;  %v1923_v34 = vmul.f32 0.00390625, %v1859_v35  ;;  %v6300_v4 = vld [vmem:[%s10127_s5 + $0x4] sm:$0xf]  ;;  %v5627_v44 = vld [vmem:[%s10127_s5 + $0x10] sm:$0xf0]  ;;  %v1890_v17 = vmul.f32 0.00390625, %v1826_v11 }
 0x263   : > { %3422 = vmatpush.bf16.msrb.mxu2 %v1966_v30  ;;  %3591 = vmatpush.bf16.msrb.mxu3 %v1974_v36  ;;  %v1962_v50 = vpack.c.bf16 %v1907_v32, %v1906_v40  ;;  %v1891_v1 = vmul.f32 0.00390625, %v1827_v51  ;;  %v5630_v52 = vor.u32 %v6300_v4, %v5627_v44  ;;  %v6452_v25 = vld [vmem:[%s10128_s6 + $0xc0] sm:$0xff]  ;;  %v6459_v36 = vld [vmem:[%s10128_s6 + $0xf8] sm:$0xff]  ;;  %v5659_v24 = vld [vmem:[%s10127_s5 + $0x50] sm:$0xf0] }
 0x264   : > { %3253 = vmatpush.bf16.msrb.mxu1 %v1958_v57  ;;  %v1970_v30 = vpack.c.bf16 %v1923_v34, %v1922_v6  ;;  %v6308_v12 = vld [vmem:[%s10127_s5 + $0x44] sm:$0xf]  ;;  %v6302_v39 = vld [vmem:[%s10127_s5 + $0xc] sm:$0xf0]  ;;  %v5649_v18 = vld [vmem:[%s10127_s5 + $0x28] sm:$0xf] }
 0x265   : > { %5592 = vmatmul.msk.bf16.gmra.mxu0 %vm2340_vm5, %v6429_v38  ;;  %5613 = vmatmul.msk.bf16.gmra.mxu1 %vm2340_vm5, %v6450_v48  ;;  %v6451_v38 = vld [vmem:[%s10128_s6 + $0xb8] sm:$0xff]  ;;  %v1973_v48 = vpack.c.bf16 %v1929_v5, %v1928_v58  ;;  %v1954_v54 = vpack.c.bf16 %v1891_v1, %v1890_v17  ;;  %v6304_v58 = vld [vmem:[%s10127_s5 + $0x24] sm:$0xf]  ;;  %v5643_v5 = vld [vmem:[%s10127_s5 + $0x30] sm:$0xf0]  ;;  %v5662_v7 = vor.u32 %v6308_v12, %v5659_v24 }
 0x266   : > { %5620 = vmatmul.msk.bf16.gmra.mxu3 %vm2340_vm5, %v6457_v13  ;;  %5618 = vmatmul.msk.bf16.gmra.mxu2 %vm2340_vm5, %v6455_v19  ;;  %v6458_v13 = vld [vmem:[%s10128_s6 + $0xf0] sm:$0xff]  ;;  %v1955_v19 = vpack.c.bf16 %v1893_v61, %v1892_v60  ;;  %v5646_v57 = vor.u32 %v6304_v58, %v5643_v5  ;;  %v6307_v8 = vld [vmem:[%s10127_s5 + $0x34] sm:$0xf0]  ;;  %v6433_v9 = vld [vmem:[%s10128_s6 + $0x28] sm:$0xff] }
 0x267   : > { %3423 = vmatpush.bf16.msrb.mxu2 %v1965_v45  ;;  %3592 = vmatpush.bf16.msrb.mxu3 %v1973_v48  ;;  %v5633_v45 = vld [vmem:[%s10127_s5 + $0x8] sm:$0xf]  ;;  %v5650_v16 = vor.u32 %v6307_v8, %v5649_v18  ;;  %v5675_v31 = vld [vmem:[%s10127_s5 + $0x70] sm:$0xf0]  ;;  %v5641_v59 = vld [vmem:[%s10127_s5 + $0x20] sm:$0xf] }
 0x268   : > { %3254 = vmatpush.bf16.msrb.mxu1 %v1957_v37  ;;  %v6453_v48 = vld [vmem:[%s10128_s6 + $0xc8] sm:$0xff]  ;;  %v6312_v37 = vld [vmem:[%s10127_s5 + $0x64] sm:$0xf]  ;;  %v6311_v33 = vld [vmem:[%s10127_s5 + $0x54] sm:$0xf0] }
 0x269   : > { %v5678_v3 = vor.u32 %v6312_v37, %v5675_v31  ;;  %v5665_v21 = vld [vmem:[%s10127_s5 + $0x48] sm:$0xf]  ;;  %v6316_v14 = vld [vmem:[%s10127_s5 + $0x84] sm:$0xf]  ;;  %v5691_v62 = vld [vmem:[%s10127_s5 + $0x90] sm:$0xf0] }
 0x26a   : > { %v5666_v63 = vor.u32 %v6311_v33, %v5665_v21  ;;  %v5657_v26 = vld [vmem:[%s10127_s5 + $0x40] sm:$0xf]  ;;  %v6310_v56 = vld [vmem:[%s10127_s5 + $0x4c] sm:$0xf0]  ;;  %v5694_v41 = vor.u32 %v6316_v14, %v5691_v62  ;;  %v5681_v28 = vld [vmem:[%s10127_s5 + $0x68] sm:$0xf] }
 0x26b   : > { %3424 = vmatpush.bf16.msrb.mxu2 %v1964_v10  ;;  %3593 = vmatpush.bf16.msrb.mxu3 %v1972_v0  ;;  %v6306_v10 = vld [vmem:[%s10127_s5 + $0x2c] sm:$0xf0]  ;;  %v6315_v27 = vld [vmem:[%s10127_s5 + $0x74] sm:$0xf0]  ;;  %v5658_v47 = vor.u32 %v6310_v56, %v5657_v26  ;;  %v5707_v60 = vld [vmem:[%s10127_s5 + $0xb0] sm:$0xf0] }
 0x26c   : > { %3255 = vmatpush.bf16.msrb.mxu1 %v1956_v42  ;;  %v6434_v0 = vld [vmem:[%s10128_s6 + $0x30] sm:$0xff]  ;;  %v5642_v55 = vor.u32 %v6306_v10, %v5641_v59  ;;  %v5682_v22 = vor.u32 %v6315_v27, %v5681_v28  ;;  %v6320_v42 = vld [vmem:[%s10127_s5 + $0xa4] sm:$0xf]  ;;  %v5673_v61 = vld [vmem:[%s10127_s5 + $0x60] sm:$0xf] }
 0x26d   : > { %v6314_v49 = vld [vmem:[%s10127_s5 + $0x6c] sm:$0xf0]  ;;  %v5710_v40 = vor.u32 %v6320_v42, %v5707_v60  ;;  %v5697_v23 = vld [vmem:[%s10127_s5 + $0x88] sm:$0xf]  ;;  %v6319_v35 = vld [vmem:[%s10127_s5 + $0x94] sm:$0xf0] }
 0x26e   : > { %v5723_v4 = vld [vmem:[%s10127_s5 + $0xd0] sm:$0xf0]  ;;  %v5689_v44 = vld [vmem:[%s10127_s5 + $0x80] sm:$0xf]  ;;  %v6318_v17 = vld [vmem:[%s10127_s5 + $0x8c] sm:$0xf0] }
 0x26f   : > { %3425 = vmatpush.bf16.msrb.mxu2 %v1963_v29  ;;  %3594 = vmatpush.bf16.msrb.mxu3 %v1971_v53  ;;  %v6436_v29 = vld [vmem:[%s10128_s6 + $0x40] sm:$0xff]  ;;  %v5674_v53 = vor.u32 %v6314_v49, %v5673_v61  ;;  %v5739_v12 = vld [vmem:[%s10127_s5 + $0xf0] sm:$0xf0]  ;;  %v6327_v18 = vld [vmem:[%s10127_s5 + $0xd4] sm:$0xf0] }
 0x270   : > { %3256 = vmatpush.bf16.msrb.mxu1 %v1955_v19  ;;  %v5698_v19 = vor.u32 %v6319_v35, %v5697_v23  ;;  %v5705_v24 = vld [vmem:[%s10127_s5 + $0xa0] sm:$0xf]  ;;  %v6438_v8 = vld [vmem:[%s10128_s6 + $0x50] sm:$0xff]  ;;  %v5745_v26 = vld [vmem:[%s10127_s5 + $0xe8] sm:$0xf] }
 0x271   : > { %v6326_v14 = vld [vmem:[%s10127_s5 + $0xcc] sm:$0xf0]  ;;  %v6331_v56 = vld [vmem:[%s10127_s5 + $0xf4] sm:$0xf0] }
 0x272   : > { %v6330_v35 = vld [vmem:[%s10127_s5 + $0xec] sm:$0xf0] }
 0x273   : > { %3426 = vmatpush.bf16.msrb.mxu2 %v1962_v50  ;;  %3595 = vmatpush.bf16.msrb.mxu3 %v1970_v30  ;;  %v6324_v50 = vld [vmem:[%s10127_s5 + $0xc4] sm:$0xf]  ;;  %v5713_v30 = vld [vmem:[%s10127_s5 + $0xa8] sm:$0xf] }
 0x274   : > { %3257 = vmatpush.bf16.msrb.mxu1 %v1954_v54  ;;  %v5726_v1 = vor.u32 %v6324_v50, %v5723_v4  ;;  %v6437_v54 = vld [vmem:[%s10128_s6 + $0x48] sm:$0xff]  ;;  %v6335_v50 = vld [vmem:[%s10127_s5 + $0x114] sm:$0xf0] }
 0x275   : > { %5593 = vmatmul.msk.bf16.gmra.mxu0 %vm2340_vm5, %v6430_v46  ;;  %5614 = vmatmul.msk.bf16.gmra.mxu1 %vm2340_vm5, %v6451_v38  ;;  %v6303_v46 = vld [vmem:[%s10127_s5 + $0x14] sm:$0xf0]  ;;  %v6432_v38 = vld [vmem:[%s10128_s6 + $0x20] sm:$0xff] }
 0x276   : > { %5621 = vmatmul.msk.bf16.gmra.mxu3 %vm2340_vm5, %v6458_v13  ;;  %3427 = vmatmul.bf16.vlgmr.msrb.gmra.mxu2 %v5630_v52  ;;  %v5634_v20 = vor.u32 %v6303_v46, %v5633_v45  ;;  %v5625_v13 = vld [vmem:[%s10127_s5] sm:$0xf]  ;;  %v6323_v52 = vld [vmem:[%s10127_s5 + $0xb4] sm:$0xf0] }
 0x277   : > { %v5626_v43 = vor.u32 %v6302_v39, %v5625_v13  ;;  %v5714_v5 = vor.u32 %v6323_v52, %v5713_v30  ;;  %v6322_v13 = vld [vmem:[%s10127_s5 + $0xac] sm:$0xf0] }
 0x285   : > { %5594 = vmatmul.msk.bf16.gmra.mxu0 %vm2340_vm5, %v6431_v2  ;;  %5615 = vmatmul.msk.bf16.gmra.mxu1 %vm2340_vm5, %v6452_v25  ;;  %v5690_v2 = vor.u32 %v6318_v17, %v5689_v44  ;;  %v6440_v44 = vld [vmem:[%s10128_s6 + $0x60] sm:$0xff] }
 0x286   : > { %5622 = vmatmul.msk.bf16.gmra.mxu3 %vm2340_vm5, %v6459_v36  ;;  %3432 = vmatmul.bf16.gmra.mxu2 %v5646_v57 }
 0x295   : > { %5595 = vmatmul.msk.bf16.gmra.mxu0 %vm2340_vm5, %v6432_v38  ;;  %5616 = vmatmul.msk.bf16.gmra.mxu1 %vm2340_vm5, %v6453_v48 }
 0x296   : > { %3596 = vmatmul.bf16.vlgmr.msrb.gmra.mxu3 %v5634_v20  ;;  %3437 = vmatmul.bf16.gmra.mxu2 %v5662_v7  ;;  %v6328_v20 = vld [vmem:[%s10127_s5 + $0xe4] sm:$0xf]  ;;  %v5729_v7 = vld [vmem:[%s10127_s5 + $0xc8] sm:$0xf] }
 0x297   : > { %v5742_v39 = vor.u32 %v6328_v20, %v5739_v12  ;;  %v5730_v31 = vor.u32 %v6327_v18, %v5729_v7  ;;  %v6340_v7 = vld [vmem:[%s10127_s5 + $0x144] sm:$0xf]  ;;  %v5787_v18 = vld [vmem:[%s10127_s5 + $0x150] sm:$0xf0] }
 0x2a5   : > { %5596 = vmatmul.msk.bf16.gmra.mxu0 %vm2340_vm5, %v6433_v9  ;;  %3258 = vmatmul.bf16.vlgmr.msrb.gmra.mxu1 %v5626_v43  ;;  %v5706_v9 = vor.u32 %v6322_v13, %v5705_v24  ;;  %v5753_v24 = vld [vmem:[%s10127_s5 + $0x100] sm:$0xf] }
 0x2a6   : > { %3601 = vmatmul.bf16.gmra.mxu3 %v5650_v16  ;;  %3442 = vmatmul.bf16.gmra.mxu2 %v5678_v3 }
 0x2b5   : > { %5597 = vmatmul.msk.bf16.gmra.mxu0 %vm2340_vm5, %v6434_v0  ;;  %3263 = vmatmul.bf16.gmra.mxu1 %v5642_v55  ;;  %v6332_v0 = vld [vmem:[%s10127_s5 + $0x104] sm:$0xf]  ;;  %v5755_v55 = vld [vmem:[%s10127_s5 + $0x110] sm:$0xf0] }
 0x2b6   : > { %3606 = vmatmul.bf16.gmra.mxu3 %v5666_v63  ;;  %3447 = vmatmul.bf16.gmra.mxu2 %v5694_v41  ;;  %v5721_v63 = vld [vmem:[%s10127_s5 + $0xc0] sm:$0xf]  ;;  %v5758_v62 = vor.u32 %v6332_v0, %v5755_v55  ;;  %v6439_v41 = vld [vmem:[%s10128_s6 + $0x58] sm:$0xff]  ;;  %v6441_v0 = vld [vmem:[%s10128_s6 + $0x68] sm:$0xff] }
 0x2b7   : > { %v5722_v28 = vor.u32 %v6326_v14, %v5721_v63 }
 0x2c5   : > { %5598 = vmatmul.msk.bf16.gmra.mxu0 %vm2340_vm5, %v6435_v15  ;;  %3268 = vmatmul.bf16.gmra.mxu1 %v5658_v47 }
 0x2c6   : > { %3611 = vmatmul.bf16.gmra.mxu3 %v5682_v22  ;;  %3452 = vmatmul.bf16.gmra.mxu2 %v5710_v40  ;;  %v5746_v22 = vor.u32 %v6331_v56, %v5745_v26  ;;  %v5737_v40 = vld [vmem:[%s10127_s5 + $0xe0] sm:$0xf] }
 0x2c7   : > { %v5738_v17 = vor.u32 %v6330_v35, %v5737_v40 }
 0x2d2   : > { %v7880_v32 = vpop.f32.mrf.mxu0  ;;  %v7882_v6 = vpop.f32.mrf.mxu1 }
 0x2d3   : > { %10145 = vst [vmem:[#allocation8_spill] sm:$0xff] %v7882_v6 }
 0x2d5   : > { %5599 = vmatmul.msk.bf16.gmra.mxu0 %vm2340_vm5, %v6436_v29  ;;  %3273 = vmatmul.bf16.gmra.mxu1 %v5674_v53  ;;  %v6336_v29 = vld [vmem:[%s10127_s5 + $0x124] sm:$0xf]  ;;  %v5771_v53 = vld [vmem:[%s10127_s5 + $0x130] sm:$0xf0] }
 0x2d6   : > { %3616 = vmatmul.bf16.gmra.mxu3 %v5698_v19  ;;  %3457 = vmatmul.bf16.gmra.mxu2 %v5726_v1  ;;  %v5761_v19 = vld [vmem:[%s10127_s5 + $0x108] sm:$0xf]  ;;  %v5774_v4 = vor.u32 %v6336_v29, %v5771_v53 }
 0x2d9   : > { %v7885_v34 = vpop.f32.mrf.mxu3  ;;  %v7918_v57 = vpop.f32.mrf.mxu2 }
 0x2da   : > { %10146 = vst [vmem:[#allocation9_spill] sm:$0xff] %v7885_v34  ;;  %v7887_v11 = vpop.f32.mrf.mxu0  ;;  %v7889_v51 = vpop.f32.mrf.mxu1 }
 0x2db   : > { %10147 = vst [vmem:[#allocation10_spill] sm:$0xff] %v7889_v51 }
 0x2e1   : > { %v7912_v25 = vpop.f32.mrf.mxu3  ;;  %v7927_v48 = vpop.f32.mrf.mxu2 }
 0x2e2   : > { %10148 = vst [vmem:[#allocation11_spill] sm:$0xff] %v7912_v25  ;;  %v7914_v36 = vpop.f32.mrf.mxu0  ;;  %v7916_v58 = vpop.f32.mrf.mxu1 }
 0x2e3   : > { %10149 = vst [vmem:[#allocation12_spill] sm:$0xff] %v7916_v58 }
 0x2e4   : > { %10152 = vst [vmem:[#allocation15_spill] sm:$0xff] %v7927_v48 }
 0x2e5   : > { %5600 = vmatmul.msk.bf16.gmra.mxu0 %vm2340_vm5, %v6437_v54  ;;  %3278 = vmatmul.bf16.gmra.mxu1 %v5690_v2  ;;  %v5762_v54 = vor.u32 %v6335_v50, %v5761_v19  ;;  %v5769_v50 = vld [vmem:[%s10127_s5 + $0x120] sm:$0xf] }
 0x2e6   : > { %3621 = vmatmul.bf16.gmra.mxu3 %v5714_v5  ;;  %3462 = vmatmul.bf16.gmra.mxu2 %v5742_v39  ;;  %v6334_v39 = vld [vmem:[%s10127_s5 + $0x10c] sm:$0xf0] }
 0x2e7   : > { %v5754_v55 = vor.u32 %v6334_v39, %v5753_v24 }
 0x2e9   : > { %v7921_v45 = vpop.f32.mrf.mxu3  ;;  %v7956_v59 = vpop.f32.mrf.mxu2 }
 0x2ea   : > { %10150 = vst [vmem:[#allocation13_spill] sm:$0xff] %v7921_v45  ;;  %v7923_v46 = vpop.f32.mrf.mxu0  ;;  %v7925_v38 = vpop.f32.mrf.mxu1 }
 0x2eb   : > { %10151 = vst [vmem:[#allocation14_spill] sm:$0xff] %v7925_v38 }
 0x2f1   : > { %v7950_v43 = vpop.f32.mrf.mxu3  ;;  %v7965_v33 = vpop.f32.mrf.mxu2 }
 0x2f2   : > { %10153 = vst [vmem:[#allocation16_spill] sm:$0xff] %v7950_v43  ;;  %v7952_v16 = vpop.f32.mrf.mxu0  ;;  %v7954_v37 = vpop.f32.mrf.mxu1 }
 0x2f3   : > { %10154 = vst [vmem:[#allocation17_spill] sm:$0xff] %v7954_v37 }
 0x2f4   : > { %10157 = vst [vmem:[#allocation20_spill] sm:$0xff] %v7965_v33 }
 0x2f5   : > { %5601 = vmatmul.msk.bf16.gmra.mxu0 %vm2340_vm5, %v6438_v8  ;;  %3283 = vmatmul.bf16.gmra.mxu1 %v5706_v9  ;;  %v5777_v8 = vld [vmem:[%s10127_s5 + $0x128] sm:$0xf]  ;;  %v6339_v9 = vld [vmem:[%s10127_s5 + $0x134] sm:$0xf0] }
 0x2f6   : > { %3626 = vmatmul.bf16.gmra.mxu3 %v5730_v31  ;;  %3467 = vmatmul.bf16.gmra.mxu2 %v5758_v62  ;;  %v5790_v31 = vor.u32 %v6340_v7, %v5787_v18  ;;  %v5778_v26 = vor.u32 %v6339_v9, %v5777_v8 }
 0x2f9   : > { %v7959_v10 = vpop.f32.mrf.mxu3  ;;  %v3428_v42 = vpop.f32.mrf.mxu2 }
 0x2fa   : > { %10155 = vst [vmem:[#allocation18_spill] sm:$0xff] %v7959_v10  ;;  %v7961_v3 = vpop.f32.mrf.mxu0  ;;  %v7963_v21 = vpop.f32.mrf.mxu1 }
 0x2fb   : > { %10156 = vst [vmem:[#allocation19_spill] sm:$0xff] %v7963_v21 }
 0x301   : > { %v7988_v27 = vpop.f32.mrf.mxu3  ;;  %v3430_v23 = vpop.f32.mrf.mxu2 }
 0x302   : > { %10158 = vst [vmem:[#allocation21_spill] sm:$0xff] %v7988_v27  ;;  %v7990_v15 = vpop.f32.mrf.mxu0  ;;  %v7992_v47 = vpop.f32.mrf.mxu1 }
 0x305   : > { %5602 = vmatmul.msk.bf16.gmra.mxu0 %vm2340_vm5, %v6439_v41  ;;  %3288 = vmatmul.bf16.gmra.mxu1 %v5722_v28 }
 0x306   : > { %3631 = vmatmul.bf16.gmra.mxu3 %v5746_v22  ;;  %3472 = vmatmul.bf16.gmra.mxu2 %v5774_v4  ;;  %v6344_v4 = vld [vmem:[%s10127_s5 + $0x164] sm:$0xf] }
 0x309   : > { %v7995_v60 = vpop.f32.mrf.mxu3  ;;  %v3433_v2 = vpop.f32.mrf.mxu2 }
 0x30a   : > { %10159 = vst [vmem:[#allocation22_spill] sm:$0xff] %v7995_v60  ;;  %v7997_v61 = vpop.f32.mrf.mxu0  ;;  %v7999_v49 = vpop.f32.mrf.mxu1 }
 0x30b   : > { %10160 = vst [vmem:[#allocation23_spill] sm:$0xff] %v7999_v49 }
 0x311   : > { %v8022_v1 = vpop.f32.mrf.mxu3  ;;  %v3435_v13 = vpop.f32.mrf.mxu2 }
 0x312   : > { %10161 = vst [vmem:[#allocation24_spill] sm:$0xff] %v8022_v1  ;;  %v8024_v30 = vpop.f32.mrf.mxu0  ;;  %v8026_v52 = vpop.f32.mrf.mxu1 }
 0x315   : > { %5603 = vmatmul.msk.bf16.gmra.mxu0 %vm2340_vm5, %v6440_v44  ;;  %3293 = vmatmul.bf16.gmra.mxu1 %v5738_v17  ;;  %v5803_v44 = vld [vmem:[%s10127_s5 + $0x170] sm:$0xf0] }
 0x316   : > { %3636 = vmatmul.bf16.gmra.mxu3 %v5762_v54  ;;  %3477 = vmatmul.bf16.gmra.mxu2 %v5790_v31  ;;  %v5806_v54 = vor.u32 %v6344_v4, %v5803_v44 }
 0x319   : > { %v3597_v5 = vpop.f32.mrf.mxu3  ;;  %v3438_v28 = vpop.f32.mrf.mxu2 }
 0x31a   : > { %v8029_v20 = vpop.f32.mrf.mxu0  ;;  %v8031_v12 = vpop.f32.mrf.mxu1 }
 0x31b   : > { %10162 = vst [vmem:[#allocation25_spill] sm:$0xff] %v8031_v12 }
 0x321   : > { %v3599_v63 = vpop.f32.mrf.mxu3 }
 0x322   : > { %v8054_v14 = vpop.f32.mrf.mxu0  ;;  %v3259_v62 = vpop.f32.mrf.mxu1 }
 0x323   : > { %v3260_v56 = vadd.f32 %v3259_v62, %v7880_v32  ;;  %v3440_v32 = vpop.f32.mrf.mxu2 }
 0x325   : > { %v3429_v41 = vadd.f32 %v3428_v42, %v3260_v56  ;;  %5604 = vmatmul.msk.bf16.gmra.mxu0 %vm2340_vm5, %v6441_v0  ;;  %3298 = vmatmul.bf16.gmra.mxu1 %v5754_v55  ;;  %v6338_v42 = vld [vmem:[%s10127_s5 + $0x12c] sm:$0xf0] }
 0x326   : > { %3641 = vmatmul.bf16.gmra.mxu3 %v5778_v26  ;;  %v5770_v24 = vor.u32 %v6338_v42, %v5769_v50  ;;  %3482 = vmatmul.bf16.gmra.mxu2 %v5806_v54  ;;  %v6443_v42 = vld [vmem:[%s10128_s6 + $0x78] sm:$0xff] }
 0x327   : > { %v8058_v22 = vadd.f32 %v3597_v5, %v3429_v41  ;;  %v6442_v5 = vld [vmem:[%s10128_s6 + $0x70] sm:$0xff] }
 0x329   : > { %v3602_v40 = vpop.f32.mrf.mxu3 }
 0x32a   : > { %v8060_v35 = vpop.f32.mrf.mxu0  ;;  %v3261_v29 = vpop.f32.mrf.mxu1 }
 0x32b   : > { %v3262_v53 = vadd.f32 %v3261_v29, %v7887_v11  ;;  %v5793_v11 = vld [vmem:[%s10127_s5 + $0x148] sm:$0xf]  ;;  %v3443_v0 = vpop.f32.mrf.mxu2  ;;  %v5785_v29 = vld [vmem:[%s10127_s5 + $0x140] sm:$0xf] }
 0x32d   : > { %v3431_v19 = vadd.f32 %v3430_v23, %v3262_v53  ;;  %v6343_v23 = vld [vmem:[%s10127_s5 + $0x154] sm:$0xf0]  ;;  %v5819_v53 = vld [vmem:[%s10127_s5 + $0x190] sm:$0xf0] }
 0x32e   : > { %v5794_v8 = vor.u32 %v6343_v23, %v5793_v11 }
 0x32f   : > { %v8075_v17 = vadd.f32 %v3599_v63, %v3431_v19 }
 0x331   : > { %v3604_v39 = vpop.f32.mrf.mxu3 }
 0x332   : > { %v8086_v7 = vpop.f32.mrf.mxu0  ;;  %v3264_v18 = vpop.f32.mrf.mxu1 }
 0x333   : > { %v3265_v9 = vadd.f32 %v3264_v18, %v7914_v36  ;;  %v3445_v36 = vpop.f32.mrf.mxu2 }
 0x335   : > { %v3434_v31 = vadd.f32 %v3433_v2, %v3265_v9  ;;  %5605 = vmatmul.msk.bf16.gmra.mxu0 %vm2340_vm5, %v6442_v5  ;;  %3303 = vmatmul.bf16.gmra.mxu1 %v5770_v24  ;;  %v6342_v2 = vld [vmem:[%s10127_s5 + $0x14c] sm:$0xf0] }
 0x336   : > { %3646 = vmatmul.bf16.gmra.mxu3 %v5794_v8  ;;  %v5786_v4 = vor.u32 %v6342_v2, %v5785_v29  ;;  %v5835_v29 = vld [vmem:[%s10127_s5 + $0x1b0] sm:$0xf0]  ;;  %v6351_v2 = vld [vmem:[%s10127_s5 + $0x194] sm:$0xf0] }
 0x337   : > { %v8090_v55 = vadd.f32 %v3602_v40, %v3434_v31  ;;  %v6348_v40 = vld [vmem:[%s10127_s5 + $0x184] sm:$0xf] }
 0x338   : > { %v5822_v50 = vor.u32 %v6348_v40, %v5819_v53  ;;  %v6444_v53 = vld [vmem:[%s10128_s6 + $0x80] sm:$0xff] }
 0x339   : > { %v3607_v63 = vpop.f32.mrf.mxu3 }
 0x33a   : > { %v8092_v62 = vpop.f32.mrf.mxu0  ;;  %v3266_v26 = vpop.f32.mrf.mxu1  ;;  %3487 = vmatmul.bf16.gmra.mxu2 %v5822_v50 }
 0x33b   : > { %v3267_v56 = vadd.f32 %v3266_v26, %v7923_v46  ;;  %v5809_v46 = vld [vmem:[%s10127_s5 + $0x168] sm:$0xf] }
 0x33d   : > { %v3436_v41 = vadd.f32 %v3435_v13, %v3267_v56  ;;  %v6347_v13 = vld [vmem:[%s10127_s5 + $0x174] sm:$0xf0] }
 0x33e   : > { %v5810_v54 = vor.u32 %v6347_v13, %v5809_v46 }
 0x33f   : > { %v8107_v19 = vadd.f32 %v3604_v39, %v3436_v41  ;;  %v3448_v39 = vpop.f32.mrf.mxu2  ;;  %v5801_v41 = vld [vmem:[%s10127_s5 + $0x160] sm:$0xf] }
 0x341   : > { %v3609_v44 = vpop.f32.mrf.mxu3 }
 0x342   : > { %v8118_v11 = vpop.f32.mrf.mxu0  ;;  %v3269_v23 = vpop.f32.mrf.mxu1 }
 0x343   : > { %v3270_v5 = vadd.f32 %v3269_v23, %v7952_v16 }
 0x345   : > { %v3439_v24 = vadd.f32 %v3438_v28, %v3270_v5  ;;  %5606 = vmatmul.msk.bf16.gmra.mxu0 %vm2340_vm5, %v6443_v42  ;;  %3308 = vmatmul.bf16.gmra.mxu1 %v5786_v4  ;;  %v6346_v28 = vld [vmem:[%s10127_s5 + $0x16c] sm:$0xf0] }
 0x346   : > { %3651 = vmatmul.bf16.gmra.mxu3 %v5810_v54  ;;  %v5802_v46 = vor.u32 %v6346_v28, %v5801_v41  ;;  %v6350_v28 = vld [vmem:[%s10127_s5 + $0x18c] sm:$0xf0] }
 0x347   : > { %v8122_v18 = vadd.f32 %v3607_v63, %v3439_v24  ;;  %v8130_v16 = vpop.f32.mrf.mxu2  ;;  %v6352_v63 = vld [vmem:[%s10127_s5 + $0x1a4] sm:$0xf] }
 0x348   : > { %v5838_v40 = vor.u32 %v6352_v63, %v5835_v29  ;;  %v5851_v63 = vld [vmem:[%s10127_s5 + $0x1d0] sm:$0xf0]  ;;  %v6355_v29 = vld [vmem:[%s10127_s5 + $0x1b4] sm:$0xf0] }
 0x349   : > { %v3612_v8 = vpop.f32.mrf.mxu3 }
 0x34a   : > { %v8124_v9 = vpop.f32.mrf.mxu0  ;;  %v3271_v31 = vpop.f32.mrf.mxu1  ;;  %3492 = vmatmul.bf16.gmra.mxu2 %v5838_v40 }
 0x34b   : > { %v3272_v26 = vadd.f32 %v3271_v31, %v7961_v3 }
 0x34d   : > { %v3441_v56 = vadd.f32 %v3440_v32, %v3272_v26  ;;  %v5825_v32 = vld [vmem:[%s10127_s5 + $0x188] sm:$0xf] }
 0x34e   : > { %v5826_v4 = vor.u32 %v6351_v2, %v5825_v32  ;;  %v6445_v2 = vld [vmem:[%s10128_s6 + $0x88] sm:$0xff] }
 0x34f   : > { %v8141_v3 = vadd.f32 %v3609_v44, %v3441_v56  ;;  %v8156_v54 = vpop.f32.mrf.mxu2 }
 0x351   : > { %v3614_v13 = vpop.f32.mrf.mxu3 }
 0x352   : > { %v8152_v50 = vpop.f32.mrf.mxu0  ;;  %v3274_v42 = vpop.f32.mrf.mxu1 }
 0x353   : > { %v3275_v44 = vadd.f32 %v3274_v42, %v7990_v15  ;;  %v5817_v15 = vld [vmem:[%s10127_s5 + $0x180] sm:$0xf]  ;;  %v1889_v42 = vld [vmem:[#allocation2 + $0x1f8] sm:$0xff] }
 0x354   : > { %v5818_v40 = vor.u32 %v6350_v28, %v5817_v15  ;;  %v1886_v15 = vld [vmem:[#allocation2 + $0x1e0] sm:$0xff]  ;;  %v1887_v28 = vld [vmem:[#allocation2 + $0x1e8] sm:$0xff] }
 0x355   : > { %v3444_v23 = vadd.f32 %v3443_v0, %v3275_v44  ;;  %5607 = vmatmul.msk.bf16.gmra.mxu0 %vm2340_vm5, %v6444_v53  ;;  %3313 = vmatmul.bf16.gmra.mxu1 %v5802_v46  ;;  %v1888_v46 = vld [vmem:[#allocation2 + $0x1f0] sm:$0xff]  ;;  %v1951_v45 = vmul.f32 0.00390625, %v1887_v28  ;;  %v5857_v28 = vld [vmem:[%s10127_s5 + $0x1c8] sm:$0xf] }
 0x356   : > { %3656 = vmatmul.bf16.gmra.mxu3 %v5826_v4 }
 0x357   : > { %v8158_v5 = vadd.f32 %v3612_v8, %v3444_v23  ;;  %v8166_v0 = vpop.f32.mrf.mxu2  ;;  %v6356_v8 = vld [vmem:[%s10127_s5 + $0x1c4] sm:$0xf]  ;;  %v1952_v23 = vmul.f32 0.00390625, %v1888_v46  ;;  %v1885_v46 = vld [vmem:[#allocation2 + $0x1d8] sm:$0xff] }
 0x358   : > { %v5854_v32 = vor.u32 %v6356_v8, %v5851_v63  ;;  %v1950_v63 = vmul.f32 0.00390625, %v1886_v15 }
 0x359   : > { %v3617_v24 = vpop.f32.mrf.mxu3 }
 0x35a   : > { %v8160_v31 = vpop.f32.mrf.mxu0  ;;  %v3276_v26 = vpop.f32.mrf.mxu1  ;;  %3497 = vmatmul.bf16.gmra.mxu2 %v5854_v32  ;;  %v1884_v32 = vld [vmem:[#allocation2 + $0x1d0] sm:$0xff] }
 0x35b   : > { %v3277_v56 = vadd.f32 %v3276_v26, %v7997_v61  ;;  %v1953_v26 = vmul.f32 0.00390625, %v1889_v42 }
 0x35d   : > { %v3446_v41 = vadd.f32 %v3445_v36, %v3277_v56  ;;  %v5841_v36 = vld [vmem:[%s10127_s5 + $0x1a8] sm:$0xf] }
 0x35e   : > { %v5842_v44 = vor.u32 %v6355_v29, %v5841_v36  ;;  %v1984_v36 = vpack.c.bf16 %v1951_v45, %v1950_v63  ;;  %v6354_v45 = vld [vmem:[%s10127_s5 + $0x1ac] sm:$0xf0]  ;;  %v6359_v63 = vld [vmem:[%s10127_s5 + $0x1d4] sm:$0xf0] }
 0x35f   : > { %v8177_v61 = vadd.f32 %v3614_v13, %v3446_v41  ;;  %v1985_v41 = vpack.c.bf16 %v1953_v26, %v1952_v23  ;;  %v8192_v8 = vpop.f32.mrf.mxu2  ;;  %v1882_v23 = vld [vmem:[#allocation2 + $0x1c0] sm:$0xff]  ;;  %v1883_v26 = vld [vmem:[#allocation2 + $0x1c8] sm:$0xff] }
 0x360   : > { %v1947_v15 = vmul.f32 0.00390625, %v1883_v26 }
 0x361   : > { %v3619_v53 = vpop.f32.mrf.mxu3  ;;  %3757 = vmatpush.bf16.msrb.mxu0 %v1985_v41  ;;  %v1946_v41 = vmul.f32 0.00390625, %v1882_v23 }
 0x362   : > { %v8188_v4 = vpop.f32.mrf.mxu0  ;;  %v3279_v13 = vpop.f32.mrf.mxu1 }
 0x363   : > { %v3280_v56 = vadd.f32 %v3279_v13, %v8024_v30  ;;  %v5833_v13 = vld [vmem:[%s10127_s5 + $0x1a0] sm:$0xf] }
 0x365   : > { %v3449_v25 = vadd.f32 %v3448_v39, %v3280_v56  ;;  %5608 = vmatmul.msk.bf16.gmra.mxu0 %vm2340_vm5, %v6445_v2  ;;  %3318 = vmatmul.bf16.gmra.mxu1 %v5818_v40  ;;  %v1948_v2 = vmul.f32 0.00390625, %v1884_v32  ;;  %v1949_v40 = vmul.f32 0.00390625, %v1885_v46  ;;  %v5867_v56 = vld [vmem:[%s10127_s5 + $0x1f0] sm:$0xf0]  ;;  %v1982_v32 = vpack.c.bf16 %v1947_v15, %v1946_v41  ;;  %v1879_v41 = vld [vmem:[#allocation2 + $0x1a8] sm:$0xff] }
 0x366   : > { %3661 = vmatmul.bf16.gmra.mxu3 %v5842_v44  ;;  %3758 = vmatpush.bf16.msrb.mxu0 %v1984_v36  ;;  %v6446_v46 = vld [vmem:[%s10128_s6 + $0x90] sm:$0xff] }
 0x367   : > { %v8194_v43 = vadd.f32 %v3617_v24, %v3449_v25  ;;  %v1983_v44 = vpack.c.bf16 %v1949_v40, %v1948_v2  ;;  %v8206_v24 = vpop.f32.mrf.mxu2  ;;  %v1880_v40 = vld [vmem:[#allocation2 + $0x1b0] sm:$0xff] }
 0x368   : > { %v1944_v23 = vmul.f32 0.00390625, %v1880_v40  ;;  %v1876_v40 = vld [vmem:[#allocation2 + $0x190] sm:$0xff] }
 0x369   : > { %v3622_v29 = vpop.f32.mrf.mxu3 }
 0x36a   : > { %v8196_v30 = vpop.f32.mrf.mxu0  ;;  %v3281_v39 = vpop.f32.mrf.mxu1  ;;  %3759 = vmatpush.bf16.msrb.mxu0 %v1983_v44 }
 0x36b   : > { %v3282_v42 = vadd.f32 %v3281_v39, %v8029_v20  ;;  %v6360_v20 = vld [vmem:[%s10127_s5 + $0x1e4] sm:$0xf]  ;;  %v5834_v39 = vor.u32 %v6354_v45, %v5833_v13 }
 0x36c   : > { %v5870_v36 = vor.u32 %v6360_v20, %v5867_v56  ;;  %v1878_v45 = vld [vmem:[#allocation2 + $0x1a0] sm:$0xff] }
 0x36d   : > { %v3451_v25 = vadd.f32 %v8130_v16, %v3282_v42  ;;  %v1881_v42 = vld [vmem:[#allocation2 + $0x1b8] sm:$0xff]  ;;  %v1942_v15 = vmul.f32 0.00390625, %v1878_v45  ;;  %v6364_v45 = vld [vmem:[%s10127_s5 + $0x204] sm:$0xf] }
 0x36e   : > { %3502 = vmatmul.bf16.gmra.mxu2 %v5870_v36  ;;  %3760 = vmatpush.bf16.msrb.mxu0 %v1982_v32  ;;  %v1945_v26 = vmul.f32 0.00390625, %v1881_v42 }
 0x36f   : > { %v8214_v16 = vadd.f32 %v3619_v53, %v3451_v25  ;;  %v5858_v25 = vor.u32 %v6359_v63, %v5857_v28  ;;  %v8230_v13 = vpop.f32.mrf.mxu2  ;;  %v1943_v28 = vmul.f32 0.00390625, %v1879_v41 }
 0x370   : > { %v1981_v20 = vpack.c.bf16 %v1945_v26, %v1944_v23  ;;  %v6358_v23 = vld [vmem:[%s10127_s5 + $0x1cc] sm:$0xf0] }
 0x371   : > { %v3624_v2 = vpop.f32.mrf.mxu3  ;;  %v1980_v36 = vpack.c.bf16 %v1943_v28, %v1942_v15 }
 0x372   : > { %v8225_v53 = vpop.f32.mrf.mxu0  ;;  %v3284_v44 = vpop.f32.mrf.mxu1  ;;  %3761 = vmatpush.bf16.msrb.mxu0 %v1981_v20  ;;  %v1874_v20 = vld [vmem:[#allocation2 + $0x180] sm:$0xff] }
 0x373   : > { %v3285_v1 = vadd.f32 %v3284_v44, %v8054_v14  ;;  %v1877_v14 = vld [vmem:[#allocation2 + $0x198] sm:$0xff]  ;;  %v5849_v44 = vld [vmem:[%s10127_s5 + $0x1c0] sm:$0xf]  ;;  %v1938_v41 = vmul.f32 0.00390625, %v1874_v20 }
 0x375   : > { %v3454_v56 = vadd.f32 %v8156_v54, %v3285_v1  ;;  %5609 = vmatmul.msk.bf16.gmra.mxu0 %vm2340_vm5, %v6446_v46  ;;  %3323 = vmatmul.bf16.gmra.mxu1 %v5834_v39  ;;  %v1940_v54 = vmul.f32 0.00390625, %v1876_v40  ;;  %v1941_v46 = vmul.f32 0.00390625, %v1877_v14 }
 0x376   : > { %3666 = vmatmul.bf16.gmra.mxu3 %v5858_v25  ;;  %3762 = vmatpush.bf16.msrb.mxu0 %v1980_v36  ;;  %v6363_v36 = vld [vmem:[%s10127_s5 + $0x1f4] sm:$0xf0] }
 0x377   : > { %v8232_v63 = vadd.f32 %v3622_v29, %v3454_v56  ;;  %v1979_v25 = vpack.c.bf16 %v1941_v46, %v1940_v54  ;;  %v3465_v26 = vpop.f32.mrf.mxu2  ;;  %v1875_v56 = vld [vmem:[#allocation2 + $0x188] sm:$0xff]  ;;  %v5850_v54 = vor.u32 %v6358_v23, %v5849_v44 }
 0x378   : > { %v1939_v15 = vmul.f32 0.00390625, %v1875_v56 }
 0x379   : > { %v3627_v32 = vpop.f32.mrf.mxu3 }
 0x37a   : > { %v8234_v42 = vpop.f32.mrf.mxu0  ;;  %v3286_v1 = vpop.f32.mrf.mxu1  ;;  %3763 = vmatpush.bf16.msrb.mxu0 %v1979_v25  ;;  %v1978_v14 = vpack.c.bf16 %v1939_v15, %v1938_v41 }
 0x37b   : > { %v3287_v39 = vadd.f32 %v3286_v1, %v8060_v35  ;;  %v5883_v35 = vld [vmem:[%s10127_s5 + $0x210] sm:$0xf0]  ;;  %v6447_v1 = vld [vmem:[%s10128_s6 + $0x98] sm:$0xff] }
 0x37c   : > { %v5886_v40 = vor.u32 %v6364_v45, %v5883_v35 }
 0x37d   : > { %v3456_v29 = vadd.f32 %v8166_v0, %v3287_v39  ;;  %v5873_v0 = vld [vmem:[%s10127_s5 + $0x1e8] sm:$0xf] }
 0x37e   : > { %v5874_v25 = vor.u32 %v6363_v36, %v5873_v0  ;;  %3507 = vmatmul.bf16.gmra.mxu2 %v5886_v40  ;;  %3764 = vmatpush.bf16.msrb.mxu0 %v1978_v14  ;;  %v6362_v0 = vld [vmem:[%s10127_s5 + $0x1ec] sm:$0xf0]  ;;  %v5899_v36 = vld [vmem:[%s10127_s5 + $0x230] sm:$0xf0]  ;;  %v6367_v40 = vld [vmem:[%s10127_s5 + $0x214] sm:$0xf0] }
 0x37f   : > { %v8250_v28 = vadd.f32 %v3624_v2, %v3456_v29  ;;  %v3468_v56 = vpop.f32.mrf.mxu2 }
 0x381   : > { %v3629_v46 = vpop.f32.mrf.mxu3 }
 0x382   : > { %v8261_v39 = vpop.f32.mrf.mxu0  ;;  %v3289_v2 = vpop.f32.mrf.mxu1 }
 0x383   : > { %v3290_v29 = vadd.f32 %v3289_v2, %v8086_v7  ;;  %v5865_v7 = vld [vmem:[%s10127_s5 + $0x1e0] sm:$0xf] }
 0x385   : > { %v3459_v20 = vadd.f32 %v8192_v8, %v3290_v29  ;;  %5610 = vmatmul.msk.bf16.gmra.mxu0 %vm2340_vm5, %v6447_v1  ;;  %3328 = vmatmul.bf16.gmra.mxu1 %v5850_v54  ;;  %v6448_v1 = vld [vmem:[%s10128_s6 + $0xa0] sm:$0xff]  ;;  %v5866_v54 = vor.u32 %v6362_v0, %v5865_v7 }
 0x386   : > { %3671 = vmatmul.bf16.gmra.mxu3 %v5874_v25 }
 0x387   : > { %v8266_v45 = vadd.f32 %v3627_v32, %v3459_v20  ;;  %v3470_v8 = vpop.f32.mrf.mxu2  ;;  %v6368_v32 = vld [vmem:[%s10127_s5 + $0x224] sm:$0xf] }
 0x388   : > { %v5902_v14 = vor.u32 %v6368_v32, %v5899_v36 }
 0x389   : > { %v3632_v35 = vpop.f32.mrf.mxu3 }
 0x38a   : > { %v8268_v44 = vpop.f32.mrf.mxu0  ;;  %v3291_v23 = vpop.f32.mrf.mxu1 }
 0x38b   : > { %v3292_v41 = vadd.f32 %v3291_v23, %v8092_v62 }
 0x38d   : > { %v3461_v15 = vadd.f32 %v8206_v24, %v3292_v41  ;;  %v5889_v24 = vld [vmem:[%s10127_s5 + $0x208] sm:$0xf] }
 0x38e   : > { %3512 = vmatmul.bf16.gmra.mxu2 %v5902_v14 }
 0x38f   : > { %v8284_v62 = vadd.f32 %v3629_v46, %v3461_v15  ;;  %v5890_v46 = vor.u32 %v6367_v40, %v5889_v24  ;;  %v3473_v41 = vpop.f32.mrf.mxu2  ;;  %v5635_v40 = vld [vmem:[%s10127_s5 + $0x18] sm:$0xf0] }
 0x391   : > { %v3634_v2 = vpop.f32.mrf.mxu3 }
 0x392   : > { %v8295_v25 = vpop.f32.mrf.mxu0  ;;  %v3294_v29 = vpop.f32.mrf.mxu1 }
 0x393   : > { %v3295_v20 = vadd.f32 %v3294_v29, %v8118_v11  ;;  %v5881_v11 = vld [vmem:[%s10127_s5 + $0x200] sm:$0xf] }
 0x395   : > { %v3464_v23 = vadd.f32 %v8230_v13, %v3295_v20  ;;  %5611 = vmatmul.msk.bf16.gmra.mxu0 %vm2340_vm5, %v6448_v1  ;;  %3333 = vmatmul.bf16.gmra.mxu1 %v5866_v54  ;;  %v6366_v13 = vld [vmem:[%s10127_s5 + $0x20c] sm:$0xf0]  ;;  %v5905_v1 = vld [vmem:[%s10127_s5 + $0x228] sm:$0xf]  ;;  %v6371_v54 = vld [vmem:[%s10127_s5 + $0x234] sm:$0xf0] }
 0x396   : > { %3676 = vmatmul.bf16.gmra.mxu3 %v5890_v46  ;;  %v5882_v46 = vor.u32 %v6366_v13, %v5881_v11  ;;  %v5906_v27 = vor.u32 %v6371_v54, %v5905_v1  ;;  %v6375_v1 = vld [vmem:[%s10127_s5 + $0x254] sm:$0xf0] }
 0x397   : > { %v8300_v15 = vadd.f32 %v3632_v35, %v3464_v23  ;;  %v6301_v35 = vld [vmem:[%s10127_s5 + $0xc] sm:$0xf]  ;;  %v3475_v24 = vpop.f32.mrf.mxu2 }
 0x398   : > { %v5638_v20 = vor.u32 %v6301_v35, %v5635_v40  ;;  %v5897_v40 = vld [vmem:[%s10127_s5 + $0x220] sm:$0xf] }
 0x399   : > { %v3637_v32 = vpop.f32.mrf.mxu3 }
 0x39a   : > { %v8302_v36 = vpop.f32.mrf.mxu0  ;;  %v3296_v7 = vpop.f32.mrf.mxu1 }
 0x39b   : > { %v3297_v0 = vadd.f32 %v3296_v7, %v8124_v9  ;;  %v6372_v9 = vld [vmem:[%s10127_s5 + $0x244] sm:$0xf] }
 0x39d   : > { %v3466_v10 = vadd.f32 %v3465_v26, %v3297_v0  ;;  %v5915_v26 = vld [vmem:[%s10127_s5 + $0x250] sm:$0xf0] }
 0x39e   : > { %v5918_v29 = vor.u32 %v6372_v9, %v5915_v26  ;;  %v5921_v26 = vld [vmem:[%s10127_s5 + $0x248] sm:$0xf] }
 0x39f   : > { %v8323_v14 = vadd.f32 %v3634_v2, %v3466_v10  ;;  %v3478_v60 = vpop.f32.mrf.mxu2 }
 0x3a0   : > { %3517 = vmatmul.bf16.gmra.mxu2 %v5918_v29 }
 0x3a1   : > { %v3639_v23 = vpop.f32.mrf.mxu3 }
 0x3a2   : > { %v8331_v7 = vpop.f32.mrf.mxu0  ;;  %v3299_v0 = vpop.f32.mrf.mxu1 }
 0x3a3   : > { %v3300_v10 = vadd.f32 %v3299_v0, %v8152_v50  ;;  %v6370_v50 = vld [vmem:[%s10127_s5 + $0x22c] sm:$0xf0] }
 0x3a4   : > { %v5898_v29 = vor.u32 %v6370_v50, %v5897_v40 }
 0x3a5   : > { %v3469_v2 = vadd.f32 %v3468_v56, %v3300_v10  ;;  %3338 = vmatmul.bf16.gmra.mxu1 %v5882_v46  ;;  %3765 = vmatmul.bf16.vlgmr.msrb.gmra.mxu0 %v5638_v20 }
 0x3a6   : > { %3681 = vmatmul.bf16.gmra.mxu3 %v5906_v27  ;;  %v6305_v27 = vld [vmem:[%s10127_s5 + $0x2c] sm:$0xf] }
 0x3a7   : > { %v8334_v34 = vadd.f32 %v3637_v32, %v3469_v2  ;;  %v3480_v56 = vpop.f32.mrf.mxu2  ;;  %v5651_v32 = vld [vmem:[%s10127_s5 + $0x38] sm:$0xf0]  ;;  %v5922_v2 = vor.u32 %v6375_v1, %v5921_v26  ;;  %v5937_v26 = vld [vmem:[%s10127_s5 + $0x268] sm:$0xf]  ;;  %v6379_v1 = vld [vmem:[%s10127_s5 + $0x274] sm:$0xf0] }
 0x3a8   : > { %v5654_v46 = vor.u32 %v6305_v27, %v5651_v32  ;;  %v5913_v32 = vld [vmem:[%s10127_s5 + $0x240] sm:$0xf] }
 0x3a9   : > { %v3642_v33 = vpop.f32.mrf.mxu3 }
 0x3aa   : > { %v8336_v48 = vpop.f32.mrf.mxu0  ;;  %v3301_v11 = vpop.f32.mrf.mxu1 }
 0x3ab   : > { %v3302_v13 = vadd.f32 %v3301_v11, %v8160_v31  ;;  %v6376_v31 = vld [vmem:[%s10127_s5 + $0x264] sm:$0xf] }
 0x3ad   : > { %v3471_v35 = vadd.f32 %v3470_v8, %v3302_v13  ;;  %v5931_v8 = vld [vmem:[%s10127_s5 + $0x270] sm:$0xf0] }
 0x3ae   : > { %v5934_v54 = vor.u32 %v6376_v31, %v5931_v8  ;;  %v5667_v31 = vld [vmem:[%s10127_s5 + $0x58] sm:$0xf0] }
 0x3af   : > { %v8357_v9 = vadd.f32 %v3639_v23, %v3471_v35  ;;  %v3483_v13 = vpop.f32.mrf.mxu2 }
 0x3b0   : > { %3522 = vmatmul.bf16.gmra.mxu2 %v5934_v54 }
 0x3b1   : > { %v3644_v20 = vpop.f32.mrf.mxu3 }
 0x3b2   : > { %v8365_v0 = vpop.f32.mrf.mxu0  ;;  %v3304_v10 = vpop.f32.mrf.mxu1 }
 0x3b3   : > { %v3305_v23 = vadd.f32 %v3304_v10, %v8188_v4  ;;  %v6374_v4 = vld [vmem:[%s10127_s5 + $0x24c] sm:$0xf0] }
 0x3b5   : > { %v3474_v11 = vadd.f32 %v3473_v41, %v3305_v23  ;;  %3343 = vmatmul.bf16.gmra.mxu1 %v5898_v29  ;;  %3770 = vmatmul.bf16.gmra.mxu0 %v5654_v46  ;;  %v5914_v29 = vor.u32 %v6374_v4, %v5913_v32 }
 0x3b6   : > { %3686 = vmatmul.bf16.gmra.mxu3 %v5922_v2 }
 0x3b7   : > { %v8368_v35 = vadd.f32 %v3642_v33, %v3474_v11  ;;  %v6309_v33 = vld [vmem:[%s10127_s5 + $0x4c] sm:$0xf]  ;;  %v3485_v41 = vpop.f32.mrf.mxu2  ;;  %v5938_v11 = vor.u32 %v6379_v1, %v5937_v26  ;;  %v5953_v26 = vld [vmem:[%s10127_s5 + $0x288] sm:$0xf]  ;;  %v6383_v1 = vld [vmem:[%s10127_s5 + $0x294] sm:$0xf0] }
 0x3b8   : > { %v5670_v46 = vor.u32 %v6309_v33, %v5667_v31  ;;  %v5929_v31 = vld [vmem:[%s10127_s5 + $0x260] sm:$0xf] }
 0x3b9   : > { %v3647_v12 = vpop.f32.mrf.mxu3 }
 0x3ba   : > { %v8370_v49 = vpop.f32.mrf.mxu0  ;;  %v3306_v40 = vpop.f32.mrf.mxu1 }
 0x3bb   : > { %v3307_v50 = vadd.f32 %v3306_v40, %v8196_v30  ;;  %v6380_v30 = vld [vmem:[%s10127_s5 + $0x284] sm:$0xf] }
 0x3bd   : > { %v3476_v27 = vadd.f32 %v3475_v24, %v3307_v50  ;;  %v5947_v24 = vld [vmem:[%s10127_s5 + $0x290] sm:$0xf0] }
 0x3be   : > { %v5950_v54 = vor.u32 %v6380_v30, %v5947_v24  ;;  %v5683_v30 = vld [vmem:[%s10127_s5 + $0x78] sm:$0xf0] }
 0x3bf   : > { %v8391_v8 = vadd.f32 %v3644_v20, %v3476_v27  ;;  %v3488_v50 = vpop.f32.mrf.mxu2 }
 0x3c0   : > { %3527 = vmatmul.bf16.gmra.mxu2 %v5950_v54 }
 0x3c1   : > { %v3649_v10 = vpop.f32.mrf.mxu3 }
 0x3c2   : > { %v8399_v2 = vpop.f32.mrf.mxu0  ;;  %v3309_v23 = vpop.f32.mrf.mxu1 }
 0x3c3   : > { %v3310_v20 = vadd.f32 %v3309_v23, %v8225_v53 }
 0x3c5   : > { %v3479_v40 = vadd.f32 %v3478_v60, %v3310_v20  ;;  %3348 = vmatmul.bf16.gmra.mxu1 %v5914_v29  ;;  %3775 = vmatmul.bf16.gmra.mxu0 %v5670_v46  ;;  %v6378_v60 = vld [vmem:[%s10127_s5 + $0x26c] sm:$0xf0] }
 0x3c6   : > { %3691 = vmatmul.bf16.gmra.mxu3 %v5938_v11  ;;  %v5930_v29 = vor.u32 %v6378_v60, %v5929_v31 }
 0x3c7   : > { %v8402_v27 = vadd.f32 %v3647_v12, %v3479_v40  ;;  %v6313_v12 = vld [vmem:[%s10127_s5 + $0x6c] sm:$0xf]  ;;  %v3490_v53 = vpop.f32.mrf.mxu2  ;;  %v5954_v40 = vor.u32 %v6383_v1, %v5953_v26  ;;  %v5969_v26 = vld [vmem:[%s10127_s5 + $0x2a8] sm:$0xf]  ;;  %v6387_v1 = vld [vmem:[%s10127_s5 + $0x2b4] sm:$0xf0] }
 0x3c8   : > { %v5686_v46 = vor.u32 %v6313_v12, %v5683_v30  ;;  %v5945_v30 = vld [vmem:[%s10127_s5 + $0x280] sm:$0xf] }
 0x3c9   : > { %v3652_v6 = vpop.f32.mrf.mxu3 }
 0x3ca   : > { %v8404_v51 = vpop.f32.mrf.mxu0  ;;  %v3311_v32 = vpop.f32.mrf.mxu1 }
 0x3cb   : > { %v3312_v4 = vadd.f32 %v3311_v32, %v8234_v42  ;;  %v6384_v42 = vld [vmem:[%s10127_s5 + $0x2a4] sm:$0xf] }
 0x3cd   : > { %v3481_v33 = vadd.f32 %v3480_v56, %v3312_v4  ;;  %v5963_v56 = vld [vmem:[%s10127_s5 + $0x2b0] sm:$0xf0] }
 0x3ce   : > { %v5966_v54 = vor.u32 %v6384_v42, %v5963_v56  ;;  %v5699_v42 = vld [vmem:[%s10127_s5 + $0x98] sm:$0xf0] }
 0x3cf   : > { %v8425_v24 = vadd.f32 %v3649_v10, %v3481_v33  ;;  %v3493_v4 = vpop.f32.mrf.mxu2 }
 0x3d0   : > { %3532 = vmatmul.bf16.gmra.mxu2 %v5966_v54 }
 0x3d1   : > { %v3654_v23 = vpop.f32.mrf.mxu3 }
 0x3d2   : > { %v8433_v11 = vpop.f32.mrf.mxu0  ;;  %v3314_v20 = vpop.f32.mrf.mxu1 }
 0x3d3   : > { %v3315_v10 = vadd.f32 %v3314_v20, %v8261_v39  ;;  %v6382_v39 = vld [vmem:[%s10127_s5 + $0x28c] sm:$0xf0] }
 0x3d5   : > { %v3484_v32 = vadd.f32 %v3483_v13, %v3315_v10  ;;  %3353 = vmatmul.bf16.gmra.mxu1 %v5930_v29  ;;  %3780 = vmatmul.bf16.gmra.mxu0 %v5686_v46  ;;  %v5946_v29 = vor.u32 %v6382_v39, %v5945_v30 }
 0x3d6   : > { %3696 = vmatmul.bf16.gmra.mxu3 %v5954_v40 }
 0x3d7   : > { %v8436_v33 = vadd.f32 %v3652_v6, %v3484_v32  ;;  %v6317_v6 = vld [vmem:[%s10127_s5 + $0x8c] sm:$0xf]  ;;  %v3495_v13 = vpop.f32.mrf.mxu2  ;;  %v5970_v32 = vor.u32 %v6387_v1, %v5969_v26  ;;  %v5985_v26 = vld [vmem:[%s10127_s5 + $0x2c8] sm:$0xf]  ;;  %v6391_v1 = vld [vmem:[%s10127_s5 + $0x2d4] sm:$0xf0] }
 0x3d8   : > { %v5702_v46 = vor.u32 %v6317_v6, %v5699_v42  ;;  %v5961_v42 = vld [vmem:[%s10127_s5 + $0x2a0] sm:$0xf] }
 0x3d9   : > { %v3657_v21 = vpop.f32.mrf.mxu3 }
 0x3da   : > { %v8438_v58 = vpop.f32.mrf.mxu0  ;;  %v3316_v31 = vpop.f32.mrf.mxu1 }
 0x3db   : > { %v3317_v60 = vadd.f32 %v3316_v31, %v8268_v44  ;;  %v6388_v44 = vld [vmem:[%s10127_s5 + $0x2c4] sm:$0xf] }
 0x3dd   : > { %v3486_v12 = vadd.f32 %v3485_v41, %v3317_v60  ;;  %v5979_v41 = vld [vmem:[%s10127_s5 + $0x2d0] sm:$0xf0] }
 0x3de   : > { %v5982_v54 = vor.u32 %v6388_v44, %v5979_v41  ;;  %v5715_v44 = vld [vmem:[%s10127_s5 + $0xb8] sm:$0xf0] }
 0x3df   : > { %v8459_v56 = vadd.f32 %v3654_v23, %v3486_v12  ;;  %v3498_v60 = vpop.f32.mrf.mxu2 }
 0x3e0   : > { %3537 = vmatmul.bf16.gmra.mxu2 %v5982_v54 }
 0x3e1   : > { %v3659_v20 = vpop.f32.mrf.mxu3 }
 0x3e2   : > { %v8467_v40 = vpop.f32.mrf.mxu0  ;;  %v3319_v10 = vpop.f32.mrf.mxu1 }
 0x3e3   : > { %v3320_v23 = vadd.f32 %v3319_v10, %v8295_v25  ;;  %v6386_v25 = vld [vmem:[%s10127_s5 + $0x2ac] sm:$0xf0] }
 0x3e5   : > { %v3489_v31 = vadd.f32 %v3488_v50, %v3320_v23  ;;  %3358 = vmatmul.bf16.gmra.mxu1 %v5946_v29  ;;  %3785 = vmatmul.bf16.gmra.mxu0 %v5702_v46  ;;  %v5962_v29 = vor.u32 %v6386_v25, %v5961_v42 }
 0x3e6   : > { %3701 = vmatmul.bf16.gmra.mxu3 %v5970_v32 }
 0x3e7   : > { %v8470_v12 = vadd.f32 %v3657_v21, %v3489_v31  ;;  %v6321_v21 = vld [vmem:[%s10127_s5 + $0xac] sm:$0xf]  ;;  %v3500_v50 = vpop.f32.mrf.mxu2  ;;  %v5986_v31 = vor.u32 %v6391_v1, %v5985_v26  ;;  %v6001_v26 = vld [vmem:[%s10127_s5 + $0x2e8] sm:$0xf]  ;;  %v6395_v1 = vld [vmem:[%s10127_s5 + $0x2f4] sm:$0xf0] }
 0x3e8   : > { %v5718_v46 = vor.u32 %v6321_v21, %v5715_v44  ;;  %v5977_v44 = vld [vmem:[%s10127_s5 + $0x2c0] sm:$0xf] }
 0x3e9   : > { %10163 = vst [vmem:[#allocation26_spill] sm:$0xff] %v8470_v12  ;;  %v3662_v38 = vpop.f32.mrf.mxu3 }
 0x3ea   : > { %v8472_v37 = vpop.f32.mrf.mxu0  ;;  %v3321_v30 = vpop.f32.mrf.mxu1 }
 0x3eb   : > { %v3322_v39 = vadd.f32 %v3321_v30, %v8302_v36  ;;  %v6392_v36 = vld [vmem:[%s10127_s5 + $0x2e4] sm:$0xf] }
 0x3ed   : > { %v3491_v6 = vadd.f32 %v3490_v53, %v3322_v39  ;;  %v5995_v53 = vld [vmem:[%s10127_s5 + $0x2f0] sm:$0xf0] }
 0x3ee   : > { %v5998_v54 = vor.u32 %v6392_v36, %v5995_v53  ;;  %v5731_v36 = vld [vmem:[%s10127_s5 + $0xd8] sm:$0xf0] }
 0x3ef   : > { %v8493_v41 = vadd.f32 %v3659_v20, %v3491_v6 }
 0x3f0   : > { %3542 = vmatmul.bf16.gmra.mxu2 %v5998_v54 }
 0x3f1   : > { %10164 = vst [vmem:[#allocation27_spill] sm:$0xff] %v8493_v41  ;;  %v3664_v10 = vpop.f32.mrf.mxu3  ;;  %v3503_v39 = vpop.f32.mrf.mxu2 }
 0x3f2   : > { %v8501_v32 = vpop.f32.mrf.mxu0  ;;  %v3324_v23 = vpop.f32.mrf.mxu1 }
 0x3f3   : > { %v3325_v20 = vadd.f32 %v3324_v23, %v8331_v7  ;;  %v6390_v7 = vld [vmem:[%s10127_s5 + $0x2cc] sm:$0xf0] }
 0x3f5   : > { %v3494_v30 = vadd.f32 %v3493_v4, %v3325_v20  ;;  %3363 = vmatmul.bf16.gmra.mxu1 %v5962_v29  ;;  %3790 = vmatmul.bf16.gmra.mxu0 %v5718_v46  ;;  %v5978_v29 = vor.u32 %v6390_v7, %v5977_v44 }
 0x3f6   : > { %3706 = vmatmul.bf16.gmra.mxu3 %v5986_v31 }
 0x3f7   : > { %v8504_v6 = vadd.f32 %v3662_v38, %v3494_v30  ;;  %v6325_v38 = vld [vmem:[%s10127_s5 + $0xcc] sm:$0xf]  ;;  %v6002_v30 = vor.u32 %v6395_v1, %v6001_v26  ;;  %v6017_v26 = vld [vmem:[%s10127_s5 + $0x308] sm:$0xf]  ;;  %v6399_v1 = vld [vmem:[%s10127_s5 + $0x314] sm:$0xf0] }
 0x3f8   : > { %v5734_v46 = vor.u32 %v6325_v38, %v5731_v36  ;;  %v5993_v36 = vld [vmem:[%s10127_s5 + $0x2e0] sm:$0xf] }
 0x3f9   : > { %10165 = vst [vmem:[#allocation28_spill] sm:$0xff] %v8504_v6  ;;  %v3667_v41 = vpop.f32.mrf.mxu3  ;;  %v3505_v4 = vpop.f32.mrf.mxu2 }
 0x3fa   : > { %v8506_v12 = vpop.f32.mrf.mxu0  ;;  %v3326_v42 = vpop.f32.mrf.mxu1 }
 0x3fb   : > { %v3327_v25 = vadd.f32 %v3326_v42, %v8336_v48  ;;  %v6396_v48 = vld [vmem:[%s10127_s5 + $0x304] sm:$0xf] }
 0x3fd   : > { %v3496_v21 = vadd.f32 %v3495_v13, %v3327_v25  ;;  %v6011_v13 = vld [vmem:[%s10127_s5 + $0x310] sm:$0xf0] }
 0x3fe   : > { %v6014_v54 = vor.u32 %v6396_v48, %v6011_v13  ;;  %v5747_v48 = vld [vmem:[%s10127_s5 + $0xf8] sm:$0xf0] }
 0x3ff   : > { %v8527_v53 = vadd.f32 %v3664_v10, %v3496_v21 }
 0x400   : > { %3547 = vmatmul.bf16.gmra.mxu2 %v6014_v54 }
 0x401   : > { %10166 = vst [vmem:[#allocation29_spill] sm:$0xff] %v8527_v53  ;;  %v3669_v23 = vpop.f32.mrf.mxu3  ;;  %v3508_v25 = vpop.f32.mrf.mxu2 }
 0x402   : > { %v8535_v31 = vpop.f32.mrf.mxu0  ;;  %v3329_v20 = vpop.f32.mrf.mxu1 }
 0x403   : > { %v3330_v10 = vadd.f32 %v3329_v20, %v8365_v0  ;;  %v6394_v0 = vld [vmem:[%s10127_s5 + $0x2ec] sm:$0xf0] }
 0x405   : > { %v3499_v42 = vadd.f32 %v3498_v60, %v3330_v10  ;;  %3368 = vmatmul.bf16.gmra.mxu1 %v5978_v29  ;;  %3795 = vmatmul.bf16.gmra.mxu0 %v5734_v46  ;;  %v6329_v60 = vld [vmem:[%s10127_s5 + $0xec] sm:$0xf]  ;;  %v5994_v29 = vor.u32 %v6394_v0, %v5993_v36 }
 0x406   : > { %3711 = vmatmul.bf16.gmra.mxu3 %v6002_v30  ;;  %v5750_v46 = vor.u32 %v6329_v60, %v5747_v48  ;;  %v6009_v48 = vld [vmem:[%s10127_s5 + $0x300] sm:$0xf] }
 0x407   : > { %v8538_v21 = vadd.f32 %v3667_v41, %v3499_v42  ;;  %v6018_v42 = vor.u32 %v6399_v1, %v6017_v26  ;;  %v6033_v1 = vld [vmem:[%s10127_s5 + $0x328] sm:$0xf] }
 0x409   : > { %v3672_v53 = vpop.f32.mrf.mxu3  ;;  %v3510_v41 = vpop.f32.mrf.mxu2 }
 0x40a   : > { %v8540_v6 = vpop.f32.mrf.mxu0  ;;  %v3331_v44 = vpop.f32.mrf.mxu1 }
 0x40b   : > { %v3332_v7 = vadd.f32 %v3331_v44, %v8370_v49  ;;  %v6400_v49 = vld [vmem:[%s10127_s5 + $0x324] sm:$0xf] }
 0x40d   : > { %v3501_v38 = vadd.f32 %v3500_v50, %v3332_v7  ;;  %v6027_v50 = vld [vmem:[%s10127_s5 + $0x330] sm:$0xf0] }
 0x40e   : > { %v6030_v54 = vor.u32 %v6400_v49, %v6027_v50  ;;  %v5763_v50 = vld [vmem:[%s10127_s5 + $0x118] sm:$0xf0] }
 0x40f   : > { %v8561_v13 = vadd.f32 %v3669_v23, %v3501_v38 }
 0x410   : > { %3552 = vmatmul.bf16.gmra.mxu2 %v6030_v54  ;;  %v6403_v54 = vld [vmem:[%s10127_s5 + $0x334] sm:$0xf0] }
 0x411   : > { %10167 = vst [vmem:[#allocation30_spill] sm:$0xff] %v8561_v13  ;;  %v3674_v20 = vpop.f32.mrf.mxu3  ;;  %v8572_v7 = vpop.f32.mrf.mxu2 }
 0x412   : > { %v8569_v30 = vpop.f32.mrf.mxu0  ;;  %v3334_v10 = vpop.f32.mrf.mxu1 }
 0x413   : > { %v3335_v23 = vadd.f32 %v3334_v10, %v8399_v2  ;;  %v6398_v2 = vld [vmem:[%s10127_s5 + $0x30c] sm:$0xf0] }
 0x415   : > { %v3504_v44 = vadd.f32 %v3503_v39, %v3335_v23  ;;  %3373 = vmatmul.bf16.gmra.mxu1 %v5994_v29  ;;  %3800 = vmatmul.bf16.gmra.mxu0 %v5750_v46  ;;  %v6333_v39 = vld [vmem:[%s10127_s5 + $0x10c] sm:$0xf]  ;;  %v6010_v46 = vor.u32 %v6398_v2, %v6009_v48  ;;  %v3926_v48 = vld [vmem:[%s10129_s7] sm:$0xff] }
 0x416   : > { %3716 = vmatmul.bf16.gmra.mxu3 %v6018_v42  ;;  %v5766_v10 = vor.u32 %v6333_v39, %v5763_v50 }
 0x417   : > { %v8574_v38 = vadd.f32 %v3672_v53, %v3504_v44 }
 0x419   : > { %v3677_v13 = vpop.f32.mrf.mxu3  ;;  %v8588_v53 = vpop.f32.mrf.mxu2 }
 0x41a   : > { %v8576_v49 = vpop.f32.mrf.mxu0  ;;  %v3336_v36 = vpop.f32.mrf.mxu1 }
 0x41b   : > { %10168 = vst [vmem:[#allocation31_spill] sm:$0xff] %v8576_v49  ;;  %v3337_v0 = vadd.f32 %v3336_v36, %v8404_v51  ;;  %v6404_v51 = vld [vmem:[%s10127_s5 + $0x344] sm:$0xf]  ;;  %v6034_v36 = vor.u32 %v6403_v54, %v6033_v1  ;;  %v6402_v54 = vld [vmem:[%s10127_s5 + $0x32c] sm:$0xf0] }
 0x41d   : > { %v3506_v60 = vadd.f32 %v3505_v4, %v3337_v0  ;;  %v6043_v4 = vld [vmem:[%s10127_s5 + $0x350] sm:$0xf0] }
 0x41e   : > { %v6046_v29 = vor.u32 %v6404_v51, %v6043_v4 }
 0x41f   : > { %v8599_v26 = vadd.f32 %v3674_v20, %v3506_v60 }
 0x420   : > { %3557 = vmatmul.bf16.gmra.mxu2 %v6046_v29  ;;  %v6337_v29 = vld [vmem:[%s10127_s5 + $0x12c] sm:$0xf] }
 0x421   : > { %10169 = vst [vmem:[#allocation32_spill] sm:$0xff] %v8599_v26  ;;  %v3679_v42 = vpop.f32.mrf.mxu3 }
 0x422   : > { %v3339_v23 = vpop.f32.mrf.mxu1  ;;  %v3766_v44 = vpop.f32.mrf.mxu0 }
 0x423   : > { %v3340_v0 = vadd.f32 %v3339_v23, %v8433_v11  ;;  %v3767_v20 = vadd.f32 %v3766_v44, %v8058_v22  ;;  %v8609_v49 = vpop.f32.mrf.mxu2  ;;  %v3927_v11 = vld [vmem:[%s10129_s7 + $0x8] sm:$0xff] }
 0x425   : > { %v3509_v60 = vadd.f32 %v3508_v25, %v3340_v0  ;;  %3378 = vmatmul.bf16.gmra.mxu1 %v6010_v46  ;;  %3805 = vmatmul.bf16.gmra.mxu0 %v5766_v10  ;;  %v3990_v22 = vadd.f32 %v3926_v48, %v3767_v20  ;;  %v6407_v0 = vld [vmem:[%s10127_s5 + $0x354] sm:$0xf0] }
 0x426   : > { %3721 = vmatmul.bf16.gmra.mxu3 %v6034_v36  ;;  %v6049_v36 = vld [vmem:[%s10127_s5 + $0x348] sm:$0xf] }
 0x427   : > { %v8611_v26 = vadd.f32 %v3677_v13, %v3509_v60  ;;  %v6025_v13 = vld [vmem:[%s10127_s5 + $0x320] sm:$0xf]  ;;  %v4054_v10 = vmax.f32 %v3990_v22, 0.0  ;;  %v6050_v22 = vor.u32 %v6407_v0, %v6049_v36  ;;  %v6406_v36 = vld [vmem:[%s10127_s5 + $0x34c] sm:$0xf0] }
 0x428   : > { %v6026_v60 = vor.u32 %v6402_v54, %v6025_v13  ;;  %v3928_v54 = vld [vmem:[%s10129_s7 + $0x10] sm:$0xff]  ;;  %v6341_v0 = vld [vmem:[%s10127_s5 + $0x14c] sm:$0xf] }
 0x429   : > { %v3682_v2 = vpop.f32.mrf.mxu3 }
 0x42a   : > { %v3341_v39 = vpop.f32.mrf.mxu1  ;;  %v3768_v50 = vpop.f32.mrf.mxu0 }
 0x42b   : > { %v3342_v25 = vadd.f32 %v3341_v39, %v8438_v58  ;;  %v3769_v51 = vadd.f32 %v3768_v50, %v8075_v17  ;;  %v8630_v46 = vpop.f32.mrf.mxu2  ;;  %v5779_v58 = vld [vmem:[%s10127_s5 + $0x138] sm:$0xf0]  ;;  %v6408_v17 = vld [vmem:[%s10127_s5 + $0x364] sm:$0xf] }
 0x42c   : > { %v5782_v48 = vor.u32 %v6337_v29, %v5779_v58 }
 0x42d   : > { %v3991_v4 = vadd.f32 %v3927_v11, %v3769_v51  ;;  %v3511_v1 = vadd.f32 %v3510_v41, %v3342_v25  ;;  %v6059_v41 = vld [vmem:[%s10127_s5 + $0x370] sm:$0xf0] }
 0x42e   : > { %v6062_v20 = vor.u32 %v6408_v17, %v6059_v41 }
 0x42f   : > { %v4055_v23 = vmax.f32 %v3991_v4, 0.0  ;;  %v8641_v44 = vadd.f32 %v3679_v42, %v3511_v1 }
 0x430   : > { %3562 = vmatmul.bf16.gmra.mxu2 %v6062_v20 }
 0x431   : > { %v3684_v39 = vpop.f32.mrf.mxu3  ;;  %v8649_v50 = vpack.c.bf16 %v4055_v23, %v4054_v10  ;;  %v6041_v23 = vld [vmem:[%s10127_s5 + $0x340] sm:$0xf] }
 0x432   : > { %v3344_v11 = vpop.f32.mrf.mxu1  ;;  %v3771_v25 = vpop.f32.mrf.mxu0 }
 0x433   : > { %v3345_v42 = vadd.f32 %v3344_v11, %v8467_v40  ;;  %v3772_v51 = vadd.f32 %v3771_v25, %v8090_v55  ;;  %v8654_v1 = vpop.f32.mrf.mxu2  ;;  %v3929_v55 = vld [vmem:[%s10129_s7 + $0x18] sm:$0xff]  ;;  %v6065_v25 = vld [vmem:[%s10127_s5 + $0x368] sm:$0xf] }
 0x435   : > { %v3514_v4 = vadd.f32 %v8572_v7, %v3345_v42  ;;  %3383 = vmatmul.bf16.gmra.mxu1 %v6026_v60  ;;  %3810 = vmatmul.bf16.gmra.mxu0 %v5782_v48  ;;  %v3992_v40 = vadd.f32 %v3928_v54, %v3772_v51  ;;  %v6042_v51 = vor.u32 %v6406_v36, %v6041_v23  ;;  %v3930_v23 = vld [vmem:[%s10129_s7 + $0x20] sm:$0xff] }
 0x436   : > { %3726 = vmatmul.bf16.gmra.mxu3 %v6050_v22  ;;  %v6411_v22 = vld [vmem:[%s10127_s5 + $0x374] sm:$0xf0] }
 0x437   : > { %v8656_v13 = vadd.f32 %v3682_v2, %v3514_v4  ;;  %v4056_v60 = vmax.f32 %v3992_v40, 0.0  ;;  %v6066_v40 = vor.u32 %v6411_v22, %v6065_v25  ;;  %v6345_v25 = vld [vmem:[%s10127_s5 + $0x16c] sm:$0xf] }
 0x439   : > { %v3687_v29 = vpop.f32.mrf.mxu3 }
 0x43a   : > { %v3346_v58 = vpop.f32.mrf.mxu1  ;;  %v3773_v17 = vpop.f32.mrf.mxu0 }
 0x43b   : > { %v3347_v7 = vadd.f32 %v3346_v58, %v8472_v37  ;;  %v3774_v41 = vadd.f32 %v3773_v17, %v8107_v19  ;;  %v8676_v20 = vpop.f32.mrf.mxu2  ;;  %v5795_v37 = vld [vmem:[%s10127_s5 + $0x158] sm:$0xf0]  ;;  %v6412_v19 = vld [vmem:[%s10127_s5 + $0x384] sm:$0xf] }
 0x43c   : > { %v5798_v4 = vor.u32 %v6341_v0, %v5795_v37 }
 0x43d   : > { %v3993_v10 = vadd.f32 %v3929_v55, %v3774_v41  ;;  %v3516_v2 = vadd.f32 %v8588_v53, %v3347_v7  ;;  %v6075_v53 = vld [vmem:[%s10127_s5 + $0x390] sm:$0xf0] }
 0x43e   : > { %v6078_v42 = vor.u32 %v6412_v19, %v6075_v53 }
 0x43f   : > { %v4057_v48 = vmax.f32 %v3993_v10, 0.0  ;;  %v8687_v11 = vadd.f32 %v3684_v39, %v3516_v2 }
 0x440   : > { %3567 = vmatmul.bf16.gmra.mxu2 %v6078_v42 }
 0x441   : > { %v3689_v54 = vpop.f32.mrf.mxu3  ;;  %v8695_v58 = vpack.c.bf16 %v4057_v48, %v4056_v60  ;;  %v6057_v60 = vld [vmem:[%s10127_s5 + $0x360] sm:$0xf]  ;;  %v6410_v48 = vld [vmem:[%s10127_s5 + $0x36c] sm:$0xf0] }
 0x442   : > { %v3349_v17 = vpop.f32.mrf.mxu1  ;;  %v3776_v55 = vpop.f32.mrf.mxu0 }
 0x443   : > { %v3350_v39 = vadd.f32 %v3349_v17, %v8501_v32  ;;  %v3777_v7 = vadd.f32 %v3776_v55, %v8122_v18  ;;  %v8700_v10 = vpop.f32.mrf.mxu2  ;;  %v3931_v18 = vld [vmem:[%s10129_s7 + $0x28] sm:$0xff]  ;;  %v6415_v17 = vld [vmem:[%s10127_s5 + $0x394] sm:$0xf0] }
 0x445   : > { %v3519_v41 = vadd.f32 %v8609_v49, %v3350_v39  ;;  %3388 = vmatmul.bf16.gmra.mxu1 %v6042_v51  ;;  %3815 = vmatmul.bf16.gmra.mxu0 %v5798_v4  ;;  %v3994_v32 = vadd.f32 %v3930_v23, %v3777_v7  ;;  %v6081_v4 = vld [vmem:[%s10127_s5 + $0x388] sm:$0xf]  ;;  %v6058_v39 = vor.u32 %v6410_v48, %v6057_v60 }
 0x446   : > { %3731 = vmatmul.bf16.gmra.mxu3 %v6066_v40 }
 0x447   : > { %v8702_v2 = vadd.f32 %v3687_v29, %v3519_v41  ;;  %v4058_v22 = vmax.f32 %v3994_v32, 0.0 }
 0x449   : > { %v3692_v36 = vpop.f32.mrf.mxu3 }
 0x44a   : > { %v3351_v0 = vpop.f32.mrf.mxu1  ;;  %v3778_v37 = vpop.f32.mrf.mxu0 }
 0x44b   : > { %v3352_v49 = vadd.f32 %v3351_v0, %v8506_v12  ;;  %v3779_v19 = vadd.f32 %v3778_v37, %v8141_v3  ;;  %v5811_v12 = vld [vmem:[%s10127_s5 + $0x178] sm:$0xf0]  ;;  %v6416_v3 = vld [vmem:[%s10127_s5 + $0x3a4] sm:$0xf]  ;;  %v8739_v55 = vpop.f32.mrf.mxu2 }
 0x44c   : > { %10170 = vst [vmem:[#allocation33_spill] sm:$0xff] %v8739_v55  ;;  %v5814_v7 = vor.u32 %v6345_v25, %v5811_v12 }
 0x44d   : > { %v3995_v53 = vadd.f32 %v3931_v18, %v3779_v19  ;;  %v3521_v29 = vadd.f32 %v8630_v46, %v3352_v49  ;;  %v6091_v46 = vld [vmem:[%s10127_s5 + $0x3b0] sm:$0xf0] }
 0x44e   : > { %v6094_v40 = vor.u32 %v6416_v3, %v6091_v46  ;;  %v6073_v46 = vld [vmem:[%s10127_s5 + $0x380] sm:$0xf] }
 0x44f   : > { %v4059_v42 = vmax.f32 %v3995_v53, 0.0  ;;  %v8731_v51 = vadd.f32 %v3689_v54, %v3521_v29  ;;  %v6082_v54 = vor.u32 %v6415_v17, %v6081_v4  ;;  %v3932_v53 = vld [vmem:[%s10129_s7 + $0x30] sm:$0xff] }
 0x450   : > { %3572 = vmatmul.bf16.gmra.mxu2 %v6094_v40 }
 0x451   : > { %v3694_v41 = vpop.f32.mrf.mxu3  ;;  %v8741_v23 = vpack.c.bf16 %v4059_v42, %v4058_v22  ;;  %v6414_v22 = vld [vmem:[%s10127_s5 + $0x38c] sm:$0xf0]  ;;  %v6349_v42 = vld [vmem:[%s10127_s5 + $0x18c] sm:$0xf] }
 0x452   : > { %v3354_v0 = vpop.f32.mrf.mxu1  ;;  %v3781_v37 = vpop.f32.mrf.mxu0 }
 0x453   : > { %v3355_v18 = vadd.f32 %v3354_v0, %v8535_v31  ;;  %v3782_v32 = vadd.f32 %v3781_v37, %v8158_v5  ;;  %v8751_v60 = vpop.f32.mrf.mxu2  ;;  %v3933_v5 = vld [vmem:[%s10129_s7 + $0x38] sm:$0xff]  ;;  %v6074_v37 = vor.u32 %v6414_v22, %v6073_v46 }
 0x455   : > { %v3524_v49 = vadd.f32 %v8654_v1, %v3355_v18  ;;  %3393 = vmatmul.bf16.gmra.mxu1 %v6058_v39  ;;  %3820 = vmatmul.bf16.gmra.mxu0 %v5814_v7  ;;  %v3996_v31 = vadd.f32 %v3932_v53, %v3782_v32  ;;  %v6097_v39 = vld [vmem:[%s10127_s5 + $0x3a8] sm:$0xf]  ;;  %v6419_v7 = vld [vmem:[%s10127_s5 + $0x3b4] sm:$0xf0] }
 0x456   : > { %3736 = vmatmul.bf16.gmra.mxu3 %v6082_v54 }
 0x457   : > { %v8746_v19 = vadd.f32 %v3692_v36, %v3524_v49  ;;  %v4060_v4 = vmax.f32 %v3996_v31, 0.0 }
 0x459   : > { %v3697_v29 = vpop.f32.mrf.mxu3 }
 0x45a   : > { %v3356_v48 = vpop.f32.mrf.mxu1  ;;  %v3783_v25 = vpop.f32.mrf.mxu0 }
 0x45b   : > { %v3357_v1 = vadd.f32 %v3356_v48, %v8540_v6  ;;  %v3784_v12 = vadd.f32 %v3783_v25, %v8177_v61  ;;  %v5827_v6 = vld [vmem:[%s10127_s5 + $0x198] sm:$0xf0]  ;;  %v6420_v61 = vld [vmem:[%s10127_s5 + $0x3c4] sm:$0xf]  ;;  %v6098_v48 = vor.u32 %v6419_v7, %v6097_v39  ;;  %v6113_v7 = vld [vmem:[%s10127_s5 + $0x3c8] sm:$0xf] }
 0x45c   : > { %v5830_v54 = vor.u32 %v6349_v42, %v5827_v6  ;;  %v6418_v42 = vld [vmem:[%s10127_s5 + $0x3ac] sm:$0xf0]  ;;  %v6353_v6 = vld [vmem:[%s10127_s5 + $0x1ac] sm:$0xf] }
 0x45d   : > { %v3997_v36 = vadd.f32 %v3933_v5, %v3784_v12  ;;  %v3526_v3 = vadd.f32 %v8676_v20, %v3357_v1  ;;  %v6107_v20 = vld [vmem:[%s10127_s5 + $0x3d0] sm:$0xf0]  ;;  %v8791_v5 = vpop.f32.mrf.mxu2  ;;  %v3934_v12 = vld [vmem:[%s10129_s7 + $0x40] sm:$0xff] }
 0x45e   : > { %v6110_v0 = vor.u32 %v6420_v61, %v6107_v20  ;;  %v5843_v20 = vld [vmem:[%s10127_s5 + $0x1b8] sm:$0xf0] }
 0x45f   : > { %v4061_v17 = vmax.f32 %v3997_v36, 0.0  ;;  %v8777_v40 = vadd.f32 %v3694_v41, %v3526_v3 }
 0x460   : > { %3577 = vmatmul.bf16.gmra.mxu2 %v6110_v0  ;;  %v6423_v0 = vld [vmem:[%s10127_s5 + $0x3d4] sm:$0xf0] }
 0x461   : > { %v8785_v18 = vpop.f32.mrf.mxu3  ;;  %v8787_v32 = vpack.c.bf16 %v4061_v17, %v4060_v4  ;;  %v6123_v4 = vld [vmem:[%s10127_s5 + $0x3f0] sm:$0xf0] }
 0x462   : > { %10171 = vst [vmem:[#allocation34_spill] sm:$0xff] %v8785_v18  ;;  %v3359_v49 = vpop.f32.mrf.mxu1  ;;  %v3786_v53 = vpop.f32.mrf.mxu0 }
 0x463   : > { %v3360_v41 = vadd.f32 %v3359_v49, %v8569_v30  ;;  %v3787_v25 = vadd.f32 %v3786_v53, %v8194_v43  ;;  %v3935_v43 = vld [vmem:[%s10129_s7 + $0x48] sm:$0xff]  ;;  %v5846_v49 = vor.u32 %v6353_v6, %v5843_v20 }
 0x465   : > { %v3529_v31 = vadd.f32 %v8700_v10, %v3360_v41  ;;  %3398 = vmatmul.bf16.gmra.mxu1 %v6074_v37  ;;  %3825 = vmatmul.bf16.gmra.mxu0 %v5830_v54  ;;  %v3998_v46 = vadd.f32 %v3934_v12, %v3787_v25  ;;  %v8816_v61 = vpop.f32.mrf.mxu2 }
 0x466   : > { %3741 = vmatmul.bf16.gmra.mxu3 %v6098_v48 }
 0x467   : > { %v8794_v1 = vadd.f32 %v3697_v29, %v3529_v31  ;;  %v6089_v29 = vld [vmem:[%s10127_s5 + $0x3a0] sm:$0xf]  ;;  %v4062_v17 = vmax.f32 %v3998_v46, 0.0  ;;  %v6114_v31 = vor.u32 %v6423_v0, %v6113_v7  ;;  %v6427_v0 = vld [vmem:[%s10127_s5 + $0x3f4] sm:$0xf0] }
 0x468   : > { %v6090_v54 = vor.u32 %v6418_v42, %v6089_v29  ;;  %v3937_v29 = vld [vmem:[%s10129_s7 + $0x58] sm:$0xff] }
 0x469   : > { %v8799_v36 = vpop.f32.mrf.mxu3 }
 0x46a   : > { %10172 = vst [vmem:[#allocation35_spill] sm:$0xff] %v8799_v36  ;;  %v8801_v3 = vpop.f32.mrf.mxu1  ;;  %v3788_v30 = vpop.f32.mrf.mxu0  ;;  %v3940_v36 = vld [vmem:[%s10129_s7 + $0x70] sm:$0xff] }
 0x46b   : > { %v3789_v10 = vadd.f32 %v3788_v30, %v8214_v16  ;;  %v6424_v16 = vld [vmem:[%s10127_s5 + $0x3e4] sm:$0xf] }
 0x46c   : > { %v6126_v37 = vor.u32 %v6424_v16, %v6123_v4  ;;  %v6422_v16 = vld [vmem:[%s10127_s5 + $0x3cc] sm:$0xf0]  ;;  %v6357_v4 = vld [vmem:[%s10127_s5 + $0x1cc] sm:$0xf] }
 0x46d   : > { %v3999_v22 = vadd.f32 %v3935_v43, %v3789_v10  ;;  %v8840_v30 = vpop.f32.mrf.mxu2  ;;  %v3936_v43 = vld [vmem:[%s10129_s7 + $0x50] sm:$0xff] }
 0x46f   : > { %v4063_v39 = vmax.f32 %v3999_v22, 0.0 }
 0x470   : > { %3582 = vmatmul.bf16.gmra.mxu2 %v6126_v37 }
 0x471   : > { %v8833_v53 = vpop.f32.mrf.mxu3  ;;  %v8835_v48 = vpack.c.bf16 %v4063_v39, %v4062_v17  ;;  %v5859_v17 = vld [vmem:[%s10127_s5 + $0x1d8] sm:$0xf0] }
 0x472   : > { %10173 = vst [vmem:[#allocation36_spill] sm:$0xff] %v8833_v53  ;;  %v8837_v41 = vpop.f32.mrf.mxu1  ;;  %v3791_v25 = vpop.f32.mrf.mxu0 }
 0x473   : > { %v3792_v12 = vadd.f32 %v3791_v25, %v8232_v63  ;;  %v6105_v63 = vld [vmem:[%s10127_s5 + $0x3c0] sm:$0xf] }
 0x474   : > { %v6106_v37 = vor.u32 %v6422_v16, %v6105_v63  ;;  %v3939_v16 = vld [vmem:[%s10129_s7 + $0x68] sm:$0xff] }
 0x475   : > { %3403 = vmatmul.bf16.gmra.mxu1 %v6090_v54  ;;  %3830 = vmatmul.bf16.gmra.mxu0 %v5846_v49  ;;  %v4000_v42 = vadd.f32 %v3936_v43, %v3792_v12  ;;  %v5862_v54 = vor.u32 %v6357_v4, %v5859_v17  ;;  %v8873_v25 = vpop.f32.mrf.mxu2 }
 0x476   : > { %3746 = vmatmul.bf16.gmra.mxu3 %v6114_v31 }
 0x477   : > { %v4064_v39 = vmax.f32 %v4000_v42, 0.0  ;;  %v3938_v42 = vld [vmem:[%s10129_s7 + $0x60] sm:$0xff] }
 0x479   : > { %v8845_v46 = vpop.f32.mrf.mxu3 }
 0x47a   : > { %v8847_v10 = vpop.f32.mrf.mxu1  ;;  %v3793_v22 = vpop.f32.mrf.mxu0 }
 0x47b   : > { %v3794_v6 = vadd.f32 %v3793_v22, %v8250_v28  ;;  %v6129_v28 = vld [vmem:[%s10127_s5 + $0x3e8] sm:$0xf] }
 0x47c   : > { %v6130_v22 = vor.u32 %v6427_v0, %v6129_v28  ;;  %v6426_v28 = vld [vmem:[%s10127_s5 + $0x3ec] sm:$0xf0]  ;;  %v6361_v0 = vld [vmem:[%s10127_s5 + $0x1ec] sm:$0xf] }
 0x47d   : > { %v4001_v20 = vadd.f32 %v3937_v29, %v3794_v6 }
 0x47f   : > { %v4065_v7 = vmax.f32 %v4001_v20, 0.0 }
 0x481   : > { %v8871_v49 = vpop.f32.mrf.mxu3  ;;  %v8875_v31 = vpack.c.bf16 %v4065_v7, %v4064_v39  ;;  %v8891_v39 = vpop.f32.mrf.mxu2 }
 0x482   : > { %v8877_v12 = vpop.f32.mrf.mxu1  ;;  %v3796_v43 = vpop.f32.mrf.mxu0 }
 0x483   : > { %v3797_v29 = vadd.f32 %v3796_v43, %v8266_v45  ;;  %v6121_v45 = vld [vmem:[%s10127_s5 + $0x3e0] sm:$0xf] }
 0x484   : > { %v6122_v43 = vor.u32 %v6426_v28, %v6121_v45  ;;  %v3941_v45 = vld [vmem:[%s10129_s7 + $0x78] sm:$0xff] }
 0x485   : > { %3408 = vmatmul.bf16.gmra.mxu1 %v6106_v37  ;;  %3835 = vmatmul.bf16.gmra.mxu0 %v5862_v54  ;;  %v4002_v4 = vadd.f32 %v3938_v42, %v3797_v29  ;;  %v5875_v37 = vld [vmem:[%s10127_s5 + $0x1f8] sm:$0xf0] }
 0x486   : > { %3751 = vmatmul.bf16.gmra.mxu3 %v6130_v22  ;;  %v5878_v22 = vor.u32 %v6361_v0, %v5875_v37 }
 0x489   : > { %v8883_v6 = vpop.f32.mrf.mxu3 }
 0x48a   : > { %v8885_v20 = vpop.f32.mrf.mxu1  ;;  %v3798_v63 = vpop.f32.mrf.mxu0 }
 0x48b   : > { %v3799_v17 = vadd.f32 %v3798_v63, %v8284_v62  ;;  %v4066_v62 = vmax.f32 %v4002_v4, 0.0 }
 0x48d   : > { %v4003_v7 = vadd.f32 %v3939_v16, %v3799_v17  ;;  %v3548_v17 = vpop.f32.mrf.mxu2 }
 0x48f   : > { %v4067_v54 = vmax.f32 %v4003_v7, 0.0 }
 0x491   : > { %v8905_v29 = vpop.f32.mrf.mxu3  ;;  %v4156_v42 = vpack.c.bf16 %v4067_v54, %v4066_v62  ;;  %v5891_v62 = vld [vmem:[%s10127_s5 + $0x218] sm:$0xf0] }
 0x492   : > { %10174 = vst [vmem:[#allocation37_spill] sm:$0xff] %v8905_v29  ;;  %v8907_v63 = vpop.f32.mrf.mxu1  ;;  %v3801_v16 = vpop.f32.mrf.mxu0 }
 0x493   : > { %v3802_v18 = vadd.f32 %v3801_v16, %v8300_v15  ;;  %v6365_v15 = vld [vmem:[%s10127_s5 + $0x20c] sm:$0xf] }
 0x494   : > { %v5894_v55 = vor.u32 %v6365_v15, %v5891_v62 }
 0x495   : > { %3413 = vmatmul.bf16.gmra.mxu1 %v6122_v43  ;;  %3840 = vmatmul.bf16.gmra.mxu0 %v5878_v22  ;;  %v4004_v28 = vadd.f32 %v3940_v36, %v3802_v18  ;;  %v8925_v22 = vpop.f32.mrf.mxu2 }
 0x497   : > { %v4068_v54 = vmax.f32 %v4004_v28, 0.0  ;;  %v3942_v28 = vld [vmem:[%s10129_s7 + $0x80] sm:$0xff] }
 0x499   : > { %v3717_v53 = vpop.f32.mrf.mxu3 }
 0x49a   : > { %v8913_v4 = vpop.f32.mrf.mxu1  ;;  %v3803_v7 = vpop.f32.mrf.mxu0 }
 0x49b   : > { %v3804_v0 = vadd.f32 %v3803_v7, %v8323_v14 }
 0x49d   : > { %v4005_v37 = vadd.f32 %v3941_v45, %v3804_v0 }
 0x49f   : > { %v4069_v43 = vmax.f32 %v4005_v37, 0.0  ;;  %v3553_v37 = vpop.f32.mrf.mxu2 }
 0x4a1   : > { %v4157_v16 = vpack.c.bf16 %v4069_v43, %v4068_v54  ;;  %v8927_v29 = vpop.f32.mrf.mxu3 }
 0x4a2   : > { %v3379_v18 = vpop.f32.mrf.mxu1  ;;  %v3806_v36 = vpop.f32.mrf.mxu0 }
 0x4a3   : > { %v3380_v14 = vadd.f32 %v3379_v18, %v7992_v47  ;;  %v3807_v7 = vadd.f32 %v3806_v36, %v8334_v34  ;;  %4358 = vmatpush.bf16.msra.mxu1 %v4157_v16  ;;  %v3943_v47 = vld [vmem:[%s10129_s7 + $0x88] sm:$0xff] }
 0x4a5   : > { %v3549_v45 = vadd.f32 %v3548_v17, %v3380_v14  ;;  %3845 = vmatmul.bf16.gmra.mxu0 %v5894_v55  ;;  %v4006_v54 = vadd.f32 %v3942_v28, %v3807_v7  ;;  %v5907_v17 = vld [vmem:[%s10127_s5 + $0x238] sm:$0xf0] }
 0x4a7   : > { %v8931_v0 = vadd.f32 %v3717_v53, %v3549_v45  ;;  %4359 = vmatpush.bf16.msra.mxu1 %v4156_v42  ;;  %v6369_v42 = vld [vmem:[%s10127_s5 + $0x22c] sm:$0xf]  ;;  %v4070_v43 = vmax.f32 %v4006_v54, 0.0  ;;  %v8955_v45 = vpop.f32.mrf.mxu2 }
 0x4a8   : > { %v5910_v18 = vor.u32 %v6369_v42, %v5907_v17 }
 0x4a9   : > { %v3722_v55 = vpop.f32.mrf.mxu3 }
 0x4aa   : > { %v8936_v15 = vpop.f32.mrf.mxu1  ;;  %v3808_v62 = vpop.f32.mrf.mxu0 }
 0x4ab   : > { %v3809_v34 = vadd.f32 %v3808_v62, %v8357_v9  ;;  %4360 = vmatpush.bf16.msra.mxu1 %v8875_v31 }
 0x4ad   : > { %v4007_v53 = vadd.f32 %v3943_v47, %v3809_v34 }
 0x4af   : > { %v4071_v16 = vmax.f32 %v4007_v53, 0.0  ;;  %4361 = vmatpush.bf16.msra.mxu1 %v8835_v48  ;;  %v3944_v48 = vld [vmem:[%s10129_s7 + $0x90] sm:$0xff]  ;;  %v5923_v53 = vld [vmem:[%s10127_s5 + $0x258] sm:$0xf0] }
 0x4b1   : > { %v8950_v36 = vpack.c.bf16 %v4071_v16, %v4070_v43  ;;  %v8957_v62 = vpop.f32.mrf.mxu3 }
 0x4b2   : > { %v3384_v9 = vpop.f32.mrf.mxu1  ;;  %v3811_v14 = vpop.f32.mrf.mxu0 }
 0x4b3   : > { %v3385_v31 = vadd.f32 %v3384_v9, %v8026_v52  ;;  %v3812_v7 = vadd.f32 %v3811_v14, %v8368_v35  ;;  %4362 = vmatpush.bf16.msra.mxu1 %v8787_v32  ;;  %v3945_v35 = vld [vmem:[%s10129_s7 + $0x98] sm:$0xff] }
 0x4b5   : > { %v3554_v28 = vadd.f32 %v3553_v37, %v3385_v31  ;;  %3850 = vmatmul.bf16.gmra.mxu0 %v5910_v18  ;;  %v4008_v32 = vadd.f32 %v3944_v48, %v3812_v7 }
 0x4b7   : > { %v8959_v47 = vadd.f32 %v3722_v55, %v3554_v28  ;;  %4363 = vmatpush.bf16.msra.mxu1 %v8741_v23  ;;  %v3558_v55 = vpop.f32.mrf.mxu2  ;;  %v6373_v23 = vld [vmem:[%s10127_s5 + $0x24c] sm:$0xf]  ;;  %v4072_v42 = vmax.f32 %v4008_v32, 0.0 }
 0x4b8   : > { %v5926_v16 = vor.u32 %v6373_v23, %v5923_v53 }
 0x4b9   : > { %v3727_v43 = vpop.f32.mrf.mxu3 }
 0x4ba   : > { %v8965_v54 = vpop.f32.mrf.mxu1  ;;  %v3813_v52 = vpop.f32.mrf.mxu0 }
 0x4bb   : > { %v3814_v37 = vadd.f32 %v3813_v52, %v8391_v8  ;;  %4364 = vmatpush.bf16.msra.mxu1 %v8695_v58 }
 0x4bd   : > { %v4009_v34 = vadd.f32 %v3945_v35, %v3814_v37 }
 0x4bf   : > { %v4073_v17 = vmax.f32 %v4009_v34, 0.0  ;;  %4365 = vmatpush.bf16.msra.mxu1 %v8649_v50  ;;  %v8985_v28 = vpop.f32.mrf.mxu2  ;;  %v3946_v50 = vld [vmem:[%s10129_s7 + $0xa0] sm:$0xff]  ;;  %v6377_v34 = vld [vmem:[%s10127_s5 + $0x26c] sm:$0xf] }
 0x4c1   : > { %v8979_v18 = vpack.c.bf16 %v4073_v17, %v4072_v42  ;;  %v8990_v48 = vpop.f32.mrf.mxu3 }
 0x4c2   : > { %v3389_v8 = vpop.f32.mrf.mxu1  ;;  %v3816_v58 = vpop.f32.mrf.mxu0 }
 0x4c3   : > { %v3390_v9 = vadd.f32 %v3389_v8, %v7918_v57  ;;  %v3817_v14 = vadd.f32 %v3816_v58, %v8402_v27  ;;  %v3947_v57 = vld [vmem:[%s10129_s7 + $0xa8] sm:$0xff] }
 0x4c5   : > { %v3559_v31 = vadd.f32 %v3558_v55, %v3390_v9  ;;  %3855 = vmatmul.bf16.gmra.mxu0 %v5926_v16  ;;  %v4010_v27 = vadd.f32 %v3946_v50, %v3817_v14  ;;  %v5939_v55 = vld [vmem:[%s10127_s5 + $0x278] sm:$0xf0]  ;;  %v3948_v50 = vld [vmem:[%s10129_s7 + $0xb0] sm:$0xff] }
 0x4c6   : > { %v5942_v17 = vor.u32 %v6377_v34, %v5939_v55 }
 0x4c7   : > { %v8983_v7 = vadd.f32 %v3727_v43, %v3559_v31  ;;  %v4074_v23 = vmax.f32 %v4010_v27, 0.0  ;;  %v3563_v42 = vpop.f32.mrf.mxu2 }
 0x4c9   : > { %v3732_v9 = vpop.f32.mrf.mxu3 }
 0x4ca   : > { %v8992_v52 = vpop.f32.mrf.mxu1  ;;  %v3818_v35 = vpop.f32.mrf.mxu0 }
 0x4cb   : > { %v3819_v32 = vadd.f32 %v3818_v35, %v8425_v24 }
 0x4cd   : > { %v4011_v37 = vadd.f32 %v3947_v57, %v3819_v32  ;;  %v3949_v57 = vld [vmem:[%s10129_s7 + $0xb8] sm:$0xff] }
 0x4cf   : > { %v4075_v53 = vmax.f32 %v4011_v37, 0.0  ;;  %v5955_v37 = vld [vmem:[%s10127_s5 + $0x298] sm:$0xf0] }
 0x4d1   : > { %v9004_v43 = vpack.c.bf16 %v4075_v53, %v4074_v23 }
 0x4d2   : > { %v3394_v16 = vpop.f32.mrf.mxu1  ;;  %v3821_v8 = vpop.f32.mrf.mxu0 }
 0x4d3   : > { %v3395_v58 = vadd.f32 %v3394_v16, %v7956_v59  ;;  %v3822_v24 = vadd.f32 %v3821_v8, %v8436_v33  ;;  %v6381_v33 = vld [vmem:[%s10127_s5 + $0x28c] sm:$0xf] }
 0x4d4   : > { %v5958_v23 = vor.u32 %v6381_v33, %v5955_v37 }
 0x4d5   : > { %v3564_v14 = vadd.f32 %v3563_v42, %v3395_v58  ;;  %3860 = vmatmul.bf16.gmra.mxu0 %v5942_v17  ;;  %v4012_v27 = vadd.f32 %v3948_v50, %v3822_v24  ;;  %v10175_v17 = vld [vmem:[#allocation26_spill] sm:$0xff]  ;;  %v3951_v58 = vld [vmem:[%s10129_s7 + $0xc8] sm:$0xff] }
 0x4d7   : > { %v9008_v31 = vadd.f32 %v3732_v9, %v3564_v14  ;;  %v4076_v34 = vmax.f32 %v4012_v27, 0.0  ;;  %v10176_v9 = vld [vmem:[#allocation27_spill] sm:$0xff] }
 0x4da   : > { %v3823_v35 = vpop.f32.mrf.mxu0 }
 0x4db   : > { %v3824_v32 = vadd.f32 %v3823_v35, %v8459_v56  ;;  %v3950_v56 = vld [vmem:[%s10129_s7 + $0xc0] sm:$0xff]  ;;  %v6385_v35 = vld [vmem:[%s10127_s5 + $0x2ac] sm:$0xf] }
 0x4dd   : > { %v4013_v59 = vadd.f32 %v3949_v57, %v3824_v32  ;;  %v5971_v57 = vld [vmem:[%s10127_s5 + $0x2b8] sm:$0xf0] }
 0x4df   : > { %v4077_v55 = vmax.f32 %v4013_v59, 0.0  ;;  %v5974_v59 = vor.u32 %v6385_v35, %v5971_v57 }
 0x4e1   : > { %v9023_v53 = vpack.c.bf16 %v4077_v55, %v4076_v34  ;;  %v10177_v34 = vld [vmem:[#allocation28_spill] sm:$0xff] }
 0x4e2   : > { %v3826_v42 = vpop.f32.mrf.mxu0 }
 0x4e3   : > { %v3827_v16 = vadd.f32 %v3826_v42, %v10175_v17  ;;  %v3953_v17 = vld [vmem:[%s10129_s7 + $0xd8] sm:$0xff] }
 0x4e5   : > { %3865 = vmatmul.bf16.gmra.mxu0 %v5958_v23  ;;  %v4014_v24 = vadd.f32 %v3950_v56, %v3827_v16  ;;  %v3952_v23 = vld [vmem:[%s10129_s7 + $0xd0] sm:$0xff]  ;;  %v10178_v56 = vld [vmem:[#allocation29_spill] sm:$0xff] }
 0x4e7   : > { %v4078_v27 = vmax.f32 %v4014_v24, 0.0  ;;  %v6389_v24 = vld [vmem:[%s10127_s5 + $0x2cc] sm:$0xf] }
 0x4ea   : > { %v3828_v8 = vpop.f32.mrf.mxu0 }
 0x4eb   : > { %v3829_v14 = vadd.f32 %v3828_v8, %v10176_v9  ;;  %v5987_v9 = vld [vmem:[%s10127_s5 + $0x2d8] sm:$0xf0] }
 0x4ec   : > { %v5990_v35 = vor.u32 %v6389_v24, %v5987_v9 }
 0x4ed   : > { %v4015_v50 = vadd.f32 %v3951_v58, %v3829_v14 }
 0x4ef   : > { %v4079_v32 = vmax.f32 %v4015_v50, 0.0 }
 0x4f1   : > { %v4162_v33 = vpack.c.bf16 %v4079_v32, %v4078_v27 }
 0x4f2   : > { %v3831_v37 = vpop.f32.mrf.mxu0 }
 0x4f3   : > { %v3832_v55 = vadd.f32 %v3831_v37, %v10177_v34  ;;  %v3955_v34 = vld [vmem:[%s10129_s7 + $0xe8] sm:$0xff] }
 0x4f5   : > { %3870 = vmatmul.bf16.gmra.mxu0 %v5974_v59  ;;  %v4016_v16 = vadd.f32 %v3952_v23, %v3832_v55  ;;  %v3954_v59 = vld [vmem:[%s10129_s7 + $0xe0] sm:$0xff]  ;;  %v10179_v23 = vld [vmem:[#allocation30_spill] sm:$0xff] }
 0x4f7   : > { %v4080_v14 = vmax.f32 %v4016_v16, 0.0  ;;  %v6393_v16 = vld [vmem:[%s10127_s5 + $0x2ec] sm:$0xf] }
 0x4fa   : > { %v3833_v42 = vpop.f32.mrf.mxu0 }
 0x4fb   : > { %v3834_v8 = vadd.f32 %v3833_v42, %v10178_v56 }
 0x4fd   : > { %v4017_v58 = vadd.f32 %v3953_v17, %v3834_v8 }
 0x4ff   : > { %v4081_v50 = vmax.f32 %v4017_v58, 0.0 }
 0x501   : > { %v4163_v57 = vpack.c.bf16 %v4081_v50, %v4080_v14  ;;  %v3956_v50 = vld [vmem:[%s10129_s7 + $0xf0] sm:$0xff] }
 0x502   : > { %v3836_v27 = vpop.f32.mrf.mxu0 }
 0x503   : > { %v3837_v32 = vadd.f32 %v3836_v27, %v8538_v21  ;;  %v6003_v21 = vld [vmem:[%s10127_s5 + $0x2f8] sm:$0xf0] }
 0x504   : > { %v6006_v58 = vor.u32 %v6393_v16, %v6003_v21  ;;  %v3957_v27 = vld [vmem:[%s10129_s7 + $0xf8] sm:$0xff] }
 0x505   : > { %3875 = vmatmul.bf16.gmra.mxu0 %v5990_v35  ;;  %v4018_v55 = vadd.f32 %v3954_v59, %v3837_v32  ;;  %v10180_v59 = vld [vmem:[#allocation32_spill] sm:$0xff] }
 0x507   : > { %v4082_v56 = vmax.f32 %v4018_v55, 0.0  ;;  %v6397_v55 = vld [vmem:[%s10127_s5 + $0x30c] sm:$0xf] }
 0x50a   : > { %v3838_v37 = vpop.f32.mrf.mxu0 }
 0x50b   : > { %v3839_v42 = vadd.f32 %v3838_v37, %v10179_v23 }
 0x50d   : > { %v4019_v17 = vadd.f32 %v3955_v34, %v3839_v42 }
 0x50f   : > { %v4083_v8 = vmax.f32 %v4019_v17, 0.0 }
 0x511   : > { %v4164_v24 = vpack.c.bf16 %v4083_v8, %v4082_v56  ;;  %v3958_v8 = vld [vmem:[%s10129_s7 + $0x100] sm:$0xff] }
 0x512   : > { %v3841_v9 = vpop.f32.mrf.mxu0 }
 0x513   : > { %v3842_v14 = vadd.f32 %v3841_v9, %v8574_v38  ;;  %v6019_v38 = vld [vmem:[%s10127_s5 + $0x318] sm:$0xf0]  ;;  %v3959_v9 = vld [vmem:[%s10129_s7 + $0x108] sm:$0xff] }
 0x514   : > { %v6022_v16 = vor.u32 %v6397_v55, %v6019_v38 }
 0x515   : > { %3880 = vmatmul.bf16.gmra.mxu0 %v6006_v58  ;;  %v4020_v32 = vadd.f32 %v3956_v50, %v3842_v14 }
 0x517   : > { %v4084_v23 = vmax.f32 %v4020_v32, 0.0 }
 0x51a   : > { %v3843_v35 = vpop.f32.mrf.mxu0 }
 0x51b   : > { %v3844_v37 = vadd.f32 %v3843_v35, %v10180_v59 }
 0x51d   : > { %v4021_v34 = vadd.f32 %v3957_v27, %v3844_v37 }
 0x51f   : > { %v4085_v42 = vmax.f32 %v4021_v34, 0.0 }
 0x521   : > { %v4165_v17 = vpack.c.bf16 %v4085_v42, %v4084_v23 }
 0x522   : > { %v3846_v21 = vpop.f32.mrf.mxu0 }
 0x523   : > { %v3847_v56 = vadd.f32 %v3846_v21, %v8611_v26  ;;  %4407 = vmatpush.bf16.msra.mxu2 %v4165_v17  ;;  %v6401_v26 = vld [vmem:[%s10127_s5 + $0x32c] sm:$0xf] }
 0x525   : > { %3885 = vmatmul.bf16.gmra.mxu0 %v6022_v16  ;;  %v4022_v14 = vadd.f32 %v3958_v8, %v3847_v56 }
 0x527   : > { %4408 = vmatpush.bf16.msra.mxu2 %v4164_v24  ;;  %v6035_v24 = vld [vmem:[%s10127_s5 + $0x338] sm:$0xf0]  ;;  %v4086_v27 = vmax.f32 %v4022_v14, 0.0 }
 0x528   : > { %v6038_v59 = vor.u32 %v6401_v26, %v6035_v24 }
 0x52a   : > { %v3848_v58 = vpop.f32.mrf.mxu0 }
 0x52b   : > { %v3849_v50 = vadd.f32 %v3848_v58, %v8641_v44  ;;  %4409 = vmatpush.bf16.msra.mxu2 %v4163_v57  ;;  %v3960_v44 = vld [vmem:[%s10129_s7 + $0x110] sm:$0xff]  ;;  %v3963_v58 = vld [vmem:[%s10129_s7 + $0x128] sm:$0xff] }
 0x52d   : > { %v4023_v35 = vadd.f32 %v3959_v9, %v3849_v50  ;;  %v6409_v50 = vld [vmem:[%s10127_s5 + $0x36c] sm:$0xf] }
 0x52f   : > { %v4087_v32 = vmax.f32 %v4023_v35, 0.0  ;;  %4410 = vmatpush.bf16.msra.mxu2 %v4162_v33  ;;  %v3961_v33 = vld [vmem:[%s10129_s7 + $0x118] sm:$0xff] }
 0x531   : > { %v9095_v37 = vpack.c.bf16 %v4087_v32, %v4086_v27 }
 0x532   : > { %v3851_v34 = vpop.f32.mrf.mxu0 }
 0x533   : > { %v3852_v55 = vadd.f32 %v3851_v34, %v8656_v13  ;;  %4411 = vmatpush.bf16.msra.mxu2 %v9023_v53  ;;  %v6405_v53 = vld [vmem:[%s10127_s5 + $0x34c] sm:$0xf] }
 0x535   : > { %3890 = vmatmul.bf16.gmra.mxu0 %v6038_v59  ;;  %v4024_v38 = vadd.f32 %v3960_v44, %v3852_v55  ;;  %v3965_v55 = vld [vmem:[%s10129_s7 + $0x138] sm:$0xff] }
 0x537   : > { %4412 = vmatpush.bf16.msra.mxu2 %v9004_v43  ;;  %v6051_v43 = vld [vmem:[%s10127_s5 + $0x358] sm:$0xf0]  ;;  %v4088_v42 = vmax.f32 %v4024_v38, 0.0  ;;  %v6413_v38 = vld [vmem:[%s10127_s5 + $0x38c] sm:$0xf] }
 0x538   : > { %v6054_v16 = vor.u32 %v6405_v53, %v6051_v43 }
 0x53a   : > { %v3853_v57 = vpop.f32.mrf.mxu0 }
 0x53b   : > { %v3854_v23 = vadd.f32 %v3853_v57, %v8687_v11  ;;  %4413 = vmatpush.bf16.msra.mxu2 %v8979_v18  ;;  %v3962_v18 = vld [vmem:[%s10129_s7 + $0x120] sm:$0xff] }
 0x53d   : > { %v4025_v13 = vadd.f32 %v3961_v33, %v3854_v23 }
 0x53f   : > { %v4089_v17 = vmax.f32 %v4025_v13, 0.0  ;;  %4414 = vmatpush.bf16.msra.mxu2 %v8950_v36 }
 0x541   : > { %v9115_v21 = vpack.c.bf16 %v4089_v17, %v4088_v42 }
 0x542   : > { %v3856_v56 = vpop.f32.mrf.mxu0 }
 0x543   : > { %v3857_v11 = vadd.f32 %v3856_v56, %v8702_v2  ;;  %v6067_v2 = vld [vmem:[%s10127_s5 + $0x378] sm:$0xf0] }
 0x544   : > { %v6070_v24 = vor.u32 %v6409_v50, %v6067_v2  ;;  %v6099_v56 = vld [vmem:[%s10127_s5 + $0x3b8] sm:$0xf0]  ;;  %v10181_v50 = vld [vmem:[#allocation17_spill] sm:$0xff] }
 0x545   : > { %3895 = vmatmul.bf16.gmra.mxu0 %v6054_v16  ;;  %v4026_v9 = vadd.f32 %v3962_v18, %v3857_v11  ;;  %v6417_v16 = vld [vmem:[%s10127_s5 + $0x3ac] sm:$0xf]  ;;  %v3375_v2 = vadd.f32 %v8907_v63, %v10181_v50 }
 0x546   : > { %v6102_v11 = vor.u32 %v6417_v16, %v6099_v56 }
 0x547   : > { %v4090_v35 = vmax.f32 %v4026_v9, 0.0 }
 0x54a   : > { %v3858_v8 = vpop.f32.mrf.mxu0 }
 0x54b   : > { %v3859_v14 = vadd.f32 %v3858_v8, %v8731_v51  ;;  %v3964_v51 = vld [vmem:[%s10129_s7 + $0x130] sm:$0xff] }
 0x54d   : > { %v4027_v36 = vadd.f32 %v3963_v58, %v3859_v14  ;;  %v6115_v58 = vld [vmem:[%s10127_s5 + $0x3d8] sm:$0xf0] }
 0x54f   : > { %v4091_v26 = vmax.f32 %v4027_v36, 0.0 }
 0x551   : > { %v9131_v27 = vpack.c.bf16 %v4091_v26, %v4090_v35  ;;  %v6425_v35 = vld [vmem:[%s10127_s5 + $0x3ec] sm:$0xf]  ;;  %v6131_v26 = vld [vmem:[%s10127_s5 + $0x3f8] sm:$0xf0] }
 0x552   : > { %v3861_v32 = vpop.f32.mrf.mxu0  ;;  %v6134_v63 = vor.u32 %v6425_v35, %v6131_v26  ;;  %v3973_v26 = vld [vmem:[%s10129_s7 + $0x178] sm:$0xff] }
 0x553   : > { %v3862_v59 = vadd.f32 %v3861_v32, %v8746_v19  ;;  %v6083_v19 = vld [vmem:[%s10127_s5 + $0x398] sm:$0xf0] }
 0x554   : > { %v6086_v53 = vor.u32 %v6413_v38, %v6083_v19 }
 0x555   : > { %3900 = vmatmul.bf16.gmra.mxu0 %v6070_v24  ;;  %v4028_v44 = vadd.f32 %v3964_v51, %v3862_v59  ;;  %v10182_v24 = vld [vmem:[#allocation14_spill] sm:$0xff]  ;;  %v10183_v59 = vld [vmem:[#allocation12_spill] sm:$0xff] }
 0x556   : > { %v3372_v32 = vadd.f32 %v8885_v20, %v10182_v24  ;;  %v3370_v51 = vadd.f32 %v8877_v12, %v10183_v59  ;;  %v6139_v12 = vld [vmem:[%s10130_s8 + $0x10] sm:$0xf0]  ;;  %v10190_v24 = vld [vmem:[#allocation36_spill] sm:$0xff] }
 0x557   : > { %v4092_v23 = vmax.f32 %v4028_v44, 0.0 }
 0x558   : > { %v3541_v19 = vadd.f32 %v8840_v30, %v3372_v32  ;;  %v10187_v30 = vld [vmem:[#allocation31_spill] sm:$0xff] }
 0x55a   : > { %v3863_v34 = vpop.f32.mrf.mxu0  ;;  %v3710_v56 = vadd.f32 %v8871_v49, %v3541_v19 }
 0x55b   : > { %v3864_v57 = vadd.f32 %v3863_v34, %v8777_v40  ;;  %v3544_v34 = vadd.f32 %v8873_v25, %v3375_v2  ;;  %v10186_v25 = vld [vmem:[#allocation8_spill] sm:$0xff]  ;;  %v3971_v2 = vld [vmem:[%s10129_s7 + $0x168] sm:$0xff] }
 0x55d   : > { %v4029_v33 = vadd.f32 %v3965_v55, %v3864_v57  ;;  %v10184_v55 = vld [vmem:[#allocation19_spill] sm:$0xff] }
 0x55e   : > { %v3377_v44 = vadd.f32 %v8913_v4, %v10184_v55  ;;  %v3539_v4 = vadd.f32 %v8816_v61, %v3370_v51  ;;  %v6462_v61 = vld [vmem:[%s10130_s8 + $0xc] sm:$0xf0]  ;;  %v10191_v51 = vld [vmem:[#allocation35_spill] sm:$0xff] }
 0x55f   : > { %v4093_v13 = vmax.f32 %v4029_v33, 0.0  ;;  %v10185_v33 = vld [vmem:[#allocation10_spill] sm:$0xff] }
 0x560   : > { %v3367_v38 = vadd.f32 %v8847_v10, %v10185_v33  ;;  %v3546_v10 = vadd.f32 %v8891_v39, %v3377_v44 }
 0x561   : > { %v9147_v43 = vpack.c.bf16 %v4093_v13, %v4092_v23  ;;  %v6460_v23 = vld [vmem:[%s10130_s8 + $0x4] sm:$0xf]  ;;  %v3365_v13 = vadd.f32 %v8837_v41, %v10186_v25  ;;  %v6137_v41 = vld [vmem:[%s10130_s8] sm:$0xf] }
 0x562   : > { %v3866_v42 = vpop.f32.mrf.mxu0  ;;  %v6142_v20 = vor.u32 %v6460_v23, %v6139_v12  ;;  %v3536_v16 = vadd.f32 %v8791_v5, %v3367_v38  ;;  %v6138_v39 = vor.u32 %v6462_v61, %v6137_v41  ;;  %v3708_v5 = vadd.f32 %v8845_v46, %v3539_v4  ;;  %v3969_v38 = vld [vmem:[%s10129_s7 + $0x158] sm:$0xff] }
 0x563   : > { %v9150_v17 = vadd.f32 %v3866_v42, %v8794_v1  ;;  %v6421_v1 = vld [vmem:[%s10127_s5 + $0x3cc] sm:$0xf]  ;;  %v3362_v42 = vadd.f32 %v8801_v3, %v10187_v30  ;;  %v3534_v3 = vadd.f32 %v8751_v60, %v3365_v13  ;;  %v3968_v13 = vld [vmem:[%s10129_s7 + $0x150] sm:$0xff] }
 0x564   : > { %v6118_v9 = vor.u32 %v6421_v1, %v6115_v58  ;;  %4415 = vmatmul.bf16.vlgmr.msra.gmra.mxu2 %v6142_v20  ;;  %v10188_v1 = vld [vmem:[#allocation37_spill] sm:$0xff]  ;;  %4366 = vmatmul.bf16.vlgmr.msra.gmra.mxu1 %v6138_v39  ;;  %v3705_v32 = vadd.f32 %v10190_v24, %v3536_v16  ;;  %v10193_v20 = vld [vmem:[#allocation23_spill] sm:$0xff] }
 0x565   : > { %3905 = vmatmul.bf16.gmra.mxu0 %v6086_v53  ;;  %v3713_v53 = vadd.f32 %v8883_v6, %v3544_v34  ;;  %v3972_v6 = vld [vmem:[%s10129_s7 + $0x170] sm:$0xff]  ;;  %v3715_v49 = vadd.f32 %v10188_v1, %v3546_v10  ;;  %v3703_v34 = vadd.f32 %v10191_v51, %v3534_v3  ;;  %v3382_v25 = vadd.f32 %v8936_v15, %v10193_v20  ;;  %v3967_v30 = vld [vmem:[%s10129_s7 + $0x148] sm:$0xff]  ;;  %v6464_v15 = vld [vmem:[%s10130_s8 + $0x24] sm:$0xf] }
 0x566   : > { %v6153_v1 = vld [vmem:[%s10130_s8 + $0x20] sm:$0xf]  ;;  %v10194_v51 = vld [vmem:[#allocation25_spill] sm:$0xff] }
 0x567   : > { %v3551_v61 = vadd.f32 %v8925_v22, %v3382_v25  ;;  %v3974_v22 = vld [vmem:[%s10129_s7 + $0x180] sm:$0xff]  ;;  %v6145_v20 = vld [vmem:[%s10130_s8 + $0x8] sm:$0xf]  ;;  %v6463_v25 = vld [vmem:[%s10130_s8 + $0x14] sm:$0xf0] }
 0x56a   : > { %v9152_v40 = vpop.f32.mrf.mxu0 }
 0x572   : > { %v3871_v18 = vpop.f32.mrf.mxu0 }
 0x573   : > { %v3872_v19 = vadd.f32 %v3871_v18, %v3703_v34 }
 0x575   : > { %3910 = vmatmul.bf16.gmra.mxu0 %v6102_v11 }
 0x57a   : > { %v3873_v8 = vpop.f32.mrf.mxu0 }
 0x57b   : > { %v3874_v55 = vadd.f32 %v3873_v8, %v3705_v32 }
 0x57d   : > { %v4033_v4 = vadd.f32 %v3969_v38, %v3874_v55 }
 0x57f   : > { %v4097_v39 = vmax.f32 %v4033_v4, 0.0 }
 0x582   : > { %v3876_v14 = vpop.f32.mrf.mxu0 }
 0x583   : > { %v3877_v60 = vadd.f32 %v3876_v14, %v3708_v5 }
 0x585   : > { %3915 = vmatmul.bf16.gmra.mxu0 %v6118_v9  ;;  %v10189_v9 = vld [vmem:[#allocation33_spill] sm:$0xff] }
 0x586   : > { %v3531_v50 = vadd.f32 %v10189_v9, %v3362_v42  ;;  %v4032_v42 = vadd.f32 %v3968_v13, %v3872_v19  ;;  %v3720_v9 = vadd.f32 %v8927_v29, %v3551_v61  ;;  %v3387_v29 = vadd.f32 %v8965_v54, %v10194_v51  ;;  %v6470_v54 = vld [vmem:[%s10130_s8 + $0x4c] sm:$0xf0]  ;;  %v3978_v61 = vld [vmem:[%s10129_s7 + $0x1a0] sm:$0xff] }
 0x588   : > { %v4096_v5 = vmax.f32 %v4032_v42, 0.0  ;;  %v3556_v38 = vadd.f32 %v8955_v45, %v3387_v29  ;;  %v3977_v45 = vld [vmem:[%s10129_s7 + $0x198] sm:$0xff] }
 0x58a   : > { %v3878_v36 = vpop.f32.mrf.mxu0 }
 0x58b   : > { %v3879_v58 = vadd.f32 %v3878_v36, %v3710_v56  ;;  %v3970_v36 = vld [vmem:[%s10129_s7 + $0x160] sm:$0xff] }
 0x58c   : > { %v4034_v23 = vadd.f32 %v3970_v36, %v3877_v60 }
 0x58d   : > { %v4035_v44 = vadd.f32 %v3971_v2, %v3879_v58  ;;  %v4171_v2 = vpack.c.bf16 %v4097_v39, %v4096_v5 }
 0x58e   : > { %v4098_v16 = vmax.f32 %v4034_v23, 0.0  ;;  %v3725_v23 = vadd.f32 %v8957_v62, %v3556_v38  ;;  %v3396_v62 = vpop.f32.mrf.mxu1 }
 0x592   : > { %v3881_v57 = vpop.f32.mrf.mxu0 }
 0x593   : > { %v3882_v11 = vadd.f32 %v3881_v57, %v3713_v53  ;;  %v10192_v57 = vld [vmem:[#allocation34_spill] sm:$0xff]  ;;  %v4099_v53 = vmax.f32 %v4035_v44, 0.0 }
 0x594   : > { %v3700_v33 = vadd.f32 %v10192_v57, %v3531_v50  ;;  %v6171_v57 = vld [vmem:[%s10130_s8 + $0x50] sm:$0xf0] }
 0x595   : > { %3920 = vmatmul.bf16.gmra.mxu0 %v6134_v63  ;;  %v4036_v59 = vadd.f32 %v3972_v6, %v3882_v11  ;;  %v3966_v11 = vld [vmem:[%s10129_s7 + $0x140] sm:$0xff]  ;;  %v4172_v3 = vpack.c.bf16 %v4099_v53, %v4098_v16 }
 0x596   : > { %v3869_v8 = vadd.f32 %v9152_v40, %v3700_v33  ;;  %v6155_v40 = vld [vmem:[%s10130_s8 + $0x30] sm:$0xf0] }
 0x597   : > { %v4100_v14 = vmax.f32 %v4036_v59, 0.0  ;;  %v6158_v41 = vor.u32 %v6464_v15, %v6155_v40  ;;  %v6187_v15 = vld [vmem:[%s10130_s8 + $0x70] sm:$0xf0] }
 0x598   : > { %v4031_v6 = vadd.f32 %v3967_v30, %v3869_v8  ;;  %v6146_v8 = vor.u32 %v6463_v25, %v6145_v20 }
 0x599   : > { %4420 = vmatmul.bf16.gmra.mxu2 %v6158_v41  ;;  %v3399_v41 = vpop.f32.mrf.mxu1 }
 0x59a   : > { %v3883_v35 = vpop.f32.mrf.mxu0  ;;  %v4095_v50 = vmax.f32 %v4031_v6, 0.0 }
 0x59b   : > { %v3884_v46 = vadd.f32 %v3883_v35, %v3715_v49  ;;  %v6466_v49 = vld [vmem:[%s10130_s8 + $0x2c] sm:$0xf0]  ;;  %v3975_v35 = vld [vmem:[%s10129_s7 + $0x188] sm:$0xff] }
 0x59c   : > { %v6154_v58 = vor.u32 %v6466_v49, %v6153_v1  ;;  %v6161_v1 = vld [vmem:[%s10130_s8 + $0x28] sm:$0xf]  ;;  %v6467_v49 = vld [vmem:[%s10130_s8 + $0x34] sm:$0xf0] }
 0x59d   : > { %v4037_v63 = vadd.f32 %v3973_v26, %v3884_v46 }
 0x59e   : > { %4371 = vmatmul.bf16.gmra.mxu1 %v6154_v58 }
 0x59f   : > { %v4101_v12 = vmax.f32 %v4037_v63, 0.0  ;;  %v6468_v63 = vld [vmem:[%s10130_s8 + $0x44] sm:$0xf] }
 0x5a0   : > { %v6174_v33 = vor.u32 %v6468_v63, %v6171_v57 }
 0x5a1   : > { %v4173_v10 = vpack.c.bf16 %v4101_v12, %v4100_v14 }
 0x5a2   : > { %v3886_v18 = vpop.f32.mrf.mxu0 }
 0x5a3   : > { %v3887_v56 = vadd.f32 %v3886_v18, %v8931_v0  ;;  %4456 = vmatpush.bf16.msra.mxu3 %v4173_v10  ;;  %v4030_v0 = vadd.f32 %v3966_v11, %v9150_v17  ;;  %v10195_v10 = vld [vmem:[#allocation15_spill] sm:$0xff]  ;;  %v3734_v11 = vpop.f32.mrf.mxu3 }
 0x5a4   : > { %v3392_v30 = vadd.f32 %v8992_v52, %v10195_v10  ;;  %v6185_v52 = vld [vmem:[%s10130_s8 + $0x60] sm:$0xf] }
 0x5a5   : > { %v4094_v26 = vmax.f32 %v4030_v0, 0.0  ;;  %v4038_v24 = vadd.f32 %v3974_v22, %v3887_v56  ;;  %v6472_v56 = vld [vmem:[%s10130_s8 + $0x64] sm:$0xf] }
 0x5a6   : > { %v6190_v40 = vor.u32 %v6472_v56, %v6187_v15 }
 0x5a7   : > { %4457 = vmatpush.bf16.msra.mxu3 %v4172_v3  ;;  %v4170_v59 = vpack.c.bf16 %v4095_v50, %v4094_v26  ;;  %v4102_v46 = vmax.f32 %v4038_v24, 0.0  ;;  %v9330_v24 = vpop.f32.mrf.mxu1 }
 0x5a9   : > { %4425 = vmatmul.bf16.gmra.mxu2 %v6174_v33  ;;  %v10197_v33 = vld [vmem:[#allocation9_spill] sm:$0xff] }
 0x5aa   : > { %v3888_v17 = vpop.f32.mrf.mxu0  ;;  %v3400_v38 = vadd.f32 %v3399_v41, %v10197_v33  ;;  %v6193_v41 = vld [vmem:[%s10130_s8 + $0x68] sm:$0xf] }
 0x5ab   : > { %v3889_v32 = vadd.f32 %v3888_v17, %v3720_v9  ;;  %4458 = vmatpush.bf16.msra.mxu3 %v4171_v2  ;;  %v6162_v9 = vor.u32 %v6467_v49, %v6161_v1  ;;  %v3737_v2 = vpop.f32.mrf.mxu3  ;;  %v10196_v17 = vld [vmem:[#allocation20_spill] sm:$0xff] }
 0x5ad   : > { %v4039_v60 = vadd.f32 %v3975_v35, %v3889_v32  ;;  %v3397_v35 = vadd.f32 %v3396_v62, %v10196_v17  ;;  %v6209_v17 = vld [vmem:[%s10130_s8 + $0x88] sm:$0xf] }
 0x5af   : > { %v4103_v36 = vmax.f32 %v4039_v60, 0.0  ;;  %4459 = vmatpush.bf16.msra.mxu3 %v4170_v59  ;;  %v6476_v59 = vld [vmem:[%s10130_s8 + $0x84] sm:$0xf] }
 0x5b1   : > { %v9263_v34 = vpack.c.bf16 %v4103_v36, %v4102_v46  ;;  %v6203_v46 = vld [vmem:[%s10130_s8 + $0x90] sm:$0xf0] }
 0x5b2   : > { %v3891_v55 = vpop.f32.mrf.mxu0  ;;  %v6206_v36 = vor.u32 %v6476_v59, %v6203_v46 }
 0x5b3   : > { %v3892_v44 = vadd.f32 %v3891_v55, %v8959_v47  ;;  %4460 = vmatpush.bf16.msra.mxu3 %v9147_v43  ;;  %v6169_v47 = vld [vmem:[%s10130_s8 + $0x40] sm:$0xf]  ;;  %v3976_v43 = vld [vmem:[%s10129_s7 + $0x190] sm:$0xff] }
 0x5b4   : > { %v6170_v19 = vor.u32 %v6470_v54, %v6169_v47  ;;  %v6201_v55 = vld [vmem:[%s10130_s8 + $0x80] sm:$0xf]  ;;  %v9351_v47 = vpop.f32.mrf.mxu3 }
 0x5b6   : > { %4376 = vmatmul.bf16.gmra.mxu1 %v6170_v19 }
 0x5b7   : > { %4461 = vmatpush.bf16.msra.mxu3 %v9131_v27  ;;  %v4040_v27 = vadd.f32 %v3976_v43, %v3892_v44  ;;  %v3980_v44 = vld [vmem:[%s10129_s7 + $0x1b0] sm:$0xff]  ;;  %v3981_v43 = vld [vmem:[%s10129_s7 + $0x1b8] sm:$0xff] }
 0x5b9   : > { %v4104_v4 = vmax.f32 %v4040_v27, 0.0  ;;  %4430 = vmatmul.bf16.gmra.mxu2 %v6190_v40  ;;  %v9362_v27 = vpop.f32.mrf.mxu1  ;;  %v6217_v40 = vld [vmem:[%s10130_s8 + $0xa0] sm:$0xf] }
 0x5ba   : > { %v3893_v14 = vpop.f32.mrf.mxu0 }
 0x5bb   : > { %v3894_v12 = vadd.f32 %v3893_v14, %v3725_v23  ;;  %4462 = vmatpush.bf16.msra.mxu3 %v9115_v21  ;;  %v3565_v21 = vpop.f32.mrf.mxu2  ;;  %v6177_v14 = vld [vmem:[%s10130_s8 + $0x48] sm:$0xf] }
 0x5bc   : > { %v3566_v51 = vadd.f32 %v3565_v21, %v3397_v35  ;;  %v6480_v21 = vld [vmem:[%s10130_s8 + $0xa4] sm:$0xf]  ;;  %v6479_v35 = vld [vmem:[%s10130_s8 + $0x94] sm:$0xf0] }
 0x5bd   : > { %v4041_v13 = vadd.f32 %v3977_v45, %v3894_v12  ;;  %v6471_v45 = vld [vmem:[%s10130_s8 + $0x54] sm:$0xf0] }
 0x5be   : > { %v3735_v57 = vadd.f32 %v3734_v11, %v3566_v51  ;;  %v6178_v25 = vor.u32 %v6471_v45, %v6177_v14  ;;  %v6251_v51 = vld [vmem:[%s10130_s8 + $0xf0] sm:$0xf0] }
 0x5bf   : > { %v4105_v53 = vmax.f32 %v4041_v13, 0.0  ;;  %4463 = vmatpush.bf16.msra.mxu3 %v9095_v37  ;;  %v3561_v37 = vadd.f32 %v8985_v28, %v3392_v30  ;;  %v3979_v28 = vld [vmem:[%s10129_s7 + $0x1a8] sm:$0xff] }
 0x5c1   : > { %v9298_v18 = vpack.c.bf16 %v4105_v53, %v4104_v4  ;;  %v3730_v39 = vadd.f32 %v8990_v48, %v3561_v37  ;;  %v3406_v15 = vpop.f32.mrf.mxu1  ;;  %v6482_v37 = vld [vmem:[%s10130_s8 + $0xac] sm:$0xf0] }
 0x5c2   : > { %v3896_v42 = vpop.f32.mrf.mxu0  ;;  %4464 = vmatmul.bf16.vlgmr.msra.gmra.mxu3 %v6146_v8  ;;  %v6218_v11 = vor.u32 %v6482_v37, %v6217_v40  ;;  %v10202_v40 = vld [vmem:[#allocation16_spill] sm:$0xff] }
 0x5c3   : > { %v3897_v16 = vadd.f32 %v3896_v42, %v8983_v7  ;;  %v6474_v7 = vld [vmem:[%s10130_s8 + $0x6c] sm:$0xf0]  ;;  %v3568_v22 = vpop.f32.mrf.mxu2  ;;  %v6219_v42 = vld [vmem:[%s10130_s8 + $0xb0] sm:$0xf0]  ;;  %v3407_v37 = vadd.f32 %v3406_v15, %v10202_v40 }
 0x5c4   : > { %v6186_v6 = vor.u32 %v6474_v7, %v6185_v52  ;;  %v3569_v12 = vadd.f32 %v3568_v22, %v3400_v38  ;;  %v6222_v56 = vor.u32 %v6480_v21, %v6219_v42  ;;  %v6233_v22 = vld [vmem:[%s10130_s8 + $0xc0] sm:$0xf] }
 0x5c5   : > { %v4042_v0 = vadd.f32 %v3978_v61, %v3897_v16  ;;  %v9376_v16 = vpop.f32.mrf.mxu3  ;;  %v6475_v61 = vld [vmem:[%s10130_s8 + $0x74] sm:$0xf0] }
 0x5c6   : > { %4381 = vmatmul.bf16.gmra.mxu1 %v6186_v6  ;;  %v3738_v4 = vadd.f32 %v3737_v2, %v3569_v12 }
 0x5c7   : > { %v4106_v48 = vmax.f32 %v4042_v0, 0.0  ;;  %v6484_v0 = vld [vmem:[%s10130_s8 + $0xc4] sm:$0xf] }
 0x5c9   : > { %4435 = vmatmul.bf16.gmra.mxu2 %v6206_v36  ;;  %v6488_v36 = vld [vmem:[%s10130_s8 + $0xe4] sm:$0xf] }
 0x5ca   : > { %v3898_v3 = vpop.f32.mrf.mxu0 }
 0x5cb   : > { %v3899_v5 = vadd.f32 %v3898_v3, %v3730_v39  ;;  %v9339_v29 = vpop.f32.mrf.mxu2  ;;  %v6194_v39 = vor.u32 %v6475_v61, %v6193_v41  ;;  %v3409_v3 = vpop.f32.mrf.mxu1  ;;  %v10203_v41 = vld [vmem:[#allocation13_spill] sm:$0xff] }
 0x5cc   : > { %v3405_v61 = vadd.f32 %v9362_v27, %v10203_v41 }
 0x5cd   : > { %v4043_v58 = vadd.f32 %v3979_v28, %v3899_v5  ;;  %v9392_v6 = vpop.f32.mrf.mxu3  ;;  %v6235_v5 = vld [vmem:[%s10130_s8 + $0xd0] sm:$0xf0] }
 0x5ce   : > { %v6238_v49 = vor.u32 %v6484_v0, %v6235_v5 }
 0x5cf   : > { %v4107_v50 = vmax.f32 %v4043_v58, 0.0  ;;  %v6486_v58 = vld [vmem:[%s10130_s8 + $0xcc] sm:$0xf0] }
 0x5d1   : > { %v9328_v26 = vpack.c.bf16 %v4107_v50, %v4106_v48  ;;  %v6234_v48 = vor.u32 %v6486_v58, %v6233_v22 }
 0x5d2   : > { %v3901_v32 = vpop.f32.mrf.mxu0  ;;  %4469 = vmatmul.bf16.gmra.mxu3 %v6162_v9 }
 0x5d3   : > { %v3902_v60 = vadd.f32 %v3901_v32, %v9008_v31  ;;  %v6478_v31 = vld [vmem:[%s10130_s8 + $0x8c] sm:$0xf0]  ;;  %v9364_v8 = vpop.f32.mrf.mxu2  ;;  %v3411_v50 = vpop.f32.mrf.mxu1 }
 0x5d4   : > { %v6202_v63 = vor.u32 %v6478_v31, %v6201_v55  ;;  %v6254_v31 = vor.u32 %v6488_v36, %v6251_v51  ;;  %v3574_v15 = vadd.f32 %v9364_v8, %v3405_v61  ;;  %v6241_v8 = vld [vmem:[%s10130_s8 + $0xc8] sm:$0xf] }
 0x5d5   : > { %v4044_v19 = vadd.f32 %v3980_v44, %v3902_v60  ;;  %v3747_v9 = vpop.f32.mrf.mxu3  ;;  %v6210_v60 = vor.u32 %v6479_v35, %v6209_v17  ;;  %v6249_v44 = vld [vmem:[%s10130_s8 + $0xe0] sm:$0xf]  ;;  %v3988_v17 = vld [vmem:[%s10129_s7 + $0x1f0] sm:$0xff] }
 0x5d6   : > { %4386 = vmatmul.bf16.gmra.mxu1 %v6202_v63  ;;  %v6490_v63 = vld [vmem:[%s10130_s8 + $0xec] sm:$0xf0] }
 0x5d7   : > { %v4108_v13 = vmax.f32 %v4044_v19, 0.0  ;;  %v6250_v33 = vor.u32 %v6490_v63, %v6249_v44 }
 0x5d9   : > { %4440 = vmatmul.bf16.gmra.mxu2 %v6222_v56 }
 0x5da   : > { %v3903_v54 = vpop.f32.mrf.mxu0 }
 0x5db   : > { %v3904_v23 = vadd.f32 %v3903_v54, %v3735_v57  ;;  %v3575_v52 = vpop.f32.mrf.mxu2  ;;  %v3414_v55 = vpop.f32.mrf.mxu1  ;;  %v6225_v54 = vld [vmem:[%s10130_s8 + $0xa8] sm:$0xf] }
 0x5dd   : > { %v4045_v20 = vadd.f32 %v3981_v43, %v3904_v23  ;;  %v3749_v59 = vpop.f32.mrf.mxu3  ;;  %v6483_v43 = vld [vmem:[%s10130_s8 + $0xb4] sm:$0xf0]  ;;  %v10198_v23 = vld [vmem:[#allocation22_spill] sm:$0xff] }
 0x5de   : > { %v3415_v14 = vadd.f32 %v3414_v55, %v10198_v23  ;;  %v6226_v12 = vor.u32 %v6483_v43, %v6225_v54  ;;  %v3984_v23 = vld [vmem:[%s10129_s7 + $0x1d0] sm:$0xff] }
 0x5df   : > { %v4109_v62 = vmax.f32 %v4045_v20, 0.0  ;;  %v10199_v20 = vld [vmem:[#allocation21_spill] sm:$0xff] }
 0x5e1   : > { %v9366_v53 = vpack.c.bf16 %v4109_v62, %v4108_v13  ;;  %v10200_v13 = vld [vmem:[#allocation18_spill] sm:$0xff] }
 0x5e2   : > { %v3906_v10 = vpop.f32.mrf.mxu0  ;;  %4474 = vmatmul.bf16.gmra.mxu3 %v6178_v25  ;;  %v3412_v25 = vadd.f32 %v3411_v50, %v10199_v20  ;;  %v3410_v62 = vadd.f32 %v3409_v3, %v10200_v13  ;;  %v3576_v3 = vadd.f32 %v3575_v52, %v3407_v37  ;;  %v3989_v52 = vld [vmem:[%s10129_s7 + $0x1f8] sm:$0xff]  ;;  %v6257_v37 = vld [vmem:[%s10130_s8 + $0xe8] sm:$0xf] }
 0x5e3   : > { %v9368_v30 = vadd.f32 %v3906_v10, %v3738_v4  ;;  %v3578_v1 = vpop.f32.mrf.mxu2  ;;  %v3416_v45 = vpop.f32.mrf.mxu1  ;;  %v10201_v10 = vld [vmem:[#allocation24_spill] sm:$0xff] }
 0x5e4   : > { %v3417_v21 = vadd.f32 %v3416_v45, %v10201_v10 }
 0x5e5   : > { %v3752_v19 = vpop.f32.mrf.mxu3 }
 0x5e6   : > { %4391 = vmatmul.bf16.gmra.mxu1 %v6218_v11 }
 0x5e9   : > { %4445 = vmatmul.bf16.gmra.mxu2 %v6238_v49  ;;  %v10204_v49 = vld [vmem:[#allocation11_spill] sm:$0xff] }
 0x5ea   : > { %v9384_v7 = vpop.f32.mrf.mxu0  ;;  %v3402_v22 = vadd.f32 %v9330_v24, %v10204_v49 }
 0x5eb   : > { %v3580_v32 = vpop.f32.mrf.mxu2 }
 0x5ec   : > { %v3581_v11 = vadd.f32 %v3580_v32, %v3412_v25  ;;  %v3571_v27 = vadd.f32 %v9339_v29, %v3402_v22  ;;  %v6487_v29 = vld [vmem:[%s10130_s8 + $0xd4] sm:$0xf0]  ;;  %v3982_v25 = vld [vmem:[%s10129_s7 + $0x1c0] sm:$0xff] }
 0x5ed   : > { %v3754_v58 = vpop.f32.mrf.mxu3 }
 0x5f2   : > { %v9394_v28 = vpop.f32.mrf.mxu0  ;;  %4479 = vmatmul.bf16.gmra.mxu3 %v6194_v39  ;;  %v3579_v39 = vadd.f32 %v3578_v1, %v3410_v62  ;;  %v3987_v1 = vld [vmem:[%s10129_s7 + $0x1e8] sm:$0xff] }
 0x5f3   : > { %v3583_v57 = vpop.f32.mrf.mxu2 }
 0x5f4   : > { %v3584_v4 = vadd.f32 %v3583_v57, %v3415_v14  ;;  %v3748_v35 = vadd.f32 %v3747_v9, %v3579_v39  ;;  %v3986_v9 = vld [vmem:[%s10129_s7 + $0x1e0] sm:$0xff]  ;;  %v3985_v57 = vld [vmem:[%s10129_s7 + $0x1d8] sm:$0xff]  ;;  %v6461_v39 = vld [vmem:[%s10130_s8 + $0xc] sm:$0xf] }
 0x5f6   : > { %4396 = vmatmul.bf16.gmra.mxu1 %v6234_v48  ;;  %v3753_v0 = vadd.f32 %v3752_v19, %v3584_v4  ;;  %v3750_v48 = vadd.f32 %v3749_v59, %v3581_v11  ;;  %v3745_v59 = vadd.f32 %v9392_v6, %v3576_v3  ;;  %v4046_v4 = vadd.f32 %v3982_v25, %v9368_v30  ;;  %v6491_v11 = vld [vmem:[%s10130_s8 + $0xf4] sm:$0xf0]  ;;  %v6179_v3 = vld [vmem:[%s10130_s8 + $0x58] sm:$0xf0] }
 0x5f7   : > { %v6258_v61 = vor.u32 %v6491_v11, %v6257_v37 }
 0x5f9   : > { %4450 = vmatmul.bf16.gmra.mxu2 %v6254_v31  ;;  %v3743_v31 = vadd.f32 %v9376_v16, %v3574_v15  ;;  %v6473_v15 = vld [vmem:[%s10130_s8 + $0x6c] sm:$0xf] }
 0x5fa   : > { %v3913_v2 = vpop.f32.mrf.mxu0 }
 0x5fb   : > { %v3585_v42 = vpop.f32.mrf.mxu2  ;;  %v3914_v44 = vadd.f32 %v3913_v2, %v3745_v59 }
 0x5fc   : > { %v3586_v5 = vadd.f32 %v3585_v42, %v3417_v21 }
 0x5fd   : > { %v4049_v2 = vadd.f32 %v3985_v57, %v3914_v44 }
 0x5fe   : > { %v3755_v32 = vadd.f32 %v3754_v58, %v3586_v5 }
 0x5ff   : > { %v4113_v62 = vmax.f32 %v4049_v2, 0.0 }
 0x602   : > { %v3916_v46 = vpop.f32.mrf.mxu0  ;;  %4484 = vmatmul.bf16.gmra.mxu3 %v6210_v60 }
 0x603   : > { %v3917_v36 = vadd.f32 %v3916_v46, %v3748_v35  ;;  %v3740_v46 = vadd.f32 %v9351_v47, %v3571_v27  ;;  %v9472_v47 = vpop.f32.mrf.mxu1  ;;  %v6195_v35 = vld [vmem:[%s10130_s8 + $0x78] sm:$0xf0]  ;;  %v6477_v27 = vld [vmem:[%s10130_s8 + $0x8c] sm:$0xf]  ;;  %v4416_v44 = vpop.f32.mrf.mxu2 }
 0x605   : > { %v4050_v54 = vadd.f32 %v3986_v9, %v3917_v36  ;;  %v3909_v16 = vadd.f32 %v9384_v7, %v3740_v46  ;;  %v6481_v36 = vld [vmem:[%s10130_s8 + $0xac] sm:$0xf] }
 0x606   : > { %4401 = vmatmul.bf16.gmra.mxu1 %v6250_v33  ;;  %v6242_v33 = vor.u32 %v6487_v29, %v6241_v8  ;;  %v6485_v9 = vld [vmem:[%s10130_s8 + $0xcc] sm:$0xf] }
 0x607   : > { %v4114_v20 = vmax.f32 %v4050_v54, 0.0  ;;  %v4768_v54 = vld [vmem:[%s6889_s23] sm:$0xff] }
 0x60a   : > { %v3918_v38 = vpop.f32.mrf.mxu0 }
 0x60b   : > { %v3919_v60 = vadd.f32 %v3918_v38, %v3750_v48  ;;  %v3912_v38 = vadd.f32 %v9394_v28, %v3743_v31  ;;  %v9481_v40 = vpop.f32.mrf.mxu1  ;;  %v6243_v31 = vld [vmem:[%s10130_s8 + $0xd8] sm:$0xf0]  ;;  %v9559_v57 = vpop.f32.mrf.mxu2 }
 0x60d   : > { %v4051_v63 = vadd.f32 %v3987_v1, %v3919_v60  ;;  %v4048_v28 = vadd.f32 %v3984_v23, %v3912_v38  ;;  %v6211_v1 = vld [vmem:[%s10130_s8 + $0x98] sm:$0xf0]  ;;  %v4769_v38 = vld [vmem:[%s6889_s23 + $0x8] sm:$0xff]  ;;  %v4770_v23 = vld [vmem:[%s6889_s23 + $0x10] sm:$0xff] }
 0x60f   : > { %v4115_v14 = vmax.f32 %v4051_v63, 0.0  ;;  %v4112_v10 = vmax.f32 %v4048_v28, 0.0  ;;  %v4786_v28 = vadd.f32 1e-10, %v4770_v23 }
 0x611   : > { %v4180_v7 = vpack.c.bf16 %v4115_v14, %v4114_v20  ;;  %v4179_v42 = vpack.c.bf16 %v4113_v62, %v4112_v10  ;;  %v4784_v14 = vadd.f32 1e-10, %v4768_v54  ;;  %v4182_v62 = vld [vmem:[%s10131_s9] sm:$0xff] }
 0x612   : > { %v3921_v56 = vpop.f32.mrf.mxu0  ;;  %4489 = vmatmul.bf16.gmra.mxu3 %v6226_v12  ;;  %v3983_v12 = vld [vmem:[%s10129_s7 + $0x1c8] sm:$0xff] }
 0x613   : > { %v3922_v50 = vadd.f32 %v3921_v56, %v3753_v0  ;;  %v4047_v13 = vadd.f32 %v3983_v12, %v3909_v16  ;;  %v4110_v56 = vmax.f32 %v4046_v4, 0.0  ;;  %v6147_v0 = vld [vmem:[%s10130_s8 + $0x18] sm:$0xf0]  ;;  %v4785_v16 = vadd.f32 1e-10, %v4769_v38  ;;  %v4183_v38 = vld [vmem:[%s10131_s9 + $0x8] sm:$0xff] }
 0x614   : > { %v6150_v5 = vor.u32 %v6461_v39, %v6147_v0  ;;  %v4370_v23 = vadd.f32 %v9481_v40, %v4183_v38 }
 0x615   : > { %v4052_v51 = vadd.f32 %v3988_v17, %v3922_v50  ;;  %v4111_v21 = vmax.f32 %v4047_v13, 0.0  ;;  %6543 = vlog2.f32 %v4785_v16 }
 0x616   : > { %6545 = vlog2.f32 %v4784_v14 }
 0x617   : > { %v4116_v43 = vmax.f32 %v4052_v51, 0.0  ;;  %v4178_v41 = vpack.c.bf16 %v4111_v21, %v4110_v56  ;;  %v6227_v51 = vld [vmem:[%s10130_s8 + $0xb8] sm:$0xf0]  ;;  %6547 = vlog2.f32 %v4786_v28  ;;  %v4368_v56 = vadd.f32 %v9472_v47, %v4182_v62 }
 0x618   : > { %v4185_v28 = vld [vmem:[%s10131_s9 + $0x18] sm:$0xff] }
 0x61a   : > { %v3923_v24 = vpop.f32.mrf.mxu0 }
 0x61b   : > { %v3924_v55 = vadd.f32 %v3923_v24, %v3755_v32  ;;  %v9490_v30 = vpop.f32.mrf.mxu1  ;;  %v6198_v32 = vor.u32 %v6473_v15, %v6195_v35  ;;  %v6544_v4 = vpop.eup %6543 }
 0x61c   : > { %v4421_v20 = vpop.f32.mrf.mxu2  ;;  %v6546_v10 = vpop.eup %6545  ;;  %v4803_v11 = vmul.f32 0.6931472, %v6544_v4 }
 0x61d   : > { %v4053_v6 = vadd.f32 %v3989_v52, %v3924_v55  ;;  %v6214_v52 = vor.u32 %v6477_v27, %v6211_v1  ;;  %v6230_v55 = vor.u32 %v6481_v36, %v6227_v51  ;;  %v4801_v39 = vmul.f32 0.6931472, %v6546_v10 }
 0x61f   : > { %v4117_v19 = vmax.f32 %v4053_v6, 0.0  ;;  %v6246_v6 = vor.u32 %v6485_v9, %v6243_v31  ;;  %v4184_v9 = vld [vmem:[%s10131_s9 + $0x10] sm:$0xff] }
 0x621   : > { %v4181_v45 = vpack.c.bf16 %v4117_v19, %v4116_v43  ;;  %v6489_v43 = vld [vmem:[%s10130_s8 + $0xec] sm:$0xf]  ;;  %v6259_v19 = vld [vmem:[%s10130_s8 + $0xf8] sm:$0xf0] }
 0x622   : > { %4494 = vmatmul.bf16.gmra.mxu3 %v6242_v33  ;;  %v6262_v12 = vor.u32 %v6489_v43, %v6259_v19  ;;  %v4373_v43 = vadd.f32 %v9490_v30, %v4184_v9 }
 0x623   : > { %4505 = vmatpush.bf16.msrb.mxu1 %v4181_v45  ;;  %v9501_v49 = vpop.f32.mrf.mxu1  ;;  %v4771_v45 = vld [vmem:[%s6889_s23 + $0x18] sm:$0xff] }
 0x624   : > { %v4787_v25 = vadd.f32 1e-10, %v4771_v45 }
 0x626   : > { %6549 = vlog2.f32 %v4787_v25  ;;  %v4422_v25 = vadd.f32 %v4421_v20, %v4373_v43 }
 0x627   : > { %4506 = vmatpush.bf16.msrb.mxu1 %v4180_v7  ;;  %v4772_v7 = vld [vmem:[%s6889_s23 + $0x20] sm:$0xff] }
 0x628   : > { %v4788_v37 = vadd.f32 1e-10, %v4772_v7  ;;  %v4419_v7 = vadd.f32 %v9559_v57, %v4370_v23 }
 0x62a   : > { %6551 = vlog2.f32 %v4788_v37 }
 0x62b   : > { %4507 = vmatpush.bf16.msrb.mxu1 %v4179_v42  ;;  %v6548_v42 = vpop.eup %6547 }
 0x62c   : > { %v4805_v0 = vmul.f32 0.6931472, %v6548_v42  ;;  %v4775_v42 = vld [vmem:[%s6889_s23 + $0x38] sm:$0xff] }
 0x62e   : > { %v4834_v35 = vsub.f32 0.0, %v4805_v0 }
 0x62f   : > { %4508 = vmatpush.bf16.msrb.mxu1 %v4178_v41  ;;  %v9584_v41 = vpop.f32.mrf.mxu2 }
 0x630   : > { %v4850_v51 = vadd.f32 1e-10, %v4834_v35 }
 0x632   : > { %4499 = vmatmul.bf16.gmra.mxu3 %v6258_v61  ;;  %v6550_v61 = vpop.eup %6549 }
 0x633   : > { %4509 = vmatpush.bf16.msrb.mxu1 %v9366_v53  ;;  %v9503_v53 = vpop.f32.mrf.mxu1 }
 0x637   : > { %4510 = vmatpush.bf16.msrb.mxu1 %v9328_v26  ;;  %v6163_v26 = vld [vmem:[%s10130_s8 + $0x38] sm:$0xf0] }
 0x63b   : > { %4511 = vmatpush.bf16.msrb.mxu1 %v9298_v18  ;;  %v6465_v18 = vld [vmem:[%s10130_s8 + $0x2c] sm:$0xf]  ;;  %v9511_v58 = vpop.f32.mrf.mxu1 }
 0x63c   : > { %v6166_v22 = vor.u32 %v6465_v18, %v6163_v26  ;;  %v4417_v18 = vadd.f32 %v4416_v44, %v4368_v56  ;;  %v4833_v26 = vsub.f32 0.0, %v4803_v11  ;;  %v4375_v11 = vadd.f32 %v9501_v49, %v4185_v28  ;;  %v4186_v49 = vld [vmem:[%s10131_s9 + $0x20] sm:$0xff] }
 0x63e   : > { %v4849_v27 = vadd.f32 1e-10, %v4833_v26  ;;  %v4791_v26 = vadd.f32 1e-10, %v4775_v42  ;;  %v4424_v35 = vadd.f32 %v9584_v41, %v4375_v11 }
 0x63f   : > { %4512 = vmatpush.bf16.msrb.mxu1 %v9263_v34  ;;  %v6469_v34 = vld [vmem:[%s10130_s8 + $0x4c] sm:$0xf] }
 0x640   : > { %v6182_v50 = vor.u32 %v6469_v34, %v6179_v3  ;;  %v4773_v34 = vld [vmem:[%s6889_s23 + $0x28] sm:$0xff] }
 0x642   : > { %4513 = vmatmul.bf16.vlgmr.msrb.gmra.mxu1 %v6150_v5 }
 0x643   : > { %v9519_v48 = vpop.f32.mrf.mxu1 }
 0x645   : > { %v4465_v63 = vpop.f32.mrf.mxu3 }
 0x646   : > { %v4466_v3 = vadd.f32 %v4465_v63, %v4417_v18 }
 0x64b   : > { %v9521_v17 = vpop.f32.mrf.mxu1 }
 0x64d   : > { %v9561_v33 = vpop.f32.mrf.mxu3 }
 0x652   : > { %4518 = vmatmul.bf16.gmra.mxu1 %v6166_v22  ;;  %v4807_v22 = vmul.f32 0.6931472, %v6550_v61  ;;  %v4468_v61 = vadd.f32 %v9561_v33, %v4419_v7 }
 0x653   : > { %v9529_v60 = vpop.f32.mrf.mxu1 }
 0x654   : > { %v4835_v1 = vsub.f32 0.0, %v4807_v22 }
 0x655   : > { %v9575_v13 = vpop.f32.mrf.mxu3 }
 0x656   : > { %v4851_v31 = vadd.f32 1e-10, %v4835_v1  ;;  %v4471_v56 = vadd.f32 %v9575_v13, %v4422_v25  ;;  %v4776_v1 = vld [vmem:[%s6889_s23 + $0x40] sm:$0xff]  ;;  %v4187_v25 = vld [vmem:[%s10131_s9 + $0x28] sm:$0xff] }
 0x657   : > { %v4792_v43 = vadd.f32 1e-10, %v4776_v1 }
 0x65b   : > { %v9537_v24 = vpop.f32.mrf.mxu1 }
 0x65d   : > { %v9586_v5 = vpop.f32.mrf.mxu3 }
 0x662   : > { %4523 = vmatmul.bf16.gmra.mxu1 %v6182_v50  ;;  %v4832_v50 = vsub.f32 0.0, %v4801_v39 }
 0x663   : > { %v9539_v59 = vpop.f32.mrf.mxu1 }
 0x664   : > { %v4848_v36 = vadd.f32 1e-10, %v4832_v50 }
 0x665   : > { %v9596_v44 = vpop.f32.mrf.mxu3 }
 0x66b   : > { %v9547_v8 = vpop.f32.mrf.mxu1 }
 0x66d   : > { %v9614_v0 = vpop.f32.mrf.mxu3 }
 0x672   : > { %4528 = vmatmul.bf16.gmra.mxu1 %v6198_v32  ;;  %v4789_v32 = vadd.f32 1e-10, %v4773_v34 }
 0x673   : > { %v9549_v29 = vpop.f32.mrf.mxu1 }
 0x674   : > { %6553 = vlog2.f32 %v4789_v32 }
 0x675   : > { %6555 = vlog2.f32 %v4849_v27 }
 0x676   : > { %6557 = vlog2.f32 %v4848_v36  ;;  %v4473_v36 = vadd.f32 %v9586_v5, %v4424_v35 }
 0x677   : > { %6559 = vlog2.f32 %v4850_v51 }
 0x678   : > { %6561 = vlog2.f32 %v4851_v31  ;;  %v4378_v31 = vadd.f32 %v9503_v53, %v4186_v49 }
 0x67b   : > { %v9557_v46 = vpop.f32.mrf.mxu1 }
 0x682   : > { %4533 = vmatmul.bf16.gmra.mxu1 %v6214_v52  ;;  %v6552_v52 = vpop.eup %6551 }
 0x683   : > { %v9572_v2 = vpop.f32.mrf.mxu1  ;;  %v4809_v63 = vmul.f32 0.6931472, %v6552_v52  ;;  %v6554_v14 = vpop.eup %6553 }
 0x684   : > { %v6556_v45 = vpop.eup %6555  ;;  %v4811_v10 = vmul.f32 0.6931472, %v6554_v14 }
 0x685   : > { %v4836_v16 = vsub.f32 0.0, %v4809_v63  ;;  %v4867_v40 = vmul.f32 0.6931472, %v6556_v45 }
 0x686   : > { %v4837_v22 = vsub.f32 0.0, %v4811_v10 }
 0x687   : > { %v4852_v4 = vadd.f32 1e-10, %v4836_v16  ;;  %v4897_v13 = vsub.f32 0.0, %v4867_v40 }
 0x688   : > { %v4853_v32 = vadd.f32 1e-10, %v4837_v22 }
 0x68b   : > { %v9581_v21 = vpop.f32.mrf.mxu1 }
 0x692   : > { %4538 = vmatmul.bf16.gmra.mxu1 %v6230_v55  ;;  %v9591_v55 = vpop.f32.mrf.mxu2 }
 0x693   : > { %v4427_v28 = vadd.f32 %v9591_v55, %v4378_v31 }
 0x695   : > { %v4476_v42 = vadd.f32 %v9596_v44, %v4427_v28 }
 0x69a   : > { %v9608_v30 = vpop.f32.mrf.mxu2 }
 0x6a2   : > { %4543 = vmatmul.bf16.gmra.mxu1 %v6246_v6  ;;  %v4774_v6 = vld [vmem:[%s6889_s23 + $0x30] sm:$0xff] }
 0x6a3   : > { %v4790_v19 = vadd.f32 1e-10, %v4774_v6  ;;  %v9628_v6 = vpop.f32.mrf.mxu2 }
 0x6a5   : > { %6563 = vlog2.f32 %v4790_v19  ;;  %v9634_v19 = vpop.f32.mrf.mxu3 }
 0x6a6   : > { %6565 = vlog2.f32 %v4852_v4 }
 0x6a7   : > { %6567 = vlog2.f32 %v4791_v26 }
 0x6a8   : > { %6569 = vlog2.f32 %v4853_v32 }
 0x6a9   : > { %6571 = vlog2.f32 %v4792_v43 }
 0x6b2   : > { %4548 = vmatmul.bf16.gmra.mxu1 %v6262_v12  ;;  %v6558_v12 = vpop.eup %6557 }
 0x6b3   : > { %v6560_v62 = vpop.eup %6559  ;;  %v4865_v20 = vmul.f32 0.6931472, %v6558_v12 }
 0x6b4   : > { %v6562_v37 = vpop.eup %6561  ;;  %v4869_v57 = vmul.f32 0.6931472, %v6560_v62 }
 0x6b5   : > { %v6564_v34 = vpop.eup %6563  ;;  %v4871_v50 = vmul.f32 0.6931472, %v6562_v37  ;;  %v4896_v33 = vsub.f32 0.0, %v4865_v20  ;;  %v4777_v37 = vld [vmem:[%s6889_s23 + $0x48] sm:$0xff] }
 0x6b6   : > { %v4813_v27 = vmul.f32 0.6931472, %v6564_v34  ;;  %v6566_v9 = vpop.eup %6565 }
 0x6b7   : > { %v4899_v51 = vsub.f32 0.0, %v4871_v50  ;;  %v6568_v16 = vpop.eup %6567  ;;  %v4873_v45 = vmul.f32 0.6931472, %v6566_v9  ;;  %v4793_v50 = vadd.f32 1e-10, %v4777_v37  ;;  %v4482_v9 = vpop.f32.mrf.mxu3 }
 0x6b8   : > { %v4838_v23 = vsub.f32 0.0, %v4813_v27  ;;  %v6570_v20 = vpop.eup %6569 }
 0x6b9   : > { %v6572_v32 = vpop.eup %6571 }
 0x6ba   : > { %v4854_v40 = vadd.f32 1e-10, %v4838_v23  ;;  %v4817_v23 = vmul.f32 0.6931472, %v6572_v32 }
 0x6bc   : > { %6573 = vlog2.f32 %v4854_v40 }
 0x6bd   : > { %6575 = vlog2.f32 %v4793_v50 }
 0x6bf   : > { %v4514_v15 = vpop.f32.mrf.mxu1 }
 0x6c0   : > { %v9589_v47 = vadd.f32 %v4514_v15, %v4466_v3  ;;  %v4898_v15 = vsub.f32 0.0, %v4869_v57  ;;  %v4380_v57 = vadd.f32 %v9511_v58, %v4187_v25 }
 0x6c2   : > { %v4912_v38 = vadd.f32 %v4896_v33, %v9589_v47  ;;  %v4554_v12 = vsel %vm1757_vm3, %v9589_v47, -inf }
 0x6c4   : > { %v9647_v62 = vmul.f32 1.4285715, %v4912_v38  ;;  %v4188_v38 = vld [vmem:[%s10131_s9 + $0x30] sm:$0xff] }
 0x6c6   : > { %v4944_v44 = vsel %vm1757_vm3, %v9647_v62, -inf }
 0x6c7   : > { %v4516_v54 = vpop.f32.mrf.mxu1 }
 0x6c8   : > { %v9618_v3 = vadd.f32 %v4516_v54, %v4468_v61 }
 0x6ca   : > { %v4913_v52 = vadd.f32 %v4897_v13, %v9618_v3  ;;  %v4555_v5 = vsel %vm1757_vm3, %v9618_v3, -inf }
 0x6cb   : > { %v4559_v10 = vmax.f32 %v4554_v12, %v4555_v5  ;;  %v6574_v12 = vpop.eup %6573 }
 0x6cc   : > { %v9638_v53 = vmul.f32 1.4285715, %v4913_v52  ;;  %v4875_v52 = vmul.f32 0.6931472, %v6570_v20  ;;  %v6576_v40 = vpop.eup %6575  ;;  %v4877_v37 = vmul.f32 0.6931472, %v6574_v12 }
 0x6ce   : > { %v4945_v55 = vsel %vm1757_vm3, %v9638_v53, -inf }
 0x6cf   : > { %v4519_v39 = vpop.f32.mrf.mxu1  ;;  %v4949_v49 = vmax.f32 %v4944_v44, %v4945_v55 }
 0x6d0   : > { %v9616_v18 = vadd.f32 %v4519_v39, %v4471_v56  ;;  %v4815_v56 = vmul.f32 0.6931472, %v6568_v16  ;;  %v4900_v39 = vsub.f32 0.0, %v4873_v45  ;;  %v4778_v16 = vld [vmem:[%s6889_s23 + $0x50] sm:$0xff]  ;;  %v4901_v45 = vsub.f32 0.0, %v4875_v52 }
 0x6d2   : > { %v4914_v54 = vadd.f32 %v4898_v15, %v9616_v18  ;;  %v4556_v7 = vsel %vm1757_vm3, %v9616_v18, -inf  ;;  %v4433_v15 = vpop.f32.mrf.mxu2  ;;  %v4839_v35 = vsub.f32 0.0, %v4815_v56 }
 0x6d3   : > { %v4561_v26 = vmax.f32 %v4556_v7, %v4559_v10  ;;  %v4794_v10 = vadd.f32 1e-10, %v4778_v16 }
 0x6d4   : > { %v9651_v4 = vmul.f32 1.4285715, %v4914_v54  ;;  %v4855_v43 = vadd.f32 1e-10, %v4839_v35 }
 0x6d6   : > { %v4946_v34 = vsel %vm1757_vm3, %v9651_v4, -inf  ;;  %6577 = vlog2.f32 %v4855_v43 }
 0x6d7   : > { %v4521_v63 = vpop.f32.mrf.mxu1  ;;  %6579 = vlog2.f32 %v4794_v10 }
 0x6d8   : > { %v9632_v41 = vadd.f32 %v4521_v63, %v4473_v36  ;;  %v4951_v36 = vmax.f32 %v4946_v34, %v4949_v49  ;;  %v4429_v63 = vadd.f32 %v9608_v30, %v4380_v57  ;;  %v4383_v30 = vadd.f32 %v9519_v48, %v4188_v38  ;;  %v4779_v57 = vld [vmem:[%s6889_s23 + $0x58] sm:$0xff] }
 0x6d9   : > { %v4819_v48 = vmul.f32 0.6931472, %v6576_v40  ;;  %v4902_v34 = vsub.f32 0.0, %v4877_v37  ;;  %v4795_v35 = vadd.f32 1e-10, %v4779_v57 }
 0x6da   : > { %v4915_v14 = vadd.f32 %v4899_v51, %v9632_v41  ;;  %v4557_v11 = vsel %vm1757_vm3, %v9632_v41, -inf  ;;  %v4436_v55 = vpop.f32.mrf.mxu2 }
 0x6db   : > { %v4563_v33 = vmax.f32 %v4557_v11, %v4561_v26  ;;  %v4432_v11 = vadd.f32 %v9628_v6, %v4383_v30 }
 0x6dc   : > { %v9659_v61 = vmul.f32 1.4285715, %v4915_v14  ;;  %v4478_v14 = vadd.f32 %v9614_v0, %v4429_v63  ;;  %v4189_v0 = vld [vmem:[%s10131_s9 + $0x38] sm:$0xff]  ;;  %v6578_v50 = vpop.eup %6577 }
 0x6dd   : > { %v4481_v44 = vadd.f32 %v9634_v19, %v4432_v11  ;;  %v4385_v6 = vadd.f32 %v9521_v17, %v4189_v0 }
 0x6de   : > { %v4947_v58 = vsel %vm1757_vm3, %v9659_v61, -inf }
 0x6df   : > { %v4524_v22 = vpop.f32.mrf.mxu1  ;;  %v4953_v54 = vmax.f32 %v4947_v58, %v4951_v36  ;;  %v4841_v58 = vsub.f32 0.0, %v4819_v48  ;;  %v4879_v36 = vmul.f32 0.6931472, %v6578_v50  ;;  %v4434_v17 = vadd.f32 %v4433_v15, %v4385_v6 }
 0x6e0   : > { %v9666_v13 = vadd.f32 %v4524_v22, %v4476_v42  ;;  %v4840_v42 = vsub.f32 0.0, %v4817_v23 }
 0x6e1   : > { %v4857_v23 = vadd.f32 1e-10, %v4841_v58  ;;  %v4903_v12 = vsub.f32 0.0, %v4879_v36 }
 0x6e2   : > { %v4558_v27 = vsel %vm1757_vm3, %v9666_v13, -inf  ;;  %v4916_v1 = vadd.f32 %v4900_v39, %v9666_v13  ;;  %v4485_v39 = vpop.f32.mrf.mxu3  ;;  %v4856_v20 = vadd.f32 1e-10, %v4840_v42  ;;  %v4438_v43 = vpop.f32.mrf.mxu2 }
 0x6e3   : > { %v4565_v51 = vmax.f32 %v4558_v27, %v4563_v33  ;;  %v6580_v27 = vpop.eup %6579 }
 0x6e4   : > { %v9673_v31 = vmul.f32 1.4285715, %v4916_v1  ;;  %6581 = vlog2.f32 %v4856_v20  ;;  %v4821_v16 = vmul.f32 0.6931472, %v6580_v27 }
 0x6e5   : > { %6583 = vlog2.f32 %v4795_v35 }
 0x6e6   : > { %v4948_v5 = vsel %vm1757_vm3, %v9673_v31, -inf  ;;  %6585 = vlog2.f32 %v4857_v23 }
 0x6e7   : > { %v4955_v28 = vmax.f32 %v4948_v5, %v4953_v54  ;;  %v4526_v25 = vpop.f32.mrf.mxu1  ;;  %v4780_v5 = vld [vmem:[%s6889_s23 + $0x60] sm:$0xff] }
 0x6e8   : > { %v9684_v7 = vadd.f32 %v4526_v25, %v4478_v14 }
 0x6ea   : > { %v4917_v56 = vadd.f32 %v4901_v45, %v9684_v7  ;;  %v4560_v26 = vsel %vm1757_vm3, %v9684_v7, -inf  ;;  %v4483_v45 = vadd.f32 %v4482_v9, %v4434_v17  ;;  %v6582_v25 = vpop.eup %6581  ;;  %v4487_v15 = vpop.f32.mrf.mxu3  ;;  %v4191_v9 = vld [vmem:[%s10131_s9 + $0x48] sm:$0xff] }
 0x6eb   : > { %v4567_v32 = vmax.f32 %v4560_v26, %v4565_v51  ;;  %v4190_v51 = vld [vmem:[%s10131_s9 + $0x40] sm:$0xff]  ;;  %v6584_v37 = vpop.eup %6583  ;;  %v4881_v0 = vmul.f32 0.6931472, %v6582_v25  ;;  %v4781_v26 = vld [vmem:[%s6889_s23 + $0x68] sm:$0xff]  ;;  %v4441_v35 = vpop.f32.mrf.mxu2 }
 0x6ec   : > { %v9694_v22 = vmul.f32 1.4285715, %v4917_v56  ;;  %v4388_v42 = vadd.f32 %v9529_v60, %v4190_v51  ;;  %v4796_v56 = vadd.f32 1e-10, %v4780_v5  ;;  %v4823_v57 = vmul.f32 0.6931472, %v6584_v37 }
 0x6ed   : > { %v4904_v50 = vsub.f32 0.0, %v4881_v0  ;;  %v4797_v58 = vadd.f32 1e-10, %v4781_v26 }
 0x6ee   : > { %v4950_v1 = vsel %vm1757_vm3, %v9694_v22, -inf  ;;  %v4437_v20 = vadd.f32 %v4436_v55, %v4388_v42  ;;  %6587 = vlog2.f32 %v4796_v56  ;;  %v4390_v55 = vadd.f32 %v9537_v24, %v4191_v9 }
 0x6ef   : > { %v4529_v49 = vpop.f32.mrf.mxu1  ;;  %v4957_v54 = vmax.f32 %v4950_v1, %v4955_v28  ;;  %v4842_v28 = vsub.f32 0.0, %v4821_v16 }
 0x6f0   : > { %v9698_v33 = vadd.f32 %v4529_v49, %v4481_v44  ;;  %v6586_v49 = vpop.eup %6585  ;;  %v4439_v23 = vadd.f32 %v4438_v43, %v4390_v55 }
 0x6f1   : > { %v4858_v48 = vadd.f32 1e-10, %v4842_v28  ;;  %v4883_v51 = vmul.f32 0.6931472, %v6586_v49 }
 0x6f2   : > { %v4562_v52 = vsel %vm1757_vm3, %v9698_v33, -inf  ;;  %v4918_v19 = vadd.f32 %v4902_v34, %v9698_v33  ;;  %v4486_v34 = vadd.f32 %v4485_v39, %v4437_v20  ;;  %v4490_v1 = vpop.f32.mrf.mxu3  ;;  %v4488_v25 = vadd.f32 %v4487_v15, %v4439_v23 }
 0x6f3   : > { %v4569_v63 = vmax.f32 %v4562_v52, %v4567_v32  ;;  %6589 = vlog2.f32 %v4858_v48  ;;  %v4843_v52 = vsub.f32 0.0, %v4823_v57  ;;  %v4443_v0 = vpop.f32.mrf.mxu2 }
 0x6f4   : > { %v9705_v38 = vmul.f32 1.4285715, %v4918_v19  ;;  %v6588_v19 = vpop.eup %6587  ;;  %6591 = vlog2.f32 %v4797_v58 }
 0x6f5   : > { %v4859_v5 = vadd.f32 1e-10, %v4843_v52 }
 0x6f6   : > { %v4952_v14 = vsel %vm1757_vm3, %v9705_v38, -inf }
 0x6f7   : > { %v4959_v30 = vmax.f32 %v4952_v14, %v4957_v54  ;;  %v4531_v10 = vpop.f32.mrf.mxu1  ;;  %v4825_v14 = vmul.f32 0.6931472, %v6588_v19  ;;  %6593 = vlog2.f32 %v4859_v5 }
 0x6f8   : > { %v9714_v40 = vadd.f32 %v4531_v10, %v4483_v45  ;;  %v4782_v45 = vld [vmem:[%s6889_s23 + $0x70] sm:$0xff]  ;;  %v4905_v10 = vsub.f32 0.0, %v4883_v51 }
 0x6f9   : > { %v6590_v42 = vpop.eup %6589 }
 0x6fa   : > { %v4919_v11 = vadd.f32 %v4903_v12, %v9714_v40  ;;  %v4564_v60 = vsel %vm1757_vm3, %v9714_v40, -inf  ;;  %v6592_v20 = vpop.eup %6591  ;;  %v4885_v15 = vmul.f32 0.6931472, %v6590_v42  ;;  %v4492_v26 = vpop.f32.mrf.mxu3 }
 0x6fb   : > { %v4571_v27 = vmax.f32 %v4564_v60, %v4569_v63  ;;  %v4192_v63 = vld [vmem:[%s10131_s9 + $0x50] sm:$0xff]  ;;  %v4827_v49 = vmul.f32 0.6931472, %v6592_v20 }
 0x6fc   : > { %v9723_v44 = vmul.f32 1.4285715, %v4919_v11  ;;  %v4393_v37 = vadd.f32 %v9539_v59, %v4192_v63  ;;  %v4798_v11 = vadd.f32 1e-10, %v4782_v45  ;;  %v4193_v59 = vld [vmem:[%s10131_s9 + $0x58] sm:$0xff] }
 0x6fd   : > { %v6594_v52 = vpop.eup %6593  ;;  %v4845_v51 = vsub.f32 0.0, %v4827_v49  ;;  %v4195_v49 = vld [vmem:[%s10131_s9 + $0x68] sm:$0xff] }
 0x6fe   : > { %v4954_v36 = vsel %vm1757_vm3, %v9723_v44, -inf  ;;  %6595 = vlog2.f32 %v4798_v11 }
 0x6ff   : > { %v4534_v6 = vpop.f32.mrf.mxu1  ;;  %v4961_v16 = vmax.f32 %v4954_v36, %v4959_v30  ;;  %v4844_v30 = vsub.f32 0.0, %v4825_v14 }
 0x700   : > { %v9726_v32 = vadd.f32 %v4534_v6, %v4486_v34  ;;  %v4442_v34 = vadd.f32 %v4441_v35, %v4393_v37  ;;  %v4783_v6 = vld [vmem:[%s6889_s23 + $0x78] sm:$0xff] }
 0x701   : > { %v4799_v35 = vadd.f32 1e-10, %v4783_v6 }
 0x702   : > { %v4566_v39 = vsel %vm1757_vm3, %v9726_v32, -inf  ;;  %v4920_v17 = vadd.f32 %v4904_v50, %v9726_v32  ;;  %v4860_v50 = vadd.f32 1e-10, %v4844_v30  ;;  %v4491_v58 = vadd.f32 %v4490_v1, %v4442_v34  ;;  %v4446_v1 = vpop.f32.mrf.mxu2 }
 0x703   : > { %v4573_v54 = vmax.f32 %v4566_v39, %v4571_v27  ;;  %v4906_v27 = vsub.f32 0.0, %v4885_v15  ;;  %v4395_v39 = vadd.f32 %v9547_v8, %v4193_v59  ;;  %v4194_v8 = vld [vmem:[%s10131_s9 + $0x60] sm:$0xff] }
 0x704   : > { %v9733_v24 = vmul.f32 1.4285715, %v4920_v17  ;;  %6597 = vlog2.f32 %v4860_v50  ;;  %v4398_v20 = vadd.f32 %v9549_v29, %v4194_v8 }
 0x705   : > { %v4444_v45 = vadd.f32 %v4443_v0, %v4395_v39  ;;  %6599 = vlog2.f32 %v4799_v35 }
 0x706   : > { %v4956_v12 = vsel %vm1757_vm3, %v9733_v24, -inf }
 0x707   : > { %v4963_v56 = vmax.f32 %v4956_v12, %v4961_v16  ;;  %v4536_v28 = vpop.f32.mrf.mxu1  ;;  %v4887_v16 = vmul.f32 0.6931472, %v6594_v52  ;;  %v4495_v12 = vpop.f32.mrf.mxu3 }
 0x708   : > { %v9742_v43 = vadd.f32 %v4536_v28, %v4488_v25  ;;  %v4861_v25 = vadd.f32 1e-10, %v4845_v51  ;;  %v4400_v51 = vadd.f32 %v9557_v46, %v4195_v49  ;;  %v4197_v49 = vld [vmem:[%s10131_s9 + $0x78] sm:$0xff] }
 0x709   : > { %v4907_v28 = vsub.f32 0.0, %v4887_v16 }
 0x70a   : > { %v4568_v9 = vsel %vm1757_vm3, %v9742_v43, -inf  ;;  %v4921_v48 = vadd.f32 %v4905_v10, %v9742_v43  ;;  %6601 = vlog2.f32 %v4861_v25  ;;  %v4448_v29 = vpop.f32.mrf.mxu2 }
 0x70b   : > { %v4575_v57 = vmax.f32 %v4568_v9, %v4573_v54  ;;  %v6596_v54 = vpop.eup %6595  ;;  %v4449_v8 = vadd.f32 %v4448_v29, %v4400_v51 }
 0x70c   : > { %v9747_v60 = vmul.f32 1.4285715, %v4921_v48  ;;  %v4829_v10 = vmul.f32 0.6931472, %v6596_v54  ;;  %v6598_v37 = vpop.eup %6597 }
 0x70d   : > { %v6600_v48 = vpop.eup %6599  ;;  %v4889_v34 = vmul.f32 0.6931472, %v6598_v37 }
 0x70e   : > { %v4958_v55 = vsel %vm1757_vm3, %v9747_v60, -inf  ;;  %v4846_v0 = vsub.f32 0.0, %v4829_v10 }
 0x70f   : > { %v4965_v19 = vmax.f32 %v4958_v55, %v4963_v56  ;;  %v4539_v36 = vpop.f32.mrf.mxu1  ;;  %v4493_v56 = vadd.f32 %v4492_v26, %v4444_v45  ;;  %v4447_v26 = vadd.f32 %v4446_v1, %v4398_v20  ;;  %v4831_v55 = vmul.f32 0.6931472, %v6600_v48  ;;  %v4497_v35 = vpop.f32.mrf.mxu3 }
 0x710   : > { %v9756_v17 = vadd.f32 %v4539_v36, %v4491_v58  ;;  %v4862_v6 = vadd.f32 1e-10, %v4846_v0  ;;  %v4908_v52 = vsub.f32 0.0, %v4889_v34  ;;  %v4498_v10 = vadd.f32 %v4497_v35, %v4449_v8 }
 0x712   : > { %v4570_v23 = vsel %vm1757_vm3, %v9756_v17, -inf  ;;  %v4922_v63 = vadd.f32 %v4906_v27, %v9756_v17  ;;  %v4496_v27 = vadd.f32 %v4495_v12, %v4447_v26  ;;  %6603 = vlog2.f32 %v4862_v6  ;;  %v4196_v12 = vld [vmem:[%s10131_s9 + $0x70] sm:$0xff] }
 0x713   : > { %v4577_v5 = vmax.f32 %v4570_v23, %v4575_v57  ;;  %v4847_v23 = vsub.f32 0.0, %v4831_v55 }
 0x714   : > { %v9761_v14 = vmul.f32 1.4285715, %v4922_v63 }
 0x715   : > { %v4863_v25 = vadd.f32 1e-10, %v4847_v23 }
 0x716   : > { %v4960_v42 = vsel %vm1757_vm3, %v9761_v14, -inf }
 0x717   : > { %v4967_v11 = vmax.f32 %v4960_v42, %v4965_v19  ;;  %v4541_v30 = vpop.f32.mrf.mxu1  ;;  %v6602_v19 = vpop.eup %6601  ;;  %6605 = vlog2.f32 %v4863_v25 }
 0x718   : > { %v9769_v9 = vadd.f32 %v4541_v30, %v4493_v56  ;;  %v6604_v56 = vpop.eup %6603  ;;  %v4403_v30 = vadd.f32 %v9572_v2, %v4196_v12  ;;  %v4500_v0 = vpop.f32.mrf.mxu3 }
 0x71a   : > { %v4572_v15 = vsel %vm1757_vm3, %v9769_v9, -inf  ;;  %v4923_v57 = vadd.f32 %v4907_v28, %v9769_v9 }
 0x71b   : > { %v4582_v59 = vmax.f32 %v4572_v15, %v4577_v5  ;;  %v4891_v5 = vmul.f32 0.6931472, %v6602_v19 }
 0x71c   : > { %v9774_v50 = vmul.f32 1.4285715, %v4923_v57  ;;  %v4893_v57 = vmul.f32 0.6931472, %v6604_v56 }
 0x71d   : > { %v4909_v42 = vsub.f32 0.0, %v4891_v5  ;;  %v6606_v55 = vpop.eup %6605 }
 0x71e   : > { %v4962_v58 = vsel %vm1757_vm3, %v9774_v50, -inf  ;;  %v4910_v2 = vsub.f32 0.0, %v4893_v57  ;;  %v4895_v51 = vmul.f32 0.6931472, %v6606_v55 }
 0x71f   : > { %v4972_v36 = vmax.f32 %v4962_v58, %v4967_v11  ;;  %v4544_v39 = vpop.f32.mrf.mxu1  ;;  %v4451_v11 = vpop.f32.mrf.mxu2 }
 0x720   : > { %v9782_v54 = vadd.f32 %v4544_v39, %v4496_v27  ;;  %v4452_v26 = vadd.f32 %v4451_v11, %v4403_v30  ;;  %v4911_v12 = vsub.f32 0.0, %v4895_v51 }
 0x722   : > { %v4574_v63 = vsel %vm1757_vm3, %v9782_v54, -inf  ;;  %v4924_v16 = vadd.f32 %v4908_v52, %v9782_v54  ;;  %v4501_v6 = vadd.f32 %v4500_v0, %v4452_v26  ;;  %v4405_v52 = vadd.f32 %v9581_v21, %v4197_v49 }
 0x723   : > { %v4579_v1 = vmax.f32 %v4574_v63, %v4582_v59  ;;  %v4502_v63 = vpop.f32.mrf.mxu3 }
 0x724   : > { %v9787_v45 = vmul.f32 1.4285715, %v4924_v16 }
 0x726   : > { %v4964_v46 = vsel %vm1757_vm3, %v9787_v45, -inf }
 0x727   : > { %v4969_v28 = vmax.f32 %v4964_v46, %v4972_v36  ;;  %v4546_v37 = vpop.f32.mrf.mxu1  ;;  %v4453_v36 = vpop.f32.mrf.mxu2 }
 0x728   : > { %v4547_v20 = vadd.f32 %v4546_v37, %v4498_v10  ;;  %v4454_v5 = vadd.f32 %v4453_v36, %v4405_v52 }
 0x72a   : > { %v4576_v48 = vsel %vm1757_vm3, %v4547_v20, -inf  ;;  %v4925_v15 = vadd.f32 %v4909_v42, %v4547_v20  ;;  %v4503_v8 = vadd.f32 %v4502_v63, %v4454_v5 }
 0x72b   : > { %v4581_v34 = vmax.f32 %v4576_v48, %v4579_v1 }
 0x72c   : > { %v9796_v59 = vmul.f32 1.4285715, %v4925_v15 }
 0x72e   : > { %v4966_v29 = vsel %vm1757_vm3, %v9796_v59, -inf }
 0x72f   : > { %v4971_v58 = vmax.f32 %v4966_v29, %v4969_v28  ;;  %v4549_v27 = vpop.f32.mrf.mxu1 }
 0x730   : > { %v4550_v19 = vadd.f32 %v4549_v27, %v4501_v6 }
 0x732   : > { %v4578_v39 = vsel %vm1757_vm3, %v4550_v19, -inf  ;;  %v4926_v35 = vadd.f32 %v4910_v2, %v4550_v19 }
 0x733   : > { %v4583_v23 = vmax.f32 %v4578_v39, %v4581_v34 }
 0x734   : > { %v4942_v16 = vmul.f32 1.4285715, %v4926_v35 }
 0x736   : > { %v4968_v1 = vsel %vm1757_vm3, %v4942_v16, -inf }
 0x737   : > { %v4973_v25 = vmax.f32 %v4968_v1, %v4971_v58  ;;  %v4551_v46 = vpop.f32.mrf.mxu1 }
 0x738   : > { %v4552_v10 = vadd.f32 %v4551_v46, %v4503_v8 }
 0x73a   : > { %v4580_v42 = vsel %vm1757_vm3, %v4552_v10, -inf  ;;  %v4927_v21 = vadd.f32 %v4911_v12, %v4552_v10 }
 0x73b   : > { %v4584_v56 = vmax.f32 %v4580_v42, %v4583_v23 }
 0x73c   : > { %v4943_v28 = vmul.f32 1.4285715, %v4927_v21 }
 0x73d   : > { %v4585_v37 = vrot.slane %v4584_v56, 4 }
 0x73e   : > { %v4970_v11 = vsel %vm1757_vm3, %v4943_v28, -inf }
 0x73f   : > { %v4586_v30 = vmax.f32 %v4584_v56, %v4585_v37  ;;  %v4974_v0 = vmax.f32 %v4970_v11, %v4973_v25 }
 0x741   : > { %v4587_v48 = vrot.slane %v4586_v30, 2  ;;  %v4975_v15 = vrot.slane %v4974_v0, 4 }
 0x743   : > { %v4588_v57 = vmax.f32 %v4586_v30, %v4587_v48  ;;  %v4976_v34 = vmax.f32 %v4974_v0, %v4975_v15 }
 0x745   : > { %v4589_v26 = vrot.slane %v4588_v57, 1  ;;  %v4977_v49 = vrot.slane %v4976_v34, 2 }
 0x747   : > { %v9808_v29 = vmax.f32 %v4588_v57, %v4589_v26  ;;  %v4978_v6 = vmax.f32 %v4976_v34, %v4977_v49 }
 0x749   : > { %v4606_v2 = vsub.f32 %v4552_v10, %v9808_v29  ;;  %v4979_v55 = vrot.slane %v4978_v6, 1  ;;  %v4605_v58 = vsub.f32 %v4550_v19, %v9808_v29  ;;  %v4604_v27 = vsub.f32 %v4547_v20, %v9808_v29 }
 0x74a   : > { %v4603_v52 = vsub.f32 %v9782_v54, %v9808_v29  ;;  %v4602_v36 = vsub.f32 %v9769_v9, %v9808_v29  ;;  %v4601_v39 = vsub.f32 %v9756_v17, %v9808_v29  ;;  %v4600_v35 = vsub.f32 %v9742_v43, %v9808_v29 }
 0x74b   : > { %v4637_v51 = vmul.f32 1.442695, %v4606_v2  ;;  %v9821_v23 = vmax.f32 %v4978_v6, %v4979_v55  ;;  %v4635_v63 = vmul.f32 1.442695, %v4605_v58  ;;  %v4633_v5 = vmul.f32 1.442695, %v4604_v27 }
 0x74c   : > { %v4599_v20 = vsub.f32 %v9726_v32, %v9808_v29  ;;  %v4631_v17 = vmul.f32 1.442695, %v4603_v52  ;;  %v4629_v32 = vmul.f32 1.442695, %v4602_v36  ;;  %v4627_v46 = vmul.f32 1.442695, %v4601_v39 }
 0x74d   : > { %6607 = vpow2.f32 %v4637_v51  ;;  %v4996_v54 = vsub.f32 %v4943_v28, %v9821_v23  ;;  %v4995_v19 = vsub.f32 %v4942_v16, %v9821_v23  ;;  %v4994_v9 = vsub.f32 %v9796_v59, %v9821_v23 }
 0x74e   : > { %v4993_v43 = vsub.f32 %v9787_v45, %v9821_v23  ;;  %v4992_v1 = vsub.f32 %v9774_v50, %v9821_v23  ;;  %6609 = vpow2.f32 %v4635_v63  ;;  %v4991_v16 = vsub.f32 %v9761_v14, %v9821_v23 }
 0x74f   : > { %v5027_v8 = vmul.f32 1.442695, %v4996_v54  ;;  %v5025_v12 = vmul.f32 1.442695, %v4995_v19  ;;  %6611 = vpow2.f32 %v4633_v5  ;;  %v5023_v25 = vmul.f32 1.442695, %v4994_v9 }
 0x750   : > { %v4990_v59 = vsub.f32 %v9747_v60, %v9821_v23  ;;  %v4597_v45 = vsub.f32 %v9698_v33, %v9808_v29  ;;  %v4989_v50 = vsub.f32 %v9733_v24, %v9821_v23  ;;  %v5021_v42 = vmul.f32 1.442695, %v4993_v43 }
 0x751   : > { %6613 = vpow2.f32 %v5027_v8  ;;  %v4625_v21 = vmul.f32 1.442695, %v4600_v35  ;;  %v4598_v14 = vsub.f32 %v9714_v40, %v9808_v29  ;;  %v5019_v56 = vmul.f32 1.442695, %v4992_v1 }
 0x752   : > { %6615 = vpow2.f32 %v4631_v17  ;;  %v4595_v33 = vsub.f32 %v9666_v13, %v9808_v29  ;;  %v4987_v24 = vsub.f32 %v9705_v38, %v9821_v23  ;;  %v4623_v37 = vmul.f32 1.442695, %v4599_v20 }
 0x753   : > { %v9841_v10 = vpop.eup %6607  ;;  %6617 = vpow2.f32 %v5025_v12  ;;  %v4594_v11 = vsub.f32 %v9632_v41, %v9808_v29  ;;  %v5017_v30 = vmul.f32 1.442695, %v4991_v16  ;;  %v4621_v13 = vmul.f32 1.442695, %v4598_v14 }
 0x754   : > { %4655 = vmatpush.msrb.mxu2 %v9841_v10  ;;  %6619 = vpow2.f32 %v4629_v32  ;;  %v9846_v60 = vpop.eup %6609  ;;  %v5015_v38 = vmul.f32 1.442695, %v4990_v59  ;;  %v4596_v48 = vsub.f32 %v9684_v7, %v9808_v29  ;;  %v4988_v41 = vsub.f32 %v9723_v44, %v9821_v23 }
 0x755   : > { %6621 = vpow2.f32 %v5023_v25  ;;  %v9852_v28 = vpop.eup %6611  ;;  %v4985_v57 = vsub.f32 %v9673_v31, %v9821_v23  ;;  %v4984_v34 = vsub.f32 %v9659_v61, %v9821_v23  ;;  %v4619_v7 = vmul.f32 1.442695, %v4597_v45 }
 0x756   : > { %4656 = vmatpush.msrb.mxu2 %v9846_v60  ;;  %6623 = vpow2.f32 %v4627_v46  ;;  %v5013_v6 = vmul.f32 1.442695, %v4989_v50  ;;  %v4617_v61 = vmul.f32 1.442695, %v4596_v48  ;;  %v5011_v44 = vmul.f32 1.442695, %v4988_v41 }
 0x757   : > { %v9857_v40 = vpop.eup %6613  ;;  %6625 = vpow2.f32 %v5021_v42  ;;  %v4986_v55 = vsub.f32 %v9694_v22, %v9821_v23  ;;  %v4615_v27 = vmul.f32 1.442695, %v4595_v33  ;;  %v4593_v52 = vsub.f32 %v9616_v18, %v9808_v29  ;;  %v4644_v48 = vld [vmem:[%s10205_s27 + $0x28] sm:$0xff]  ;;  %v4645_v41 = vld [vmem:[%s10205_s27 + $0x30] sm:$0xff] }
 0x758   : > { %v9859_v0 = vpop.eup %6615  ;;  %4657 = vmatpush.msrb.mxu2 %v9852_v28  ;;  %5045 = vmatpush.msrb.mxu3 %v9857_v40  ;;  %6627 = vpow2.f32 %v4625_v21  ;;  %v5009_v39 = vmul.f32 1.442695, %v4987_v24  ;;  %v4613_v22 = vmul.f32 1.442695, %v4594_v11  ;;  %v4592_v51 = vsub.f32 %v9618_v3, %v9808_v29  ;;  %v4640_v11 = vld [vmem:[%s10205_s27 + $0x8] sm:$0xff] }
 0x759   : > { %v9865_v15 = vpop.eup %6617  ;;  %6629 = vpow2.f32 %v5019_v56  ;;  %v5007_v5 = vmul.f32 1.442695, %v4986_v55  ;;  %v4611_v20 = vmul.f32 1.442695, %v4593_v52  ;;  %v4591_v54 = vsub.f32 %v9589_v47, %v9808_v29  ;;  %v4639_v56 = vld [vmem:[%s10205_s27] sm:$0xff]  ;;  %v4652_v55 = vld [vmem:[%s10205_s27 + $0x68] sm:$0xff] }
 0x75a   : > { %v9873_v26 = vpop.eup %6619  ;;  %4658 = vmatpush.msrb.mxu2 %v9859_v0  ;;  %5046 = vmatpush.msrb.mxu3 %v9865_v15  ;;  %6631 = vpow2.f32 %v4623_v37  ;;  %v5005_v9 = vmul.f32 1.442695, %v4985_v57  ;;  %v4983_v3 = vsub.f32 %v9651_v4, %v9821_v23  ;;  %v4609_v43 = vmul.f32 1.442695, %v4592_v51  ;;  %v4646_v57 = vld [vmem:[%s10205_s27 + $0x38] sm:$0xff] }
 0x75b   : > { %v9877_v49 = vpop.eup %6621  ;;  %6633 = vpow2.f32 %v5017_v30  ;;  %v5003_v8 = vmul.f32 1.442695, %v4984_v34  ;;  %v4982_v47 = vsub.f32 %v9638_v53, %v9821_v23  ;;  %v4607_v4 = vmul.f32 1.442695, %v4591_v54  ;;  %v4641_v30 = vld [vmem:[%s10205_s27 + $0x10] sm:$0xff]  ;;  %v4647_v34 = vld [vmem:[%s10205_s27 + $0x40] sm:$0xff] }
 0x75c   : > { %v9879_v2 = vpop.eup %6623  ;;  %4659 = vmatpush.msrb.mxu2 %v9873_v26  ;;  %5047 = vmatpush.msrb.mxu3 %v9877_v49  ;;  %6635 = vpow2.f32 %v4621_v13  ;;  %v5001_v32 = vmul.f32 1.442695, %v4983_v3  ;;  %v4981_v25 = vsub.f32 %v9647_v62, %v9821_v23  ;;  %v4642_v13 = vld [vmem:[%s10205_s27 + $0x18] sm:$0xff] }
 0x75d   : > { %v9883_v31 = vpop.eup %6625  ;;  %6637 = vpow2.f32 %v5015_v38  ;;  %v4999_v59 = vmul.f32 1.442695, %v4982_v47  ;;  %v4643_v38 = vld [vmem:[%s10205_s27 + $0x20] sm:$0xff]  ;;  %v4654_v52 = vld [vmem:[%s10205_s27 + $0x78] sm:$0xff] }
 0x75e   : > { %v9887_v58 = vpop.eup %6627  ;;  %4660 = vmatpush.msrb.mxu2 %v9879_v2  ;;  %5048 = vmatpush.msrb.mxu3 %v9883_v31  ;;  %6639 = vpow2.f32 %v4619_v7  ;;  %v4997_v62 = vmul.f32 1.442695, %v4981_v25  ;;  %v4648_v7 = vld [vmem:[%s10205_s27 + $0x48] sm:$0xff] }
 0x75f   : > { %v9893_v36 = vpop.eup %6629  ;;  %6641 = vpow2.f32 %v5013_v6  ;;  %v4649_v6 = vld [vmem:[%s10205_s27 + $0x50] sm:$0xff] }
 0x760   : > { %v9895_v35 = vpop.eup %6631  ;;  %4661 = vmatpush.msrb.mxu2 %v9887_v58  ;;  %5049 = vmatpush.msrb.mxu3 %v9893_v36  ;;  %6643 = vpow2.f32 %v4617_v61  ;;  %v4650_v61 = vld [vmem:[%s10205_s27 + $0x58] sm:$0xff] }
 0x761   : > { %v9901_v63 = vpop.eup %6633  ;;  %6645 = vpow2.f32 %v5011_v44  ;;  %v4651_v44 = vld [vmem:[%s10205_s27 + $0x60] sm:$0xff] }
 0x762   : > { %v9903_v18 = vpop.eup %6635  ;;  %4662 = vmatpush.msrb.mxu2 %v9895_v35  ;;  %5050 = vmatpush.msrb.mxu3 %v9901_v63  ;;  %6647 = vpow2.f32 %v4615_v27  ;;  %v4653_v27 = vld [vmem:[%s10205_s27 + $0x70] sm:$0xff] }
 0x763   : > { %v9909_v19 = vpop.eup %6637  ;;  %6649 = vpow2.f32 %v5009_v39 }
 0x764   : > { %v9913_v17 = vpop.eup %6639  ;;  %4663 = vmatpush.msrb.mxu2 %v9903_v18  ;;  %5051 = vmatpush.msrb.mxu3 %v9909_v19  ;;  %6651 = vpow2.f32 %v4613_v22 }
 0x765   : > { %v9917_v1 = vpop.eup %6641  ;;  %6653 = vpow2.f32 %v5007_v5 }
 0x766   : > { %v9921_v29 = vpop.eup %6643  ;;  %4664 = vmatpush.msrb.mxu2 %v9913_v17  ;;  %5052 = vmatpush.msrb.mxu3 %v9917_v1  ;;  %6655 = vpow2.f32 %v4611_v20 }
 0x767   : > { %v9925_v12 = vpop.eup %6645  ;;  %6657 = vpow2.f32 %v5005_v9 }
 0x768   : > { %v9929_v16 = vpop.eup %6647  ;;  %4665 = vmatpush.msrb.mxu2 %v9921_v29  ;;  %5053 = vmatpush.msrb.mxu3 %v9925_v12  ;;  %6659 = vpow2.f32 %v4609_v43 }
 0x769   : > { %v9933_v53 = vpop.eup %6649  ;;  %6661 = vpow2.f32 %v5003_v8 }
 0x76a   : > { %v9935_v46 = vpop.eup %6651  ;;  %4666 = vmatpush.msrb.mxu2 %v9929_v16  ;;  %5054 = vmatpush.msrb.mxu3 %v9933_v53  ;;  %6663 = vpow2.f32 %v4607_v4 }
 0x76b   : > { %v9939_v45 = vpop.eup %6653  ;;  %6665 = vpow2.f32 %v5001_v32 }
 0x76c   : > { %v9941_v23 = vpop.eup %6655  ;;  %4667 = vmatpush.msrb.mxu2 %v9935_v46  ;;  %5055 = vmatpush.msrb.mxu3 %v9939_v45  ;;  %6667 = vpow2.f32 %v4999_v59 }
 0x76d   : > { %v9945_v50 = vpop.eup %6657  ;;  %6669 = vpow2.f32 %v4997_v62 }
 0x76e   : > { %v9947_v42 = vpop.eup %6659  ;;  %4668 = vmatpush.msrb.mxu2 %v9941_v23  ;;  %5056 = vmatpush.msrb.mxu3 %v9945_v50 }
 0x76f   : > { %v9951_v21 = vpop.eup %6661 }
 0x770   : > { %v9953_v14 = vpop.eup %6663  ;;  %4669 = vmatpush.msrb.mxu2 %v9947_v42  ;;  %5057 = vmatpush.msrb.mxu3 %v9951_v21 }
 0x771   : > { %v9960_v33 = vpop.eup %6665 }
 0x772   : > { %4670 = vmatpush.msrb.mxu2 %v9953_v14  ;;  %5058 = vmatpush.msrb.mxu3 %v9960_v33  ;;  %v9964_v24 = vpop.eup %6667 }
 0x773   : > { %4671 = vmatmul.f32.vlgmr.msrb.gmra.mxu2 %v4639_v56  ;;  %v6670_v37 = vpop.eup %6669 }
 0x774   : > { %5059 = vmatpush.msrb.mxu3 %v9964_v24 }
 0x776   : > { %5060 = vmatpush.msrb.mxu3 %v6670_v37 }
 0x777   : > { %5061 = vmatmul.f32.vlgmr.msrb.gmra.mxu3 %v4639_v56 }
 0x77b   : > { %4674 = vmatmul.f32.gmra.mxu2 %v4640_v11 }
 0x77f   : > { %5064 = vmatmul.f32.gmra.mxu3 %v4640_v11 }
 0x783   : > { %4677 = vmatmul.f32.gmra.mxu2 %v4641_v30 }
 0x787   : > { %5067 = vmatmul.f32.gmra.mxu3 %v4641_v30 }
 0x78b   : > { %4680 = vmatmul.f32.gmra.mxu2 %v4642_v13 }
 0x78f   : > { %5070 = vmatmul.f32.gmra.mxu3 %v4642_v13 }
 0x793   : > { %4683 = vmatmul.f32.gmra.mxu2 %v4643_v38 }
 0x797   : > { %5073 = vmatmul.f32.gmra.mxu3 %v4643_v38 }
 0x79b   : > { %4686 = vmatmul.f32.gmra.mxu2 %v4644_v48 }
 0x79f   : > { %5076 = vmatmul.f32.gmra.mxu3 %v4644_v48 }
 0x7a3   : > { %4689 = vmatmul.f32.gmra.mxu2 %v4645_v41 }
 0x7a7   : > { %5079 = vmatmul.f32.gmra.mxu3 %v4645_v41 }
 0x7ab   : > { %4692 = vmatmul.f32.gmra.mxu2 %v4646_v57 }
 0x7af   : > { %5082 = vmatmul.f32.gmra.mxu3 %v4646_v57 }
 0x7b3   : > { %4695 = vmatmul.f32.gmra.mxu2 %v4647_v34 }
 0x7b7   : > { %5085 = vmatmul.f32.gmra.mxu3 %v4647_v34 }
 0x7bb   : > { %4698 = vmatmul.f32.gmra.mxu2 %v4648_v7 }
 0x7bf   : > { %5088 = vmatmul.f32.gmra.mxu3 %v4648_v7 }
 0x7c3   : > { %4701 = vmatmul.f32.gmra.mxu2 %v4649_v6 }
 0x7c7   : > { %5091 = vmatmul.f32.gmra.mxu3 %v4649_v6 }
 0x7cb   : > { %4704 = vmatmul.f32.gmra.mxu2 %v4650_v61 }
 0x7cf   : > { %5094 = vmatmul.f32.gmra.mxu3 %v4650_v61 }
 0x7d3   : > { %4707 = vmatmul.f32.gmra.mxu2 %v4651_v44 }
 0x7d7   : > { %5097 = vmatmul.f32.gmra.mxu3 %v4651_v44 }
 0x7db   : > { %4710 = vmatmul.f32.gmra.mxu2 %v4652_v55 }
 0x7df   : > { %5100 = vmatmul.f32.gmra.mxu3 %v4652_v55 }
 0x7e3   : > { %4713 = vmatmul.f32.gmra.mxu2 %v4653_v27 }
 0x7e7   : > { %5103 = vmatmul.f32.gmra.mxu3 %v4653_v27 }
 0x7eb   : > { %4716 = vmatmul.f32.gmra.mxu2 %v4654_v52 }
 0x7ef   : > { %5106 = vmatmul.f32.gmra.mxu3 %v4654_v52 }
 0x7f6   : > { %v4672_v39 = vpop.f32.mrf.mxu2 }
 0x7f7   : > { %6671 = vrcp.f32 %v4672_v39 }
 0x7fa   : > { %v5062_v22 = vpop.f32.mrf.mxu3 }
 0x7fb   : > { %6673 = vrcp.f32 %v5062_v22 }
 0x7fd   : > { %v6672_v51 = vpop.eup %6671 }
 0x7fe   : > { %v4736_v5 = vmul.f32 %v6672_v51, %v9953_v14  ;;  %v4675_v20 = vpop.f32.mrf.mxu2 }
 0x7ff   : > { %6675 = vrcp.f32 %v4675_v20 }
 0x800   : > { %4752 = vst.msk [vmem:[%s6899_s13] sm:$0xff] %vm1757_vm3, %v4736_v5 }
 0x801   : > { %v6674_v54 = vpop.eup %6673 }
 0x802   : > { %v5126_v9 = vmul.f32 %v6674_v54, %v6670_v37  ;;  %v5065_v3 = vpop.f32.mrf.mxu3 }
 0x803   : > { %6677 = vrcp.f32 %v5065_v3 }
 0x804   : > { %5142 = vst.msk [vmem:[%s6894_s28] sm:$0xff] %vm1757_vm3, %v5126_v9 }
 0x805   : > { %v6676_v43 = vpop.eup %6675 }
 0x806   : > { %v4737_v8 = vmul.f32 %v6676_v43, %v9947_v42  ;;  %v4678_v47 = vpop.f32.mrf.mxu2 }
 0x807   : > { %6679 = vrcp.f32 %v4678_v47 }
 0x808   : > { %4753 = vst.msk [vmem:[%s6899_s13 + $0x8] sm:$0xff] %vm1757_vm3, %v4737_v8 }
 0x809   : > { %v6678_v4 = vpop.eup %6677 }
 0x80a   : > { %v5127_v32 = vmul.f32 %v6678_v4, %v9964_v24  ;;  %v5068_v25 = vpop.f32.mrf.mxu3 }
 0x80b   : > { %6681 = vrcp.f32 %v5068_v25 }
 0x80c   : > { %5143 = vst.msk [vmem:[%s6894_s28 + $0x8] sm:$0xff] %vm1757_vm3, %v5127_v32 }
 0x80d   : > { %v6680_v59 = vpop.eup %6679 }
 0x80e   : > { %v4738_v62 = vmul.f32 %v6680_v59, %v9941_v23  ;;  %v4681_v14 = vpop.f32.mrf.mxu2 }
 0x80f   : > { %6683 = vrcp.f32 %v4681_v14 }
 0x810   : > { %4754 = vst.msk [vmem:[%s6899_s13 + $0x10] sm:$0xff] %vm1757_vm3, %v4738_v62 }
 0x811   : > { %v6682_v42 = vpop.eup %6681 }
 0x812   : > { %v5128_v56 = vmul.f32 %v6682_v42, %v9960_v33  ;;  %v5071_v37 = vpop.f32.mrf.mxu3 }
 0x813   : > { %6685 = vrcp.f32 %v5071_v37 }
 0x814   : > { %5144 = vst.msk [vmem:[%s6894_s28 + $0x10] sm:$0xff] %vm1757_vm3, %v5128_v56 }
 0x815   : > { %v6684_v24 = vpop.eup %6683 }
 0x816   : > { %v4739_v11 = vmul.f32 %v6684_v24, %v9935_v46  ;;  %v4684_v30 = vpop.f32.mrf.mxu2 }
 0x817   : > { %6687 = vrcp.f32 %v4684_v30 }
 0x818   : > { %4755 = vst.msk [vmem:[%s6899_s13 + $0x18] sm:$0xff] %vm1757_vm3, %v4739_v11 }
 0x819   : > { %v6686_v23 = vpop.eup %6685 }
 0x81a   : > { %v5129_v13 = vmul.f32 %v6686_v23, %v9951_v21  ;;  %v5074_v38 = vpop.f32.mrf.mxu3 }
 0x81b   : > { %6689 = vrcp.f32 %v5074_v38 }
 0x81c   : > { %5145 = vst.msk [vmem:[%s6894_s28 + $0x18] sm:$0xff] %vm1757_vm3, %v5129_v13 }
 0x81d   : > { %v6688_v33 = vpop.eup %6687 }
 0x81e   : > { %v4740_v48 = vmul.f32 %v6688_v33, %v9929_v16  ;;  %v4687_v41 = vpop.f32.mrf.mxu2 }
 0x81f   : > { %6691 = vrcp.f32 %v4687_v41 }
 0x820   : > { %4756 = vst.msk [vmem:[%s6899_s13 + $0x20] sm:$0xff] %vm1757_vm3, %v4740_v48 }
 0x821   : > { %v6690_v46 = vpop.eup %6689 }
 0x822   : > { %v5130_v57 = vmul.f32 %v6690_v46, %v9945_v50  ;;  %v5077_v34 = vpop.f32.mrf.mxu3 }
 0x823   : > { %6693 = vrcp.f32 %v5077_v34 }
 0x824   : > { %5146 = vst.msk [vmem:[%s6894_s28 + $0x20] sm:$0xff] %vm1757_vm3, %v5130_v57 }
 0x825   : > { %v6692_v21 = vpop.eup %6691 }
 0x826   : > { %v4741_v7 = vmul.f32 %v6692_v21, %v9921_v29  ;;  %v4690_v6 = vpop.f32.mrf.mxu2 }
 0x827   : > { %6695 = vrcp.f32 %v4690_v6 }
 0x828   : > { %4757 = vst.msk [vmem:[%s6899_s13 + $0x28] sm:$0xff] %vm1757_vm3, %v4741_v7 }
 0x829   : > { %v6694_v16 = vpop.eup %6693 }
 0x82a   : > { %v5131_v61 = vmul.f32 %v6694_v16, %v9939_v45  ;;  %v5080_v44 = vpop.f32.mrf.mxu3 }
 0x82b   : > { %6697 = vrcp.f32 %v5080_v44 }
 0x82c   : > { %5147 = vst.msk [vmem:[%s6894_s28 + $0x28] sm:$0xff] %vm1757_vm3, %v5131_v61 }
 0x82d   : > { %v6696_v50 = vpop.eup %6695 }
 0x82e   : > { %v4742_v55 = vmul.f32 %v6696_v50, %v9913_v17  ;;  %v4693_v27 = vpop.f32.mrf.mxu2 }
 0x82f   : > { %6699 = vrcp.f32 %v4693_v27 }
 0x830   : > { %4758 = vst.msk [vmem:[%s6899_s13 + $0x30] sm:$0xff] %vm1757_vm3, %v4742_v55 }
 0x831   : > { %v6698_v29 = vpop.eup %6697 }
 0x832   : > { %v5132_v52 = vmul.f32 %v6698_v29, %v9933_v53  ;;  %v5083_v39 = vpop.f32.mrf.mxu3 }
 0x833   : > { %6701 = vrcp.f32 %v5083_v39 }
 0x834   : > { %5148 = vst.msk [vmem:[%s6894_s28 + $0x30] sm:$0xff] %vm1757_vm3, %v5132_v52 }
 0x835   : > { %v6700_v45 = vpop.eup %6699 }
 0x836   : > { %v4743_v22 = vmul.f32 %v6700_v45, %v9903_v18  ;;  %v4696_v51 = vpop.f32.mrf.mxu2 }
 0x837   : > { %6703 = vrcp.f32 %v4696_v51 }
 0x838   : > { %4759 = vst.msk [vmem:[%s6899_s13 + $0x38] sm:$0xff] %vm1757_vm3, %v4743_v22 }
 0x839   : > { %v6702_v17 = vpop.eup %6701 }
 0x83a   : > { %v5133_v5 = vmul.f32 %v6702_v17, %v9925_v12  ;;  %v5086_v20 = vpop.f32.mrf.mxu3 }
 0x83b   : > { %6705 = vrcp.f32 %v5086_v20 }
 0x83c   : > { %5149 = vst.msk [vmem:[%s6894_s28 + $0x38] sm:$0xff] %vm1757_vm3, %v5133_v5 }
 0x83d   : > { %v6704_v53 = vpop.eup %6703 }
 0x83e   : > { %v4744_v54 = vmul.f32 %v6704_v53, %v9895_v35  ;;  %v4699_v9 = vpop.f32.mrf.mxu2 }
 0x83f   : > { %6707 = vrcp.f32 %v4699_v9 }
 0x840   : > { %4760 = vst.msk [vmem:[%s6899_s13 + $0x40] sm:$0xff] %vm1757_vm3, %v4744_v54 }
 0x841   : > { %v6706_v18 = vpop.eup %6705 }
 0x842   : > { %v5134_v3 = vmul.f32 %v6706_v18, %v9917_v1  ;;  %v5089_v43 = vpop.f32.mrf.mxu3 }
 0x843   : > { %6709 = vrcp.f32 %v5089_v43 }
 0x844   : > { %5150 = vst.msk [vmem:[%s6894_s28 + $0x40] sm:$0xff] %vm1757_vm3, %v5134_v3 }
 0x845   : > { %v6708_v12 = vpop.eup %6707 }
 0x846   : > { %v4745_v8 = vmul.f32 %v6708_v12, %v9887_v58  ;;  %v4702_v47 = vpop.f32.mrf.mxu2 }
 0x847   : > { %6711 = vrcp.f32 %v4702_v47 }
 0x848   : > { %4761 = vst.msk [vmem:[%s6899_s13 + $0x48] sm:$0xff] %vm1757_vm3, %v4745_v8 }
 0x849   : > { %v6710_v35 = vpop.eup %6709 }
 0x84a   : > { %v5135_v4 = vmul.f32 %v6710_v35, %v9909_v19  ;;  %v5092_v32 = vpop.f32.mrf.mxu3 }
 0x84b   : > { %6713 = vrcp.f32 %v5092_v32 }
 0x84c   : > { %5151 = vst.msk [vmem:[%s6894_s28 + $0x48] sm:$0xff] %vm1757_vm3, %v5135_v4 }
 0x84d   : > { %v6712_v1 = vpop.eup %6711 }
 0x84e   : > { %v4746_v25 = vmul.f32 %v6712_v1, %v9879_v2  ;;  %v4705_v59 = vpop.f32.mrf.mxu2 }
 0x84f   : > { %6715 = vrcp.f32 %v4705_v59 }
 0x850   : > { %4762 = vst.msk [vmem:[%s6899_s13 + $0x50] sm:$0xff] %vm1757_vm3, %v4746_v25 }
 0x851   : > { %v6714_v58 = vpop.eup %6713 }
 0x852   : > { %v5136_v62 = vmul.f32 %v6714_v58, %v9901_v63  ;;  %v5095_v14 = vpop.f32.mrf.mxu3 }
 0x853   : > { %6717 = vrcp.f32 %v5095_v14 }
 0x854   : > { %5152 = vst.msk [vmem:[%s6894_s28 + $0x50] sm:$0xff] %vm1757_vm3, %v5136_v62 }
 0x855   : > { %v6716_v19 = vpop.eup %6715 }
 0x856   : > { %v4747_v42 = vmul.f32 %v6716_v19, %v9873_v26  ;;  %v4708_v56 = vpop.f32.mrf.mxu2 }
 0x857   : > { %6719 = vrcp.f32 %v4708_v56 }
 0x858   : > { %4763 = vst.msk [vmem:[%s6899_s13 + $0x58] sm:$0xff] %vm1757_vm3, %v4747_v42 }
 0x859   : > { %v6718_v2 = vpop.eup %6717 }
 0x85a   : > { %v5137_v37 = vmul.f32 %v6718_v2, %v9893_v36  ;;  %v5098_v24 = vpop.f32.mrf.mxu3 }
 0x85b   : > { %6721 = vrcp.f32 %v5098_v24 }
 0x85c   : > { %5153 = vst.msk [vmem:[%s6894_s28 + $0x58] sm:$0xff] %vm1757_vm3, %v5137_v37 }
 0x85d   : > { %v6720_v63 = vpop.eup %6719 }
 0x85e   : > { %v4748_v11 = vmul.f32 %v6720_v63, %v9859_v0  ;;  %v4711_v30 = vpop.f32.mrf.mxu2 }
 0x85f   : > { %6723 = vrcp.f32 %v4711_v30 }
 0x860   : > { %4764 = vst.msk [vmem:[%s6899_s13 + $0x60] sm:$0xff] %vm1757_vm3, %v4748_v11 }
 0x861   : > { %v6722_v26 = vpop.eup %6721 }
 0x862   : > { %v5138_v23 = vmul.f32 %v6722_v26, %v9883_v31  ;;  %v5101_v13 = vpop.f32.mrf.mxu3 }
 0x863   : > { %6725 = vrcp.f32 %v5101_v13 }
 0x864   : > { %5154 = vst.msk [vmem:[%s6894_s28 + $0x60] sm:$0xff] %vm1757_vm3, %v5138_v23 }
 0x865   : > { %v6724_v36 = vpop.eup %6723 }
 0x866   : > { %v4749_v38 = vmul.f32 %v6724_v36, %v9852_v28  ;;  %v4714_v33 = vpop.f32.mrf.mxu2 }
 0x867   : > { %6727 = vrcp.f32 %v4714_v33 }
 0x868   : > { %4765 = vst.msk [vmem:[%s6899_s13 + $0x68] sm:$0xff] %vm1757_vm3, %v4749_v38 }
 0x869   : > { %v6726_v0 = vpop.eup %6725 }
 0x86a   : > { %v5139_v48 = vmul.f32 %v6726_v0, %v9877_v49  ;;  %v5104_v41 = vpop.f32.mrf.mxu3 }
 0x86b   : > { %6729 = vrcp.f32 %v5104_v41 }
 0x86c   : > { %5155 = vst.msk [vmem:[%s6894_s28 + $0x68] sm:$0xff] %vm1757_vm3, %v5139_v48 }
 0x86d   : > { %v6728_v31 = vpop.eup %6727 }
 0x86e   : > { %v4750_v46 = vmul.f32 %v6728_v31, %v9846_v60  ;;  %v4717_v57 = vpop.f32.mrf.mxu2 }
 0x86f   : > { %6731 = vrcp.f32 %v4717_v57 }
 0x870   : > { %4766 = vst.msk [vmem:[%s6899_s13 + $0x70] sm:$0xff] %vm1757_vm3, %v4750_v46 }
 0x871   : > { %v6730_v28 = vpop.eup %6729 }
 0x872   : > { %v5140_v34 = vmul.f32 %v6730_v28, %v9865_v15  ;;  %v5107_v21 = vpop.f32.mrf.mxu3 }
 0x873   : > { %6733 = vrcp.f32 %v5107_v21 }
 0x874   : > { %5156 = vst.msk [vmem:[%s6894_s28 + $0x70] sm:$0xff] %vm1757_vm3, %v5140_v34 }
 0x875   : > { %v6732_v49 = vpop.eup %6731 }
 0x876   : > { %v4751_v7 = vmul.f32 %v6732_v49, %v9841_v10 }
 0x878   : > { %4767 = vst.msk [vmem:[%s6899_s13 + $0x78] sm:$0xff] %vm1757_vm3, %v4751_v7 }
 0x879   : > { %v6734_v6 = vpop.eup %6733 }
 0x87a   : > { %v5141_v16 = vmul.f32 %v6734_v6, %v9857_v40 }
 0x87c   : > { %5157 = vst.msk [vmem:[%s6894_s28 + $0x78] sm:$0xff] %vm1757_vm3, %v5141_v16 }
 0x87d PF: > { %s10206_s19 = sld [smem:[#allocation5_spill]] }
 0x87e   : > { %s10207_s21 = sld [smem:[#allocation3_spill]] }
 0x87f   : > { %s10208_s22 = sld [smem:[#allocation4_spill]] }
 0x880   : > { %s10209_s23 = sld [smem:[#allocation6_spill]] }
 0x881   : > { %s10210_s24 = sld [smem:[#allocation7_spill]] }
 0x883   : > { %s23_s25 = sadd.s32 1, %s10206_s19  }
 0x884   : > { %p20_p9 = scmp.ge.s32.totalorder %s23_s25, 6  }
 0x886   :  { %22 = sbr.rel (!%p20_p9) target bundleno = 3 (0x3), region = 120 }

</bundles_post_ra>
